<compile_context>
chip_gen: v5e
topology: v5e:2x2
jax: 0.10.0
libtpu: 0.0.40
codegen_flags: <defaults>
</compile_context>

<pallas_src>
import functools

import numpy as np
import jax
import jax.numpy as jnp
from jax import lax
from jax.experimental import pallas as pl
from jax.experimental.pallas import tpu as pltpu

F32 = jnp.float32
BF16 = jnp.bfloat16
LANE = 128
CH_PAD = 16                      # channel padding (bf16 sublane packing)


def _round_up(x, n):
    return ((x + n - 1) // n) * n


def _vmem_limit_bytes():
    cap = 64 * 1024 * 1024
    try:
        cap = int(pltpu.get_tpu_info().vmem_capacity_bytes)
    except Exception:
        pass
    return min((cap * 3) // 4, 48 * 1024 * 1024)


_VMEM_LIMIT = _vmem_limit_bytes()


def _compiler_params(sem):
    return pltpu.CompilerParams(dimension_semantics=sem,
                                vmem_limit_bytes=_VMEM_LIMIT)


def _pick_tile(hwp):
    for t in (2048, 1024, 512, 256, 128):
        if t <= hwp and hwp % t == 0:
            return t
    return LANE


def _pad_bias(b, rows):
    b = b.astype(F32)
    return jnp.pad(b, (0, rows - b.shape[0])).reshape(rows, 1)


# ----------------------------------------------------------------------------
# Kernel 1: conv1 (1x1, n_feat -> f), bf16 output, channels padded to fp
# ----------------------------------------------------------------------------
def _conv1_kernel(w_ref, b_ref, x_ref, o_ref):
    xb = x_ref[0].astype(BF16)                                    # [C, tile]
    acc = jnp.dot(w_ref[...], xb, preferred_element_type=F32) + b_ref[...]
    o_ref[0] = acc.astype(o_ref.dtype)


def pallas_conv1(w1, b1, x3, fp, tile):
    B, C, HWp = x3.shape
    f = w1.shape[0]
    wmat = jnp.pad(w1.reshape(f, C).astype(F32), ((0, fp - f), (0, 0))).astype(BF16)
    return pl.pallas_call(
        _conv1_kernel,
        out_shape=jax.ShapeDtypeStruct((B, fp, HWp), BF16),
        grid=(B, HWp // tile),
        in_specs=[
            pl.BlockSpec((fp, C), lambda bi, mi: (0, 0)),          # weight, resident
            pl.BlockSpec((fp, 1), lambda bi, mi: (0, 0)),          # bias, resident
            pl.BlockSpec((1, C, tile), lambda bi, mi: (bi, 0, mi)),
        ],
        out_specs=pl.BlockSpec((1, fp, tile), lambda bi, mi: (bi, 0, mi)),
        compiler_params=_compiler_params(("parallel", "parallel")),
    )(wmat, _pad_bias(b1, fp), x3)


# ----------------------------------------------------------------------------
# Kernel 2: conv2 (3x3, stride 2, pad 0) as an im2col GEMM
# ----------------------------------------------------------------------------
def _gemm_bias_kernel(w_ref, b_ref, a_ref, o_ref):
    acc = jnp.dot(w_ref[...], a_ref[...], preferred_element_type=F32) + b_ref[...]
    o_ref[...] = acc.astype(o_ref.dtype)


def pallas_conv2(w2, b2, c1_bf, B, H, W, fp):
    f = w2.shape[0]
    HW = H * W
    x4 = c1_bf[:, :, :HW].reshape(B, fp, H, W)
    Ho = (H - 3) // 2 + 1
    Wo = (W - 3) // 2 + 1
    taps = []
    for ky in range(3):
        for kx in range(3):
            taps.append(x4[:, :, ky:ky + 2 * (Ho - 1) + 1:2,
                           kx:kx + 2 * (Wo - 1) + 1:2])
    patches = jnp.stack(taps, axis=2)                              # [B, fp, 9, Ho, Wo]
    patches = patches.transpose(1, 2, 0, 3, 4).reshape(fp * 9, B * Ho * Wo)
    M = B * Ho * Wo
    Mp = _round_up(M, LANE)
    if Mp != M:
        patches = jnp.pad(patches, ((0, 0), (0, Mp - M)))
    wmat = jnp.pad(w2.astype(F32), ((0, fp - f), (0, fp - f), (0, 0), (0, 0))
                   ).reshape(fp, fp * 9).astype(BF16)
    out = pl.pallas_call(
        _gemm_bias_kernel,
        out_shape=jax.ShapeDtypeStruct((fp, Mp), F32),
        grid=(1,),
        in_specs=[
            pl.BlockSpec((fp, fp * 9), lambda i: (0, 0)),
            pl.BlockSpec((fp, 1), lambda i: (0, 0)),
            pl.BlockSpec((fp * 9, Mp), lambda i: (0, 0)),
        ],
        out_specs=pl.BlockSpec((fp, Mp), lambda i: (0, 0)),
        compiler_params=_compiler_params(("arbitrary",)),
    )(wmat, _pad_bias(b2, fp), patches)
    out = out[:, :M] if Mp != M else out
    return out, Ho, Wo


# ----------------------------------------------------------------------------
# Kernel 3: fused small-map chain  conv_max -> relu -> conv3 -> relu -> conv3_
# All operands VMEM-resident; 3x3/pad-1 convs done per-tap via shift matrices.
# ----------------------------------------------------------------------------
def _chain_kernel(s_ref, wm_ref, bm_ref, w3_ref, b3_ref, w3p_ref, b3p_ref,
                  v_ref, o_ref, *, fp, P, B):
    BP = B * P

    def conv3x3_vmem(a_bf, w_ref, b_ref, relu):
        acc = jnp.zeros((fp, BP), F32)
        for t in range(9):                                         # unrolled, tiny dots
            shifted = jnp.dot(a_bf, s_ref[t],
                              preferred_element_type=F32).astype(BF16)
            acc = acc + jnp.dot(w_ref[t], shifted, preferred_element_type=F32)
        acc = acc + b_ref[...]
        return jnp.maximum(acc, 0.0) if relu else acc

    a = conv3x3_vmem(v_ref[...], wm_ref, bm_ref, True).astype(BF16)
    a = conv3x3_vmem(a, w3_ref, b3_ref, True).astype(BF16)
    a = conv3x3_vmem(a, w3p_ref, b3p_ref, False)
    for bb in range(B):                                            # [B, fp, P] output
        o_ref[bb] = a[:, bb * P:(bb + 1) * P].astype(o_ref.dtype)


def _shift_matrices(h, w):
    """S[t, q, p] = 1 iff input position q feeds output position p for 3x3/pad-1 tap t."""
    P = h * w
    S = np.zeros((9, P, P), np.float32)
    for ky in range(3):
        for kx in range(3):
            t = ky * 3 + kx
            dy, dx = ky - 1, kx - 1
            for i in range(h):
                for j in range(w):
                    ii, jj = i + dy, j + dx
                    if 0 <= ii < h and 0 <= jj < w:
                        S[t, ii * w + jj, i * w + j] = 1.0
    return S


def _shift_stack(B, h, w):
    S = _shift_matrices(h, w)
    eye = np.eye(B, dtype=np.float32)
    return np.stack([np.kron(eye, S[t]) for t in range(9)], 0)     # [9, B*P, B*P]


def _tap_stack(w, fp):
    f = w.shape[0]
    wp_ = jnp.pad(w.astype(F32), ((0, fp - f), (0, fp - f), (0, 0), (0, 0)))
    return wp_.transpose(2, 3, 0, 1).reshape(9, fp, fp).astype(BF16)


def pallas_small_chain(wm, bm, w3, b3, w3p, b3p, v_bf, B, hp, wp, fp):
    P = hp * wp
    BP = B * P
    S = jnp.asarray(_shift_stack(B, hp, wp), BF16)                 # constant, tiny
    kernel = functools.partial(_chain_kernel, fp=fp, P=P, B=B)
    return pl.pallas_call(
        kernel,
        out_shape=jax.ShapeDtypeStruct((B, fp, P), BF16),
        grid=(1,),
        in_specs=[
            pl.BlockSpec((9, BP, BP), lambda i: (0, 0, 0)),
            pl.BlockSpec((9, fp, fp), lambda i: (0, 0, 0)),
            pl.BlockSpec((fp, 1), lambda i: (0, 0)),
            pl.BlockSpec((9, fp, fp), lambda i: (0, 0, 0)),
            pl.BlockSpec((fp, 1), lambda i: (0, 0)),
            pl.BlockSpec((9, fp, fp), lambda i: (0, 0, 0)),
            pl.BlockSpec((fp, 1), lambda i: (0, 0)),
            pl.BlockSpec((fp, BP), lambda i: (0, 0)),
        ],
        out_specs=pl.BlockSpec((B, fp, P), lambda i: (0, 0, 0)),
        compiler_params=_compiler_params(("arbitrary",)),
    )(S, _tap_stack(wm, fp), _pad_bias(bm, fp),
      _tap_stack(w3, fp), _pad_bias(b3, fp),
      _tap_stack(w3p, fp), _pad_bias(b3p, fp), v_bf)


# ----------------------------------------------------------------------------
# Kernel 4: fused tail  (bilinear upsample + conv_f + add + conv4 + sigmoid + gate)
# ----------------------------------------------------------------------------
def _tail_kernel(wf_ref, bf_ref, w4_ref, b4_ref, c3_ref, it_ref, c1_ref, x_ref, o_ref):
    # c3_up = bilinear-upsampled c3 (interp-matrix GEMM, c3 block VMEM-resident)
    c3_up = jnp.dot(c3_ref[0], it_ref[...], preferred_element_type=F32)
    # cf = conv_f(c1_)
    cf = jnp.dot(wf_ref[...], c1_ref[0], preferred_element_type=F32) + bf_ref[...]
    s = (c3_up + cf).astype(BF16)
    # m = sigmoid(conv4(s)); out = x * m
    acc = jnp.dot(w4_ref[...], s, preferred_element_type=F32) + b4_ref[...]
    m = pl.reciprocal(1.0 + jnp.exp(-acc), approx=True)
    o_ref[0] = x_ref[0] * m


def pallas_tail(wf, bfv, w4, b4v, c3_small, interp_t, c1_bf, x3, fp, tile):
    B, C, HWp = x3.shape
    f = wf.shape[0]
    P = c3_small.shape[2]
    wf_m = jnp.pad(wf.reshape(f, f).astype(F32),
                   ((0, fp - f), (0, fp - f))).astype(BF16)
    w4_m = jnp.pad(w4.reshape(C, f).astype(F32), ((0, 0), (0, fp - f))).astype(BF16)
    return pl.pallas_call(
        _tail_kernel,
        out_shape=jax.ShapeDtypeStruct((B, C, HWp), F32),
        grid=(B, HWp // tile),
        in_specs=[
            pl.BlockSpec((fp, fp), lambda bi, mi: (0, 0)),          # conv_f weight
            pl.BlockSpec((fp, 1), lambda bi, mi: (0, 0)),           # conv_f bias
            pl.BlockSpec((C, fp), lambda bi, mi: (0, 0)),           # conv4 weight
            pl.BlockSpec((C, 1), lambda bi, mi: (0, 0)),            # conv4 bias
            pl.BlockSpec((1, fp, P), lambda bi, mi: (bi, 0, 0)),    # c3 small (resident)
            pl.BlockSpec((P, tile), lambda bi, mi: (0, mi)),        # interp matrix
            pl.BlockSpec((1, fp, tile), lambda bi, mi: (bi, 0, mi)),  # c1_
            pl.BlockSpec((1, C, tile), lambda bi, mi: (bi, 0, mi)),   # x
        ],
        out_specs=pl.BlockSpec((1, C, tile), lambda bi, mi: (bi, 0, mi)),
        compiler_params=_compiler_params(("parallel", "parallel")),
    )(wf_m, _pad_bias(bfv, fp), w4_m, _pad_bias(b4v, C), c3_small, interp_t, c1_bf, x3)


# ----------------------------------------------------------------------------
# Bilinear (align_corners=False) interpolation weights
# ----------------------------------------------------------------------------
def _interp_matrix_1d(out_size, in_size):
    scale = in_size / out_size
    src = (np.arange(out_size, dtype=np.float64) + 0.5) * scale - 0.5
    src = np.maximum(src, 0.0)
    i0 = np.clip(np.floor(src).astype(np.int64), 0, in_size - 1)
    i1 = np.minimum(i0 + 1, in_size - 1)
    frac = src - i0.astype(np.float64)
    R = np.zeros((out_size, in_size), np.float64)
    rows = np.arange(out_size)
    np.add.at(R, (rows, i0), 1.0 - frac)
    np.add.at(R, (rows, i1), frac)
    return R.astype(np.float32)


# ----------------------------------------------------------------------------
# ESA forward (Pallas) and pure-JAX f32 reference
# ----------------------------------------------------------------------------
def esa_fwd(p, x):
    B, C, H, W = x.shape
    f = p['conv1_w'].shape[0]
    fp = _round_up(max(f, 8), CH_PAD)
    HW = H * W
    HWp = _round_up(HW, LANE)
    tile = _pick_tile(HWp)

    x3 = x.reshape(B, C, HW).astype(F32)
    if HWp != HW:
        x3 = jnp.pad(x3, ((0, 0), (0, 0), (0, HWp - HW)))

    # conv1: 1x1, n_feat -> f (bf16 output, fp-padded channels)
    c1_bf = pallas_conv1(p['conv1_w'], p['conv1_b'], x3, fp, tile)

    # conv2: 3x3, stride 2, no pad (im2col GEMM)
    c1s, h2, w2 = pallas_conv2(p['conv2_w'], p['conv2_b'], c1_bf, B, H, W, fp)

    # TODO(synk): 7x7/3 max-pool stays as lax.reduce_window glue (tiny tensor).
    vm = lax.reduce_window(c1s.reshape(fp, B, h2, w2), -jnp.inf, lax.max,
                           (1, 1, 7, 7), (1, 1, 3, 3), 'VALID')
    hp, wp = vm.shape[2], vm.shape[3]
    v_bf = vm.reshape(fp, B * hp * wp).astype(BF16)

    # fused conv_max -> relu -> conv3 -> relu -> conv3_ on the tiny map (one kernel)
    c3_small = pallas_small_chain(p['convmax_w'], p['convmax_b'],
                                  p['conv3_w'], p['conv3_b'],
                                  p['conv3__w'], p['conv3__b'],
                                  v_bf, B, hp, wp, fp)

    # shared (per-sample) bilinear interpolation matrix, align_corners=False
    Rh = _interp_matrix_1d(H, hp)
    Rw = _interp_matrix_1d(W, wp)
    r2t = np.kron(Rh, Rw).T                                       # [hp*wp, H*W]
    it = np.zeros((hp * wp, HWp), np.float32)
    it[:, :HW] = r2t
    interp_t = jnp.asarray(it, BF16)

    # fused tail: upsample + conv_f + add + conv4 + sigmoid + gate (one kernel)
    out3 = pallas_tail(p['convf_w'], p['convf_b'], p['conv4_w'], p['conv4_b'],
                       c3_small, interp_t, c1_bf, x3, fp, tile)
    if HWp != HW:
        out3 = out3[:, :, :HW]
    return out3.reshape(B, C, H, W)


def esa_reference(p, x):
    """Pure-JAX f32 reference of the PyTorch ESA.forward (loose parity check)."""
    def conv(z, w, b, stride=1, pad=0):
        y = lax.conv_general_dilated(z, w, (stride, stride),
                                     [(pad, pad), (pad, pad)],
                                     dimension_numbers=('NCHW', 'OIHW', 'NCHW'))
        return y + b[None, :, None, None]

    c1_ = conv(x, p['conv1_w'], p['conv1_b'])
    c1 = conv(c1_, p['conv2_w'], p['conv2_b'], stride=2)
    v_max = lax.reduce_window(c1, -jnp.inf, lax.max, (1, 1, 7, 7), (1, 1, 3, 3), 'VALID')
    v_range = jnp.maximum(conv(v_max, p['convmax_w'], p['convmax_b'], pad=1), 0.0)
    c3 = jnp.maximum(conv(v_range, p['conv3_w'], p['conv3_b'], pad=1), 0.0)
    c3 = conv(c3, p['conv3__w'], p['conv3__b'], pad=1)
    H, W = x.shape[2], x.shape[3]
    Rh = jnp.asarray(_interp_matrix_1d(H, c3.shape[2]))
    Rw = jnp.asarray(_interp_matrix_1d(W, c3.shape[3]))
    c3u = jnp.einsum('bfhw,Hh,Ww->bfHW', c3, Rh, Rw)
    cf = conv(c1_, p['convf_w'], p['convf_b'])
    c4 = conv(c3u + cf, p['conv4_w'], p['conv4_b'])
    return x * jax.nn.sigmoid(c4)


# ----------------------------------------------------------------------------
# Deterministic parameter init (PyTorch nn.Conv2d default: U(+-1/sqrt(fan_in)))
# ----------------------------------------------------------------------------
class ParamGen:
    def __init__(self, key):
        self.key = key

    def _next(self):
        self.key, k = jax.random.split(self.key)
        return k

    def conv(self, out_c, in_c, k):
        bound = 1.0 / np.sqrt(in_c * k * k)
        w = jax.random.uniform(self._next(), (out_c, in_c, k, k), F32, -bound, bound)
        b = jax.random.uniform(self._next(), (out_c,), F32, -bound, bound)
        return w, b


def init_esa(pg, n_feat, reduction):
    f = n_feat // reduction
    p = {}
    p['conv1_w'], p['conv1_b'] = pg.conv(f, n_feat, 1)
    p['convf_w'], p['convf_b'] = pg.conv(f, f, 1)
    p['convmax_w'], p['convmax_b'] = pg.conv(f, f, 3)
    p['conv2_w'], p['conv2_b'] = pg.conv(f, f, 3)
    p['conv3_w'], p['conv3_b'] = pg.conv(f, f, 3)
    p['conv3__w'], p['conv3__b'] = pg.conv(f, f, 3)
    p['conv4_w'], p['conv4_b'] = pg.conv(n_feat, f, 1)
    return p


# ----------------------------------------------------------------------------
if __name__ == "__main__":
    n_feat, reduction = 32, 4          # f = 8
    B, H, W = 2, 32, 32                # spatial large enough for the 7x7/3 max-pool

    root = jax.random.PRNGKey(0)
    k_x, k_p = jax.random.split(root)
    params = init_esa(ParamGen(k_p), n_feat, reduction)
    x = jax.random.normal(k_x, (B, n_feat, H, W), F32)

    fwd = jax.jit(esa_fwd)
    y = jax.block_until_ready(fwd(params, x))

    assert y.shape == (B, n_feat, H, W), y.shape
    assert bool(jnp.all(jnp.isfinite(y)))

    # Loose parity check vs. the f32 reference (GEMM operands / intermediates are bf16).
    y_ref = jax.block_until_ready(jax.jit(esa_reference)(params, x))
    err = float(jnp.max(jnp.abs(y - y_ref)))
    assert err < 0.15, f"max abs err vs f32 reference: {err}"

    print("KERNEL_OK")
</pallas_src>

<mosaic_0001>
module attributes {stable_mosaic.version = 11 : i64} {
  func.func @_conv1_kernel(%arg0: i32, %arg1: i32, %arg2: memref<16x32xbf16, #tpu.memory_space<vmem>>, %arg3: memref<16x1xf32, #tpu.memory_space<vmem>>, %arg4: memref<1x32x1024xf32, #tpu.memory_space<vmem>>, %arg5: memref<1x16x1024xbf16, #tpu.memory_space<vmem>>) attributes {dimension_semantics = [#tpu.dimension_semantics<parallel>, #tpu.dimension_semantics<parallel>], iteration_bounds = array<i64: 2, 1>, scalar_prefetch = 0 : i64, scratch_operands = 0 : i64, tpu.core_type = #tpu.core_type<tc>, window_params = [{pipeline_mode = #tpu.pipeline_mode<synchronous>, transform_indices = @transform_0, window_bounds = array<i64: 16, 32>}, {pipeline_mode = #tpu.pipeline_mode<synchronous>, transform_indices = @transform_1, window_bounds = array<i64: 16, 1>}, {transform_indices = @transform_2, window_bounds = array<i64: 1, 32, 1024>}, {transform_indices = @transform_3, window_bounds = array<i64: 1, 16, 1024>}]} {
    %c0 = arith.constant 0 : index
    %c0_0 = arith.constant 0 : index
    %c0_1 = arith.constant 0 : index
    %0 = vector.load %arg4[%c0, %c0_0, %c0_1] : memref<1x32x1024xf32, #tpu.memory_space<vmem>>, vector<1x32x1024xf32>
    %1 = vector.shape_cast %0 : vector<1x32x1024xf32> to vector<32x1024xf32>
    %2 = arith.truncf %1 : vector<32x1024xf32> to vector<32x1024xbf16>
    %c0_2 = arith.constant 0 : index
    %c0_3 = arith.constant 0 : index
    %3 = vector.load %arg2[%c0_2, %c0_3] : memref<16x32xbf16, #tpu.memory_space<vmem>>, vector<16x32xbf16>
    %cst = arith.constant dense<0.000000e+00> : vector<16x1024xf32>
    %4 = tpu.matmul %3, %2, %cst {dimension_numbers = #tpu.dot_dimension_numbers<[1], [0], [0], [1], [0, 0, 1, 1], [], []>} : vector<16x32xbf16>, vector<32x1024xbf16>, vector<16x1024xf32> -> vector<16x1024xf32>
    %c0_4 = arith.constant 0 : index
    %c0_5 = arith.constant 0 : index
    %5 = vector.load %arg3[%c0_4, %c0_5] : memref<16x1xf32, #tpu.memory_space<vmem>>, vector<16x1xf32>
    %6 = vector.broadcast %5 : vector<16x1xf32> to vector<16x1024xf32>
    %7 = arith.addf %4, %6 : vector<16x1024xf32>
    %8 = arith.truncf %7 : vector<16x1024xf32> to vector<16x1024xbf16>
    %c0_6 = arith.constant 0 : index
    %c0_7 = arith.constant 0 : index
    %c0_8 = arith.constant 0 : index
    %9 = vector.load %arg5[%c0_6, %c0_7, %c0_8] : memref<1x16x1024xbf16, #tpu.memory_space<vmem>>, vector<1x16x1024xbf16>
    %10 = vector.shape_cast %9 : vector<1x16x1024xbf16> to vector<16x1024xbf16>
    %11 = vector.shape_cast %8 : vector<16x1024xbf16> to vector<1x16x1024xbf16>
    tpu.vector_store %arg5[%c0_6, %c0_7, %c0_8], %11 {strides = array<i32>} : memref<1x16x1024xbf16, #tpu.memory_space<vmem>>, vector<1x16x1024xbf16>,
    return
  }
  func.func @transform_0(%arg0: i32, %arg1: i32) -> (i32, i32) {
    %c0_i32 = arith.constant 0 : i32
    %c0_i32_0 = arith.constant 0 : i32
    %c0_i32_1 = arith.constant 0 : i32
    return %c0_i32, %c0_i32_0 : i32, i32
  }
  func.func @transform_1(%arg0: i32, %arg1: i32) -> (i32, i32) {
    %c0_i32 = arith.constant 0 : i32
    %c0_i32_0 = arith.constant 0 : i32
    %c0_i32_1 = arith.constant 0 : i32
    return %c0_i32, %c0_i32_0 : i32, i32
  }
  func.func @transform_2(%arg0: i32, %arg1: i32) -> (i32, i32, i32) {
    %c0_i32 = arith.constant 0 : i32
    %c0_i32_0 = arith.constant 0 : i32
    return %arg0, %c0_i32, %arg1 : i32, i32, i32
  }
  func.func @transform_3(%arg0: i32, %arg1: i32) -> (i32, i32, i32) {
    %c0_i32 = arith.constant 0 : i32
    %c0_i32_0 = arith.constant 0 : i32
    return %arg0, %c0_i32, %arg1 : i32, i32, i32
  }
}

module attributes {stable_mosaic.version = 11 : i64} {
  func.func @_gemm_bias_kernel(%arg0: i32, %arg1: memref<16x144xbf16, #tpu.memory_space<vmem>>, %arg2: memref<16x1xf32, #tpu.memory_space<vmem>>, %arg3: memref<144x512xbf16, #tpu.memory_space<vmem>>, %arg4: memref<16x512xf32, #tpu.memory_space<vmem>>) attributes {dimension_semantics = [#tpu.dimension_semantics<arbitrary>], iteration_bounds = array<i64: 1>, scalar_prefetch = 0 : i64, scratch_operands = 0 : i64, tpu.core_type = #tpu.core_type<tc>, window_params = [{pipeline_mode = #tpu.pipeline_mode<synchronous>, transform_indices = @transform_0, window_bounds = array<i64: 16, 144>}, {pipeline_mode = #tpu.pipeline_mode<synchronous>, transform_indices = @transform_1, window_bounds = array<i64: 16, 1>}, {pipeline_mode = #tpu.pipeline_mode<synchronous>, transform_indices = @transform_2, window_bounds = array<i64: 144, 512>}, {pipeline_mode = #tpu.pipeline_mode<synchronous>, transform_indices = @transform_3, window_bounds = array<i64: 16, 512>}]} {
    %c0 = arith.constant 0 : index
    %c0_0 = arith.constant 0 : index
    %0 = vector.load %arg1[%c0, %c0_0] : memref<16x144xbf16, #tpu.memory_space<vmem>>, vector<16x144xbf16>
    %c0_1 = arith.constant 0 : index
    %c0_2 = arith.constant 0 : index
    %1 = vector.load %arg3[%c0_1, %c0_2] : memref<144x512xbf16, #tpu.memory_space<vmem>>, vector<144x512xbf16>
    %cst = arith.constant dense<0.000000e+00> : vector<16x512xf32>
    %2 = tpu.matmul %0, %1, %cst {dimension_numbers = #tpu.dot_dimension_numbers<[1], [0], [0], [1], [0, 0, 1, 1], [], []>} : vector<16x144xbf16>, vector<144x512xbf16>, vector<16x512xf32> -> vector<16x512xf32>
    %c0_3 = arith.constant 0 : index
    %c0_4 = arith.constant 0 : index
    %3 = vector.load %arg2[%c0_3, %c0_4] : memref<16x1xf32, #tpu.memory_space<vmem>>, vector<16x1xf32>
    %4 = vector.broadcast %3 : vector<16x1xf32> to vector<16x512xf32>
    %5 = arith.addf %2, %4 : vector<16x512xf32>
    %c0_5 = arith.constant 0 : index
    %c0_6 = arith.constant 0 : index
    %6 = vector.load %arg4[%c0_5, %c0_6] : memref<16x512xf32, #tpu.memory_space<vmem>>, vector<16x512xf32>
    tpu.vector_store %arg4[%c0_5, %c0_6], %5 {strides = array<i32>} : memref<16x512xf32, #tpu.memory_space<vmem>>, vector<16x512xf32>,
    return
  }
  func.func @transform_0(%arg0: i32) -> (i32, i32) {
    %c0_i32 = arith.constant 0 : i32
    %c0_i32_0 = arith.constant 0 : i32
    %c0_i32_1 = arith.constant 0 : i32
    return %c0_i32, %c0_i32_0 : i32, i32
  }
  func.func @transform_1(%arg0: i32) -> (i32, i32) {
    %c0_i32 = arith.constant 0 : i32
    %c0_i32_0 = arith.constant 0 : i32
    %c0_i32_1 = arith.constant 0 : i32
    return %c0_i32, %c0_i32_0 : i32, i32
  }
  func.func @transform_2(%arg0: i32) -> (i32, i32) {
    %c0_i32 = arith.constant 0 : i32
    %c0_i32_0 = arith.constant 0 : i32
    %c0_i32_1 = arith.constant 0 : i32
    return %c0_i32, %c0_i32_0 : i32, i32
  }
  func.func @transform_3(%arg0: i32) -> (i32, i32) {
    %c0_i32 = arith.constant 0 : i32
    %c0_i32_0 = arith.constant 0 : i32
    %c0_i32_1 = arith.constant 0 : i32
    return %c0_i32, %c0_i32_0 : i32, i32
  }
}

module attributes {stable_mosaic.version = 11 : i64} {
  func.func @_chain_kernel(%arg0: i32, %arg1: memref<9x18x18xbf16, #tpu.memory_space<vmem>>, %arg2: memref<9x16x16xbf16, #tpu.memory_space<vmem>>, %arg3: memref<16x1xf32, #tpu.memory_space<vmem>>, %arg4: memref<9x16x16xbf16, #tpu.memory_space<vmem>>, %arg5: memref<16x1xf32, #tpu.memory_space<vmem>>, %arg6: memref<9x16x16xbf16, #tpu.memory_space<vmem>>, %arg7: memref<16x1xf32, #tpu.memory_space<vmem>>, %arg8: memref<16x18xbf16, #tpu.memory_space<vmem>>, %arg9: memref<2x16x9xbf16, #tpu.memory_space<vmem>>) attributes {dimension_semantics = [#tpu.dimension_semantics<arbitrary>], iteration_bounds = array<i64: 1>, scalar_prefetch = 0 : i64, scratch_operands = 0 : i64, tpu.core_type = #tpu.core_type<tc>, window_params = [{pipeline_mode = #tpu.pipeline_mode<synchronous>, transform_indices = @transform_0, window_bounds = array<i64: 9, 18, 18>}, {pipeline_mode = #tpu.pipeline_mode<synchronous>, transform_indices = @transform_1, window_bounds = array<i64: 9, 16, 16>}, {pipeline_mode = #tpu.pipeline_mode<synchronous>, transform_indices = @transform_2, window_bounds = array<i64: 16, 1>}, {pipeline_mode = #tpu.pipeline_mode<synchronous>, transform_indices = @transform_3, window_bounds = array<i64: 9, 16, 16>}, {pipeline_mode = #tpu.pipeline_mode<synchronous>, transform_indices = @transform_4, window_bounds = array<i64: 16, 1>}, {pipeline_mode = #tpu.pipeline_mode<synchronous>, transform_indices = @transform_5, window_bounds = array<i64: 9, 16, 16>}, {pipeline_mode = #tpu.pipeline_mode<synchronous>, transform_indices = @transform_6, window_bounds = array<i64: 16, 1>}, {pipeline_mode = #tpu.pipeline_mode<synchronous>, transform_indices = @transform_7, window_bounds = array<i64: 16, 18>}, {pipeline_mode = #tpu.pipeline_mode<synchronous>, transform_indices = @transform_8, window_bounds = array<i64: 2, 16, 9>}]} {
    %c0 = arith.constant 0 : index
    %c0_0 = arith.constant 0 : index
    %0 = vector.load %arg8[%c0, %c0_0] : memref<16x18xbf16, #tpu.memory_space<vmem>>, vector<16x18xbf16>
    %cst = arith.constant 0.000000e+00 : f32
    %1 = vector.broadcast %cst : f32 to vector<16x18xf32>
    %c0_1 = arith.constant 0 : index
    %c0_2 = arith.constant 0 : index
    %c0_3 = arith.constant 0 : index
    %2 = vector.load %arg1[%c0_1, %c0_2, %c0_3] : memref<9x18x18xbf16, #tpu.memory_space<vmem>>, vector<1x18x18xbf16>
    %3 = vector.shape_cast %2 : vector<1x18x18xbf16> to vector<18x18xbf16>
    %cst_4 = arith.constant dense<0.000000e+00> : vector<16x18xf32>
    %4 = tpu.matmul %0, %3, %cst_4 {dimension_numbers = #tpu.dot_dimension_numbers<[1], [0], [0], [1], [0, 0, 1, 1], [], []>} : vector<16x18xbf16>, vector<18x18xbf16>, vector<16x18xf32> -> vector<16x18xf32>
    %5 = arith.truncf %4 : vector<16x18xf32> to vector<16x18xbf16>
    %c0_5 = arith.constant 0 : index
    %c0_6 = arith.constant 0 : index
    %c0_7 = arith.constant 0 : index
    %6 = vector.load %arg2[%c0_5, %c0_6, %c0_7] : memref<9x16x16xbf16, #tpu.memory_space<vmem>>, vector<1x16x16xbf16>
    %7 = vector.shape_cast %6 : vector<1x16x16xbf16> to vector<16x16xbf16>
    %cst_8 = arith.constant dense<0.000000e+00> : vector<16x18xf32>
    %8 = tpu.matmul %7, %5, %cst_8 {dimension_numbers = #tpu.dot_dimension_numbers<[1], [0], [0], [1], [0, 0, 1, 1], [], []>} : vector<16x16xbf16>, vector<16x18xbf16>, vector<16x18xf32> -> vector<16x18xf32>
    %9 = arith.addf %1, %8 : vector<16x18xf32>
    %c1 = arith.constant 1 : index
    %c0_9 = arith.constant 0 : index
    %c0_10 = arith.constant 0 : index
    %10 = vector.load %arg1[%c1, %c0_9, %c0_10] : memref<9x18x18xbf16, #tpu.memory_space<vmem>>, vector<1x18x18xbf16>
    %11 = vector.shape_cast %10 : vector<1x18x18xbf16> to vector<18x18xbf16>
    %cst_11 = arith.constant dense<0.000000e+00> : vector<16x18xf32>
    %12 = tpu.matmul %0, %11, %cst_11 {dimension_numbers = #tpu.dot_dimension_numbers<[1], [0], [0], [1], [0, 0, 1, 1], [], []>} : vector<16x18xbf16>, vector<18x18xbf16>, vector<16x18xf32> -> vector<16x18xf32>
    %13 = arith.truncf %12 : vector<16x18xf32> to vector<16x18xbf16>
    %c1_12 = arith.constant 1 : index
    %c0_13 = arith.constant 0 : index
    %c0_14 = arith.constant 0 : index
    %14 = vector.load %arg2[%c1_12, %c0_13, %c0_14] : memref<9x16x16xbf16, #tpu.memory_space<vmem>>, vector<1x16x16xbf16>
    %15 = vector.shape_cast %14 : vector<1x16x16xbf16> to vector<16x16xbf16>
    %cst_15 = arith.constant dense<0.000000e+00> : vector<16x18xf32>
    %16 = tpu.matmul %15, %13, %cst_15 {dimension_numbers = #tpu.dot_dimension_numbers<[1], [0], [0], [1], [0, 0, 1, 1], [], []>} : vector<16x16xbf16>, vector<16x18xbf16>, vector<16x18xf32> -> vector<16x18xf32>
    %17 = arith.addf %9, %16 : vector<16x18xf32>
    %c2 = arith.constant 2 : index
    %c0_16 = arith.constant 0 : index
    %c0_17 = arith.constant 0 : index
    %18 = vector.load %arg1[%c2, %c0_16, %c0_17] : memref<9x18x18xbf16, #tpu.memory_space<vmem>>, vector<1x18x18xbf16>
    %19 = vector.shape_cast %18 : vector<1x18x18xbf16> to vector<18x18xbf16>
    %cst_18 = arith.constant dense<0.000000e+00> : vector<16x18xf32>
    %20 = tpu.matmul %0, %19, %cst_18 {dimension_numbers = #tpu.dot_dimension_numbers<[1], [0], [0], [1], [0, 0, 1, 1], [], []>} : vector<16x18xbf16>, vector<18x18xbf16>, vector<16x18xf32> -> vector<16x18xf32>
    %21 = arith.truncf %20 : vector<16x18xf32> to vector<16x18xbf16>
    %c2_19 = arith.constant 2 : index
    %c0_20 = arith.constant 0 : index
    %c0_21 = arith.constant 0 : index
    %22 = vector.load %arg2[%c2_19, %c0_20, %c0_21] : memref<9x16x16xbf16, #tpu.memory_space<vmem>>, vector<1x16x16xbf16>
    %23 = vector.shape_cast %22 : vector<1x16x16xbf16> to vector<16x16xbf16>
    %cst_22 = arith.constant dense<0.000000e+00> : vector<16x18xf32>
    %24 = tpu.matmul %23, %21, %cst_22 {dimension_numbers = #tpu.dot_dimension_numbers<[1], [0], [0], [1], [0, 0, 1, 1], [], []>} : vector<16x16xbf16>, vector<16x18xbf16>, vector<16x18xf32> -> vector<16x18xf32>
    %25 = arith.addf %17, %24 : vector<16x18xf32>
    %c3 = arith.constant 3 : index
    %c0_23 = arith.constant 0 : index
    %c0_24 = arith.constant 0 : index
    %26 = vector.load %arg1[%c3, %c0_23, %c0_24] : memref<9x18x18xbf16, #tpu.memory_space<vmem>>, vector<1x18x18xbf16>
    %27 = vector.shape_cast %26 : vector<1x18x18xbf16> to vector<18x18xbf16>
    %cst_25 = arith.constant dense<0.000000e+00> : vector<16x18xf32>
    %28 = tpu.matmul %0, %27, %cst_25 {dimension_numbers = #tpu.dot_dimension_numbers<[1], [0], [0], [1], [0, 0, 1, 1], [], []>} : vector<16x18xbf16>, vector<18x18xbf16>, vector<16x18xf32> -> vector<16x18xf32>
    %29 = arith.truncf %28 : vector<16x18xf32> to vector<16x18xbf16>
    %c3_26 = arith.constant 3 : index
    %c0_27 = arith.constant 0 : index
    %c0_28 = arith.constant 0 : index
    %30 = vector.load %arg2[%c3_26, %c0_27, %c0_28] : memref<9x16x16xbf16, #tpu.memory_space<vmem>>, vector<1x16x16xbf16>
    %31 = vector.shape_cast %30 : vector<1x16x16xbf16> to vector<16x16xbf16>
    %cst_29 = arith.constant dense<0.000000e+00> : vector<16x18xf32>
    %32 = tpu.matmul %31, %29, %cst_29 {dimension_numbers = #tpu.dot_dimension_numbers<[1], [0], [0], [1], [0, 0, 1, 1], [], []>} : vector<16x16xbf16>, vector<16x18xbf16>, vector<16x18xf32> -> vector<16x18xf32>
    %33 = arith.addf %25, %32 : vector<16x18xf32>
    %c4 = arith.constant 4 : index
    %c0_30 = arith.constant 0 : index
    %c0_31 = arith.constant 0 : index
    %34 = vector.load %arg1[%c4, %c0_30, %c0_31] : memref<9x18x18xbf16, #tpu.memory_space<vmem>>, vector<1x18x18xbf16>
    %35 = vector.shape_cast %34 : vector<1x18x18xbf16> to vector<18x18xbf16>
    %cst_32 = arith.constant dense<0.000000e+00> : vector<16x18xf32>
    %36 = tpu.matmul %0, %35, %cst_32 {dimension_numbers = #tpu.dot_dimension_numbers<[1], [0], [0], [1], [0, 0, 1, 1], [], []>} : vector<16x18xbf16>, vector<18x18xbf16>, vector<16x18xf32> -> vector<16x18xf32>
    %37 = arith.truncf %36 : vector<16x18xf32> to vector<16x18xbf16>
    %c4_33 = arith.constant 4 : index
    %c0_34 = arith.constant 0 : index
    %c0_35 = arith.constant 0 : index
    %38 = vector.load %arg2[%c4_33, %c0_34, %c0_35] : memref<9x16x16xbf16, #tpu.memory_space<vmem>>, vector<1x16x16xbf16>
    %39 = vector.shape_cast %38 : vector<1x16x16xbf16> to vector<16x16xbf16>
    %cst_36 = arith.constant dense<0.000000e+00> : vector<16x18xf32>
    %40 = tpu.matmul %39, %37, %cst_36 {dimension_numbers = #tpu.dot_dimension_numbers<[1], [0], [0], [1], [0, 0, 1, 1], [], []>} : vector<16x16xbf16>, vector<16x18xbf16>, vector<16x18xf32> -> vector<16x18xf32>
    %41 = arith.addf %33, %40 : vector<16x18xf32>
    %c5 = arith.constant 5 : index
    %c0_37 = arith.constant 0 : index
    %c0_38 = arith.constant 0 : index
    %42 = vector.load %arg1[%c5, %c0_37, %c0_38] : memref<9x18x18xbf16, #tpu.memory_space<vmem>>, vector<1x18x18xbf16>
    %43 = vector.shape_cast %42 : vector<1x18x18xbf16> to vector<18x18xbf16>
    %cst_39 = arith.constant dense<0.000000e+00> : vector<16x18xf32>
    %44 = tpu.matmul %0, %43, %cst_39 {dimension_numbers = #tpu.dot_dimension_numbers<[1], [0], [0], [1], [0, 0, 1, 1], [], []>} : vector<16x18xbf16>, vector<18x18xbf16>, vector<16x18xf32> -> vector<16x18xf32>
    %45 = arith.truncf %44 : vector<16x18xf32> to vector<16x18xbf16>
    %c5_40 = arith.constant 5 : index
    %c0_41 = arith.constant 0 : index
    %c0_42 = arith.constant 0 : index
    %46 = vector.load %arg2[%c5_40, %c0_41, %c0_42] : memref<9x16x16xbf16, #tpu.memory_space<vmem>>, vector<1x16x16xbf16>
    %47 = vector.shape_cast %46 : vector<1x16x16xbf16> to vector<16x16xbf16>
    %cst_43 = arith.constant dense<0.000000e+00> : vector<16x18xf32>
    %48 = tpu.matmul %47, %45, %cst_43 {dimension_numbers = #tpu.dot_dimension_numbers<[1], [0], [0], [1], [0, 0, 1, 1], [], []>} : vector<16x16xbf16>, vector<16x18xbf16>, vector<16x18xf32> -> vector<16x18xf32>
    %49 = arith.addf %41, %48 : vector<16x18xf32>
    %c6 = arith.constant 6 : index
    %c0_44 = arith.constant 0 : index
    %c0_45 = arith.constant 0 : index
    %50 = vector.load %arg1[%c6, %c0_44, %c0_45] : memref<9x18x18xbf16, #tpu.memory_space<vmem>>, vector<1x18x18xbf16>
    %51 = vector.shape_cast %50 : vector<1x18x18xbf16> to vector<18x18xbf16>
    %cst_46 = arith.constant dense<0.000000e+00> : vector<16x18xf32>
    %52 = tpu.matmul %0, %51, %cst_46 {dimension_numbers = #tpu.dot_dimension_numbers<[1], [0], [0], [1], [0, 0, 1, 1], [], []>} : vector<16x18xbf16>, vector<18x18xbf16>, vector<16x18xf32> -> vector<16x18xf32>
    %53 = arith.truncf %52 : vector<16x18xf32> to vector<16x18xbf16>
    %c6_47 = arith.constant 6 : index
    %c0_48 = arith.constant 0 : index
    %c0_49 = arith.constant 0 : index
    %54 = vector.load %arg2[%c6_47, %c0_48, %c0_49] : memref<9x16x16xbf16, #tpu.memory_space<vmem>>, vector<1x16x16xbf16>
    %55 = vector.shape_cast %54 : vector<1x16x16xbf16> to vector<16x16xbf16>
    %cst_50 = arith.constant dense<0.000000e+00> : vector<16x18xf32>
    %56 = tpu.matmul %55, %53, %cst_50 {dimension_numbers = #tpu.dot_dimension_numbers<[1], [0], [0], [1], [0, 0, 1, 1], [], []>} : vector<16x16xbf16>, vector<16x18xbf16>, vector<16x18xf32> -> vector<16x18xf32>
    %57 = arith.addf %49, %56 : vector<16x18xf32>
    %c7 = arith.constant 7 : index
    %c0_51 = arith.constant 0 : index
    %c0_52 = arith.constant 0 : index
    %58 = vector.load %arg1[%c7, %c0_51, %c0_52] : memref<9x18x18xbf16, #tpu.memory_space<vmem>>, vector<1x18x18xbf16>
    %59 = vector.shape_cast %58 : vector<1x18x18xbf16> to vector<18x18xbf16>
    %cst_53 = arith.constant dense<0.000000e+00> : vector<16x18xf32>
    %60 = tpu.matmul %0, %59, %cst_53 {dimension_numbers = #tpu.dot_dimension_numbers<[1], [0], [0], [1], [0, 0, 1, 1], [], []>} : vector<16x18xbf16>, vector<18x18xbf16>, vector<16x18xf32> -> vector<16x18xf32>
    %61 = arith.truncf %60 : vector<16x18xf32> to vector<16x18xbf16>
    %c7_54 = arith.constant 7 : index
    %c0_55 = arith.constant 0 : index
    %c0_56 = arith.constant 0 : index
    %62 = vector.load %arg2[%c7_54, %c0_55, %c0_56] : memref<9x16x16xbf16, #tpu.memory_space<vmem>>, vector<1x16x16xbf16>
    %63 = vector.shape_cast %62 : vector<1x16x16xbf16> to vector<16x16xbf16>
    %cst_57 = arith.constant dense<0.000000e+00> : vector<16x18xf32>
    %64 = tpu.matmul %63, %61, %cst_57 {dimension_numbers = #tpu.dot_dimension_numbers<[1], [0], [0], [1], [0, 0, 1, 1], [], []>} : vector<16x16xbf16>, vector<16x18xbf16>, vector<16x18xf32> -> vector<16x18xf32>
    %65 = arith.addf %57, %64 : vector<16x18xf32>
    %c8 = arith.constant 8 : index
    %c0_58 = arith.constant 0 : index
    %c0_59 = arith.constant 0 : index
    %66 = vector.load %arg1[%c8, %c0_58, %c0_59] : memref<9x18x18xbf16, #tpu.memory_space<vmem>>, vector<1x18x18xbf16>
    %67 = vector.shape_cast %66 : vector<1x18x18xbf16> to vector<18x18xbf16>
    %cst_60 = arith.constant dense<0.000000e+00> : vector<16x18xf32>
    %68 = tpu.matmul %0, %67, %cst_60 {dimension_numbers = #tpu.dot_dimension_numbers<[1], [0], [0], [1], [0, 0, 1, 1], [], []>} : vector<16x18xbf16>, vector<18x18xbf16>, vector<16x18xf32> -> vector<16x18xf32>
    %69 = arith.truncf %68 : vector<16x18xf32> to vector<16x18xbf16>
    %c8_61 = arith.constant 8 : index
    %c0_62 = arith.constant 0 : index
    %c0_63 = arith.constant 0 : index
    %70 = vector.load %arg2[%c8_61, %c0_62, %c0_63] : memref<9x16x16xbf16, #tpu.memory_space<vmem>>, vector<1x16x16xbf16>
    %71 = vector.shape_cast %70 : vector<1x16x16xbf16> to vector<16x16xbf16>
    %cst_64 = arith.constant dense<0.000000e+00> : vector<16x18xf32>
    %72 = tpu.matmul %71, %69, %cst_64 {dimension_numbers = #tpu.dot_dimension_numbers<[1], [0], [0], [1], [0, 0, 1, 1], [], []>} : vector<16x16xbf16>, vector<16x18xbf16>, vector<16x18xf32> -> vector<16x18xf32>
    %73 = arith.addf %65, %72 : vector<16x18xf32>
    %c0_65 = arith.constant 0 : index
    %c0_66 = arith.constant 0 : index
    %74 = vector.load %arg3[%c0_65, %c0_66] : memref<16x1xf32, #tpu.memory_space<vmem>>, vector<16x1xf32>
    %75 = vector.broadcast %74 : vector<16x1xf32> to vector<16x18xf32>
    %76 = arith.addf %73, %75 : vector<16x18xf32>
    %cst_67 = arith.constant 0.000000e+00 : f32
    %77 = vector.broadcast %cst_67 : f32 to vector<16x18xf32>
    %78 = arith.maximumf %76, %77 : vector<16x18xf32>
    %79 = arith.truncf %78 : vector<16x18xf32> to vector<16x18xbf16>
    %cst_68 = arith.constant 0.000000e+00 : f32
    %80 = vector.broadcast %cst_68 : f32 to vector<16x18xf32>
    %c0_69 = arith.constant 0 : index
    %c0_70 = arith.constant 0 : index
    %c0_71 = arith.constant 0 : index
    %81 = vector.load %arg1[%c0_69, %c0_70, %c0_71] : memref<9x18x18xbf16, #tpu.memory_space<vmem>>, vector<1x18x18xbf16>
    %82 = vector.shape_cast %81 : vector<1x18x18xbf16> to vector<18x18xbf16>
    %cst_72 = arith.constant dense<0.000000e+00> : vector<16x18xf32>
    %83 = tpu.matmul %79, %82, %cst_72 {dimension_numbers = #tpu.dot_dimension_numbers<[1], [0], [0], [1], [0, 0, 1, 1], [], []>} : vector<16x18xbf16>, vector<18x18xbf16>, vector<16x18xf32> -> vector<16x18xf32>
    %84 = arith.truncf %83 : vector<16x18xf32> to vector<16x18xbf16>
    %c0_73 = arith.constant 0 : index
    %c0_74 = arith.constant 0 : index
    %c0_75 = arith.constant 0 : index
    %85 = vector.load %arg4[%c0_73, %c0_74, %c0_75] : memref<9x16x16xbf16, #tpu.memory_space<vmem>>, vector<1x16x16xbf16>
    %86 = vector.shape_cast %85 : vector<1x16x16xbf16> to vector<16x16xbf16>
    %cst_76 = arith.constant dense<0.000000e+00> : vector<16x18xf32>
    %87 = tpu.matmul %86, %84, %cst_76 {dimension_numbers = #tpu.dot_dimension_numbers<[1], [0], [0], [1], [0, 0, 1, 1], [], []>} : vector<16x16xbf16>, vector<16x18xbf16>, vector<16x18xf32> -> vector<16x18xf32>
    %88 = arith.addf %80, %87 : vector<16x18xf32>
    %c1_77 = arith.constant 1 : index
    %c0_78 = arith.constant 0 : index
    %c0_79 = arith.constant 0 : index
    %89 = vector.load %arg1[%c1_77, %c0_78, %c0_79] : memref<9x18x18xbf16, #tpu.memory_space<vmem>>, vector<1x18x18xbf16>
    %90 = vector.shape_cast %89 : vector<1x18x18xbf16> to vector<18x18xbf16>
    %cst_80 = arith.constant dense<0.000000e+00> : vector<16x18xf32>
    %91 = tpu.matmul %79, %90, %cst_80 {dimension_numbers = #tpu.dot_dimension_numbers<[1], [0], [0], [1], [0, 0, 1, 1], [], []>} : vector<16x18xbf16>, vector<18x18xbf16>, vector<16x18xf32> -> vector<16x18xf32>
    %92 = arith.truncf %91 : vector<16x18xf32> to vector<16x18xbf16>
    %c1_81 = arith.constant 1 : index
    %c0_82 = arith.constant 0 : index
    %c0_83 = arith.constant 0 : index
    %93 = vector.load %arg4[%c1_81, %c0_82, %c0_83] : memref<9x16x16xbf16, #tpu.memory_space<vmem>>, vector<1x16x16xbf16>
    %94 = vector.shape_cast %93 : vector<1x16x16xbf16> to vector<16x16xbf16>
    %cst_84 = arith.constant dense<0.000000e+00> : vector<16x18xf32>
    %95 = tpu.matmul %94, %92, %cst_84 {dimension_numbers = #tpu.dot_dimension_numbers<[1], [0], [0], [1], [0, 0, 1, 1], [], []>} : vector<16x16xbf16>, vector<16x18xbf16>, vector<16x18xf32> -> vector<16x18xf32>
    %96 = arith.addf %88, %95 : vector<16x18xf32>
    %c2_85 = arith.constant 2 : index
    %c0_86 = arith.constant 0 : index
    %c0_87 = arith.constant 0 : index
    %97 = vector.load %arg1[%c2_85, %c0_86, %c0_87] : memref<9x18x18xbf16, #tpu.memory_space<vmem>>, vector<1x18x18xbf16>
    %98 = vector.shape_cast %97 : vector<1x18x18xbf16> to vector<18x18xbf16>
    %cst_88 = arith.constant dense<0.000000e+00> : vector<16x18xf32>
    %99 = tpu.matmul %79, %98, %cst_88 {dimension_numbers = #tpu.dot_dimension_numbers<[1], [0], [0], [1], [0, 0, 1, 1], [], []>} : vector<16x18xbf16>, vector<18x18xbf16>, vector<16x18xf32> -> vector<16x18xf32>
    %100 = arith.truncf %99 : vector<16x18xf32> to vector<16x18xbf16>
    %c2_89 = arith.constant 2 : index
    %c0_90 = arith.constant 0 : index
    %c0_91 = arith.constant 0 : index
    %101 = vector.load %arg4[%c2_89, %c0_90, %c0_91] : memref<9x16x16xbf16, #tpu.memory_space<vmem>>, vector<1x16x16xbf16>
    %102 = vector.shape_cast %101 : vector<1x16x16xbf16> to vector<16x16xbf16>
    %cst_92 = arith.constant dense<0.000000e+00> : vector<16x18xf32>
    %103 = tpu.matmul %102, %100, %cst_92 {dimension_numbers = #tpu.dot_dimension_numbers<[1], [0], [0], [1], [0, 0, 1, 1], [], []>} : vector<16x16xbf16>, vector<16x18xbf16>, vector<16x18xf32> -> vector<16x18xf32>
    %104 = arith.addf %96, %103 : vector<16x18xf32>
    %c3_93 = arith.constant 3 : index
    %c0_94 = arith.constant 0 : index
    %c0_95 = arith.constant 0 : index
    %105 = vector.load %arg1[%c3_93, %c0_94, %c0_95] : memref<9x18x18xbf16, #tpu.memory_space<vmem>>, vector<1x18x18xbf16>
    %106 = vector.shape_cast %105 : vector<1x18x18xbf16> to vector<18x18xbf16>
    %cst_96 = arith.constant dense<0.000000e+00> : vector<16x18xf32>
    %107 = tpu.matmul %79, %106, %cst_96 {dimension_numbers = #tpu.dot_dimension_numbers<[1], [0], [0], [1], [0, 0, 1, 1], [], []>} : vector<16x18xbf16>, vector<18x18xbf16>, vector<16x18xf32> -> vector<16x18xf32>
    %108 = arith.truncf %107 : vector<16x18xf32> to vector<16x18xbf16>
    %c3_97 = arith.constant 3 : index
    %c0_98 = arith.constant 0 : index
    %c0_99 = arith.constant 0 : index
    %109 = vector.load %arg4[%c3_97, %c0_98, %c0_99] : memref<9x16x16xbf16, #tpu.memory_space<vmem>>, vector<1x16x16xbf16>
    %110 = vector.shape_cast %109 : vector<1x16x16xbf16> to vector<16x16xbf16>
    %cst_100 = arith.constant dense<0.000000e+00> : vector<16x18xf32>
    %111 = tpu.matmul %110, %108, %cst_100 {dimension_numbers = #tpu.dot_dimension_numbers<[1], [0], [0], [1], [0, 0, 1, 1], [], []>} : vector<16x16xbf16>, vector<16x18xbf16>, vector<16x18xf32> -> vector<16x18xf32>
    %112 = arith.addf %104, %111 : vector<16x18xf32>
    %c4_101 = arith.constant 4 : index
    %c0_102 = arith.constant 0 : index
    %c0_103 = arith.constant 0 : index
    %113 = vector.load %arg1[%c4_101, %c0_102, %c0_103] : memref<9x18x18xbf16, #tpu.memory_space<vmem>>, vector<1x18x18xbf16>
    %114 = vector.shape_cast %113 : vector<1x18x18xbf16> to vector<18x18xbf16>
    %cst_104 = arith.constant dense<0.000000e+00> : vector<16x18xf32>
    %115 = tpu.matmul %79, %114, %cst_104 {dimension_numbers = #tpu.dot_dimension_numbers<[1], [0], [0], [1], [0, 0, 1, 1], [], []>} : vector<16x18xbf16>, vector<18x18xbf16>, vector<16x18xf32> -> vector<16x18xf32>
    %116 = arith.truncf %115 : vector<16x18xf32> to vector<16x18xbf16>
    %c4_105 = arith.constant 4 : index
    %c0_106 = arith.constant 0 : index
    %c0_107 = arith.constant 0 : index
    %117 = vector.load %arg4[%c4_105, %c0_106, %c0_107] : memref<9x16x16xbf16, #tpu.memory_space<vmem>>, vector<1x16x16xbf16>
    %118 = vector.shape_cast %117 : vector<1x16x16xbf16> to vector<16x16xbf16>
    %cst_108 = arith.constant dense<0.000000e+00> : vector<16x18xf32>
    %119 = tpu.matmul %118, %116, %cst_108 {dimension_numbers = #tpu.dot_dimension_numbers<[1], [0], [0], [1], [0, 0, 1, 1], [], []>} : vector<16x16xbf16>, vector<16x18xbf16>, vector<16x18xf32> -> vector<16x18xf32>
    %120 = arith.addf %112, %119 : vector<16x18xf32>
    %c5_109 = arith.constant 5 : index
    %c0_110 = arith.constant 0 : index
    %c0_111 = arith.constant 0 : index
    %121 = vector.load %arg1[%c5_109, %c0_110, %c0_111] : memref<9x18x18xbf16, #tpu.memory_space<vmem>>, vector<1x18x18xbf16>
    %122 = vector.shape_cast %121 : vector<1x18x18xbf16> to vector<18x18xbf16>
    %cst_112 = arith.constant dense<0.000000e+00> : vector<16x18xf32>
    %123 = tpu.matmul %79, %122, %cst_112 {dimension_numbers = #tpu.dot_dimension_numbers<[1], [0], [0], [1], [0, 0, 1, 1], [], []>} : vector<16x18xbf16>, vector<18x18xbf16>, vector<16x18xf32> -> vector<16x18xf32>
    %124 = arith.truncf %123 : vector<16x18xf32> to vector<16x18xbf16>
    %c5_113 = arith.constant 5 : index
    %c0_114 = arith.constant 0 : index
    %c0_115 = arith.constant 0 : index
    %125 = vector.load %arg4[%c5_113, %c0_114, %c0_115] : memref<9x16x16xbf16, #tpu.memory_space<vmem>>, vector<1x16x16xbf16>
    %126 = vector.shape_cast %125 : vector<1x16x16xbf16> to vector<16x16xbf16>
    %cst_116 = arith.constant dense<0.000000e+00> : vector<16x18xf32>
    %127 = tpu.matmul %126, %124, %cst_116 {dimension_numbers = #tpu.dot_dimension_numbers<[1], [0], [0], [1], [0, 0, 1, 1], [], []>} : vector<16x16xbf16>, vector<16x18xbf16>, vector<16x18xf32> -> vector<16x18xf32>
    %128 = arith.addf %120, %127 : vector<16x18xf32>
    %c6_117 = arith.constant 6 : index
    %c0_118 = arith.constant 0 : index
    %c0_119 = arith.constant 0 : index
    %129 = vector.load %arg1[%c6_117, %c0_118, %c0_119] : memref<9x18x18xbf16, #tpu.memory_space<vmem>>, vector<1x18x18xbf16>
    %130 = vector.shape_cast %129 : vector<1x18x18xbf16> to vector<18x18xbf16>
    %cst_120 = arith.constant dense<0.000000e+00> : vector<16x18xf32>
    %131 = tpu.matmul %79, %130, %cst_120 {dimension_numbers = #tpu.dot_dimension_numbers<[1], [0], [0], [1], [0, 0, 1, 1], [], []>} : vector<16x18xbf16>, vector<18x18xbf16>, vector<16x18xf32> -> vector<16x18xf32>
    %132 = arith.truncf %131 : vector<16x18xf32> to vector<16x18xbf16>
    %c6_121 = arith.constant 6 : index
    %c0_122 = arith.constant 0 : index
    %c0_123 = arith.constant 0 : index
    %133 = vector.load %arg4[%c6_121, %c0_122, %c0_123] : memref<9x16x16xbf16, #tpu.memory_space<vmem>>, vector<1x16x16xbf16>
    %134 = vector.shape_cast %133 : vector<1x16x16xbf16> to vector<16x16xbf16>
    %cst_124 = arith.constant dense<0.000000e+00> : vector<16x18xf32>
    %135 = tpu.matmul %134, %132, %cst_124 {dimension_numbers = #tpu.dot_dimension_numbers<[1], [0], [0], [1], [0, 0, 1, 1], [], []>} : vector<16x16xbf16>, vector<16x18xbf16>, vector<16x18xf32> -> vector<16x18xf32>
    %136 = arith.addf %128, %135 : vector<16x18xf32>
    %c7_125 = arith.constant 7 : index
    %c0_126 = arith.constant 0 : index
    %c0_127 = arith.constant 0 : index
    %137 = vector.load %arg1[%c7_125, %c0_126, %c0_127] : memref<9x18x18xbf16, #tpu.memory_space<vmem>>, vector<1x18x18xbf16>
    %138 = vector.shape_cast %137 : vector<1x18x18xbf16> to vector<18x18xbf16>
    %cst_128 = arith.constant dense<0.000000e+00> : vector<16x18xf32>
    %139 = tpu.matmul %79, %138, %cst_128 {dimension_numbers = #tpu.dot_dimension_numbers<[1], [0], [0], [1], [0, 0, 1, 1], [], []>} : vector<16x18xbf16>, vector<18x18xbf16>, vector<16x18xf32> -> vector<16x18xf32>
    %140 = arith.truncf %139 : vector<16x18xf32> to vector<16x18xbf16>
    %c7_129 = arith.constant 7 : index
    %c0_130 = arith.constant 0 : index
    %c0_131 = arith.constant 0 : index
    %141 = vector.load %arg4[%c7_129, %c0_130, %c0_131] : memref<9x16x16xbf16, #tpu.memory_space<vmem>>, vector<1x16x16xbf16>
    %142 = vector.shape_cast %141 : vector<1x16x16xbf16> to vector<16x16xbf16>
    %cst_132 = arith.constant dense<0.000000e+00> : vector<16x18xf32>
    %143 = tpu.matmul %142, %140, %cst_132 {dimension_numbers = #tpu.dot_dimension_numbers<[1], [0], [0], [1], [0, 0, 1, 1], [], []>} : vector<16x16xbf16>, vector<16x18xbf16>, vector<16x18xf32> -> vector<16x18xf32>
    %144 = arith.addf %136, %143 : vector<16x18xf32>
    %c8_133 = arith.constant 8 : index
    %c0_134 = arith.constant 0 : index
    %c0_135 = arith.constant 0 : index
    %145 = vector.load %arg1[%c8_133, %c0_134, %c0_135] : memref<9x18x18xbf16, #tpu.memory_space<vmem>>, vector<1x18x18xbf16>
    %146 = vector.shape_cast %145 : vector<1x18x18xbf16> to vector<18x18xbf16>
    %cst_136 = arith.constant dense<0.000000e+00> : vector<16x18xf32>
    %147 = tpu.matmul %79, %146, %cst_136 {dimension_numbers = #tpu.dot_dimension_numbers<[1], [0], [0], [1], [0, 0, 1, 1], [], []>} : vector<16x18xbf16>, vector<18x18xbf16>, vector<16x18xf32> -> vector<16x18xf32>
    %148 = arith.truncf %147 : vector<16x18xf32> to vector<16x18xbf16>
    %c8_137 = arith.constant 8 : index
    %c0_138 = arith.constant 0 : index
    %c0_139 = arith.constant 0 : index
    %149 = vector.load %arg4[%c8_137, %c0_138, %c0_139] : memref<9x16x16xbf16, #tpu.memory_space<vmem>>, vector<1x16x16xbf16>
    %150 = vector.shape_cast %149 : vector<1x16x16xbf16> to vector<16x16xbf16>
    %cst_140 = arith.constant dense<0.000000e+00> : vector<16x18xf32>
    %151 = tpu.matmul %150, %148, %cst_140 {dimension_numbers = #tpu.dot_dimension_numbers<[1], [0], [0], [1], [0, 0, 1, 1], [], []>} : vector<16x16xbf16>, vector<16x18xbf16>, vector<16x18xf32> -> vector<16x18xf32>
    %152 = arith.addf %144, %151 : vector<16x18xf32>
    %c0_141 = arith.constant 0 : index
    %c0_142 = arith.constant 0 : index
    %153 = vector.load %arg5[%c0_141, %c0_142] : memref<16x1xf32, #tpu.memory_space<vmem>>, vector<16x1xf32>
    %154 = vector.broadcast %153 : vector<16x1xf32> to vector<16x18xf32>
    %155 = arith.addf %152, %154 : vector<16x18xf32>
    %cst_143 = arith.constant 0.000000e+00 : f32
    %156 = vector.broadcast %cst_143 : f32 to vector<16x18xf32>
    %157 = arith.maximumf %155, %156 : vector<16x18xf32>
    %158 = arith.truncf %157 : vector<16x18xf32> to vector<16x18xbf16>
    %cst_144 = arith.constant 0.000000e+00 : f32
    %159 = vector.broadcast %cst_144 : f32 to vector<16x18xf32>
    %c0_145 = arith.constant 0 : index
    %c0_146 = arith.constant 0 : index
    %c0_147 = arith.constant 0 : index
    %160 = vector.load %arg1[%c0_145, %c0_146, %c0_147] : memref<9x18x18xbf16, #tpu.memory_space<vmem>>, vector<1x18x18xbf16>
    %161 = vector.shape_cast %160 : vector<1x18x18xbf16> to vector<18x18xbf16>
    %cst_148 = arith.constant dense<0.000000e+00> : vector<16x18xf32>
    %162 = tpu.matmul %158, %161, %cst_148 {dimension_numbers = #tpu.dot_dimension_numbers<[1], [0], [0], [1], [0, 0, 1, 1], [], []>} : vector<16x18xbf16>, vector<18x18xbf16>, vector<16x18xf32> -> vector<16x18xf32>
    %163 = arith.truncf %162 : vector<16x18xf32> to vector<16x18xbf16>
    %c0_149 = arith.constant 0 : index
    %c0_150 = arith.constant 0 : index
    %c0_151 = arith.constant 0 : index
    %164 = vector.load %arg6[%c0_149, %c0_150, %c0_151] : memref<9x16x16xbf16, #tpu.memory_space<vmem>>, vector<1x16x16xbf16>
    %165 = vector.shape_cast %164 : vector<1x16x16xbf16> to vector<16x16xbf16>
    %cst_152 = arith.constant dense<0.000000e+00> : vector<16x18xf32>
    %166 = tpu.matmul %165, %163, %cst_152 {dimension_numbers = #tpu.dot_dimension_numbers<[1], [0], [0], [1], [0, 0, 1, 1], [], []>} : vector<16x16xbf16>, vector<16x18xbf16>, vector<16x18xf32> -> vector<16x18xf32>
    %167 = arith.addf %159, %166 : vector<16x18xf32>
    %c1_153 = arith.constant 1 : index
    %c0_154 = arith.constant 0 : index
    %c0_155 = arith.constant 0 : index
    %168 = vector.load %arg1[%c1_153, %c0_154, %c0_155] : memref<9x18x18xbf16, #tpu.memory_space<vmem>>, vector<1x18x18xbf16>
    %169 = vector.shape_cast %168 : vector<1x18x18xbf16> to vector<18x18xbf16>
    %cst_156 = arith.constant dense<0.000000e+00> : vector<16x18xf32>
    %170 = tpu.matmul %158, %169, %cst_156 {dimension_numbers = #tpu.dot_dimension_numbers<[1], [0], [0], [1], [0, 0, 1, 1], [], []>} : vector<16x18xbf16>, vector<18x18xbf16>, vector<16x18xf32> -> vector<16x18xf32>
    %171 = arith.truncf %170 : vector<16x18xf32> to vector<16x18xbf16>
    %c1_157 = arith.constant 1 : index
    %c0_158 = arith.constant 0 : index
    %c0_159 = arith.constant 0 : index
    %172 = vector.load %arg6[%c1_157, %c0_158, %c0_159] : memref<9x16x16xbf16, #tpu.memory_space<vmem>>, vector<1x16x16xbf16>
    %173 = vector.shape_cast %172 : vector<1x16x16xbf16> to vector<16x16xbf16>
    %cst_160 = arith.constant dense<0.000000e+00> : vector<16x18xf32>
    %174 = tpu.matmul %173, %171, %cst_160 {dimension_numbers = #tpu.dot_dimension_numbers<[1], [0], [0], [1], [0, 0, 1, 1], [], []>} : vector<16x16xbf16>, vector<16x18xbf16>, vector<16x18xf32> -> vector<16x18xf32>
    %175 = arith.addf %167, %174 : vector<16x18xf32>
    %c2_161 = arith.constant 2 : index
    %c0_162 = arith.constant 0 : index
    %c0_163 = arith.constant 0 : index
    %176 = vector.load %arg1[%c2_161, %c0_162, %c0_163] : memref<9x18x18xbf16, #tpu.memory_space<vmem>>, vector<1x18x18xbf16>
    %177 = vector.shape_cast %176 : vector<1x18x18xbf16> to vector<18x18xbf16>
    %cst_164 = arith.constant dense<0.000000e+00> : vector<16x18xf32>
    %178 = tpu.matmul %158, %177, %cst_164 {dimension_numbers = #tpu.dot_dimension_numbers<[1], [0], [0], [1], [0, 0, 1, 1], [], []>} : vector<16x18xbf16>, vector<18x18xbf16>, vector<16x18xf32> -> vector<16x18xf32>
    %179 = arith.truncf %178 : vector<16x18xf32> to vector<16x18xbf16>
    %c2_165 = arith.constant 2 : index
    %c0_166 = arith.constant 0 : index
    %c0_167 = arith.constant 0 : index
    %180 = vector.load %arg6[%c2_165, %c0_166, %c0_167] : memref<9x16x16xbf16, #tpu.memory_space<vmem>>, vector<1x16x16xbf16>
    %181 = vector.shape_cast %180 : vector<1x16x16xbf16> to vector<16x16xbf16>
    %cst_168 = arith.constant dense<0.000000e+00> : vector<16x18xf32>
    %182 = tpu.matmul %181, %179, %cst_168 {dimension_numbers = #tpu.dot_dimension_numbers<[1], [0], [0], [1], [0, 0, 1, 1], [], []>} : vector<16x16xbf16>, vector<16x18xbf16>, vector<16x18xf32> -> vector<16x18xf32>
    %183 = arith.addf %175, %182 : vector<16x18xf32>
    %c3_169 = arith.constant 3 : index
    %c0_170 = arith.constant 0 : index
    %c0_171 = arith.constant 0 : index
    %184 = vector.load %arg1[%c3_169, %c0_170, %c0_171] : memref<9x18x18xbf16, #tpu.memory_space<vmem>>, vector<1x18x18xbf16>
    %185 = vector.shape_cast %184 : vector<1x18x18xbf16> to vector<18x18xbf16>
    %cst_172 = arith.constant dense<0.000000e+00> : vector<16x18xf32>
    %186 = tpu.matmul %158, %185, %cst_172 {dimension_numbers = #tpu.dot_dimension_numbers<[1], [0], [0], [1], [0, 0, 1, 1], [], []>} : vector<16x18xbf16>, vector<18x18xbf16>, vector<16x18xf32> -> vector<16x18xf32>
    %187 = arith.truncf %186 : vector<16x18xf32> to vector<16x18xbf16>
    %c3_173 = arith.constant 3 : index
    %c0_174 = arith.constant 0 : index
    %c0_175 = arith.constant 0 : index
    %188 = vector.load %arg6[%c3_173, %c0_174, %c0_175] : memref<9x16x16xbf16, #tpu.memory_space<vmem>>, vector<1x16x16xbf16>
    %189 = vector.shape_cast %188 : vector<1x16x16xbf16> to vector<16x16xbf16>
    %cst_176 = arith.constant dense<0.000000e+00> : vector<16x18xf32>
    %190 = tpu.matmul %189, %187, %cst_176 {dimension_numbers = #tpu.dot_dimension_numbers<[1], [0], [0], [1], [0, 0, 1, 1], [], []>} : vector<16x16xbf16>, vector<16x18xbf16>, vector<16x18xf32> -> vector<16x18xf32>
    %191 = arith.addf %183, %190 : vector<16x18xf32>
    %c4_177 = arith.constant 4 : index
    %c0_178 = arith.constant 0 : index
    %c0_179 = arith.constant 0 : index
    %192 = vector.load %arg1[%c4_177, %c0_178, %c0_179] : memref<9x18x18xbf16, #tpu.memory_space<vmem>>, vector<1x18x18xbf16>
    %193 = vector.shape_cast %192 : vector<1x18x18xbf16> to vector<18x18xbf16>
    %cst_180 = arith.constant dense<0.000000e+00> : vector<16x18xf32>
    %194 = tpu.matmul %158, %193, %cst_180 {dimension_numbers = #tpu.dot_dimension_numbers<[1], [0], [0], [1], [0, 0, 1, 1], [], []>} : vector<16x18xbf16>, vector<18x18xbf16>, vector<16x18xf32> -> vector<16x18xf32>
    %195 = arith.truncf %194 : vector<16x18xf32> to vector<16x18xbf16>
    %c4_181 = arith.constant 4 : index
    %c0_182 = arith.constant 0 : index
    %c0_183 = arith.constant 0 : index
    %196 = vector.load %arg6[%c4_181, %c0_182, %c0_183] : memref<9x16x16xbf16, #tpu.memory_space<vmem>>, vector<1x16x16xbf16>
    %197 = vector.shape_cast %196 : vector<1x16x16xbf16> to vector<16x16xbf16>
    %cst_184 = arith.constant dense<0.000000e+00> : vector<16x18xf32>
    %198 = tpu.matmul %197, %195, %cst_184 {dimension_numbers = #tpu.dot_dimension_numbers<[1], [0], [0], [1], [0, 0, 1, 1], [], []>} : vector<16x16xbf16>, vector<16x18xbf16>, vector<16x18xf32> -> vector<16x18xf32>
    %199 = arith.addf %191, %198 : vector<16x18xf32>
    %c5_185 = arith.constant 5 : index
    %c0_186 = arith.constant 0 : index
    %c0_187 = arith.constant 0 : index
    %200 = vector.load %arg1[%c5_185, %c0_186, %c0_187] : memref<9x18x18xbf16, #tpu.memory_space<vmem>>, vector<1x18x18xbf16>
    %201 = vector.shape_cast %200 : vector<1x18x18xbf16> to vector<18x18xbf16>
    %cst_188 = arith.constant dense<0.000000e+00> : vector<16x18xf32>
    %202 = tpu.matmul %158, %201, %cst_188 {dimension_numbers = #tpu.dot_dimension_numbers<[1], [0], [0], [1], [0, 0, 1, 1], [], []>} : vector<16x18xbf16>, vector<18x18xbf16>, vector<16x18xf32> -> vector<16x18xf32>
    %203 = arith.truncf %202 : vector<16x18xf32> to vector<16x18xbf16>
    %c5_189 = arith.constant 5 : index
    %c0_190 = arith.constant 0 : index
    %c0_191 = arith.constant 0 : index
    %204 = vector.load %arg6[%c5_189, %c0_190, %c0_191] : memref<9x16x16xbf16, #tpu.memory_space<vmem>>, vector<1x16x16xbf16>
    %205 = vector.shape_cast %204 : vector<1x16x16xbf16> to vector<16x16xbf16>
    %cst_192 = arith.constant dense<0.000000e+00> : vector<16x18xf32>
    %206 = tpu.matmul %205, %203, %cst_192 {dimension_numbers = #tpu.dot_dimension_numbers<[1], [0], [0], [1], [0, 0, 1, 1], [], []>} : vector<16x16xbf16>, vector<16x18xbf16>, vector<16x18xf32> -> vector<16x18xf32>
    %207 = arith.addf %199, %206 : vector<16x18xf32>
    %c6_193 = arith.constant 6 : index
    %c0_194 = arith.constant 0 : index
    %c0_195 = arith.constant 0 : index
    %208 = vector.load %arg1[%c6_193, %c0_194, %c0_195] : memref<9x18x18xbf16, #tpu.memory_space<vmem>>, vector<1x18x18xbf16>
    %209 = vector.shape_cast %208 : vector<1x18x18xbf16> to vector<18x18xbf16>
    %cst_196 = arith.constant dense<0.000000e+00> : vector<16x18xf32>
    %210 = tpu.matmul %158, %209, %cst_196 {dimension_numbers = #tpu.dot_dimension_numbers<[1], [0], [0], [1], [0, 0, 1, 1], [], []>} : vector<16x18xbf16>, vector<18x18xbf16>, vector<16x18xf32> -> vector<16x18xf32>
    %211 = arith.truncf %210 : vector<16x18xf32> to vector<16x18xbf16>
    %c6_197 = arith.constant 6 : index
    %c0_198 = arith.constant 0 : index
    %c0_199 = arith.constant 0 : index
    %212 = vector.load %arg6[%c6_197, %c0_198, %c0_199] : memref<9x16x16xbf16, #tpu.memory_space<vmem>>, vector<1x16x16xbf16>
    %213 = vector.shape_cast %212 : vector<1x16x16xbf16> to vector<16x16xbf16>
    %cst_200 = arith.constant dense<0.000000e+00> : vector<16x18xf32>
    %214 = tpu.matmul %213, %211, %cst_200 {dimension_numbers = #tpu.dot_dimension_numbers<[1], [0], [0], [1], [0, 0, 1, 1], [], []>} : vector<16x16xbf16>, vector<16x18xbf16>, vector<16x18xf32> -> vector<16x18xf32>
    %215 = arith.addf %207, %214 : vector<16x18xf32>
    %c7_201 = arith.constant 7 : index
    %c0_202 = arith.constant 0 : index
    %c0_203 = arith.constant 0 : index
    %216 = vector.load %arg1[%c7_201, %c0_202, %c0_203] : memref<9x18x18xbf16, #tpu.memory_space<vmem>>, vector<1x18x18xbf16>
    %217 = vector.shape_cast %216 : vector<1x18x18xbf16> to vector<18x18xbf16>
    %cst_204 = arith.constant dense<0.000000e+00> : vector<16x18xf32>
    %218 = tpu.matmul %158, %217, %cst_204 {dimension_numbers = #tpu.dot_dimension_numbers<[1], [0], [0], [1], [0, 0, 1, 1], [], []>} : vector<16x18xbf16>, vector<18x18xbf16>, vector<16x18xf32> -> vector<16x18xf32>
    %219 = arith.truncf %218 : vector<16x18xf32> to vector<16x18xbf16>
    %c7_205 = arith.constant 7 : index
    %c0_206 = arith.constant 0 : index
    %c0_207 = arith.constant 0 : index
    %220 = vector.load %arg6[%c7_205, %c0_206, %c0_207] : memref<9x16x16xbf16, #tpu.memory_space<vmem>>, vector<1x16x16xbf16>
    %221 = vector.shape_cast %220 : vector<1x16x16xbf16> to vector<16x16xbf16>
    %cst_208 = arith.constant dense<0.000000e+00> : vector<16x18xf32>
    %222 = tpu.matmul %221, %219, %cst_208 {dimension_numbers = #tpu.dot_dimension_numbers<[1], [0], [0], [1], [0, 0, 1, 1], [], []>} : vector<16x16xbf16>, vector<16x18xbf16>, vector<16x18xf32> -> vector<16x18xf32>
    %223 = arith.addf %215, %222 : vector<16x18xf32>
    %c8_209 = arith.constant 8 : index
    %c0_210 = arith.constant 0 : index
    %c0_211 = arith.constant 0 : index
    %224 = vector.load %arg1[%c8_209, %c0_210, %c0_211] : memref<9x18x18xbf16, #tpu.memory_space<vmem>>, vector<1x18x18xbf16>
    %225 = vector.shape_cast %224 : vector<1x18x18xbf16> to vector<18x18xbf16>
    %cst_212 = arith.constant dense<0.000000e+00> : vector<16x18xf32>
    %226 = tpu.matmul %158, %225, %cst_212 {dimension_numbers = #tpu.dot_dimension_numbers<[1], [0], [0], [1], [0, 0, 1, 1], [], []>} : vector<16x18xbf16>, vector<18x18xbf16>, vector<16x18xf32> -> vector<16x18xf32>
    %227 = arith.truncf %226 : vector<16x18xf32> to vector<16x18xbf16>
    %c8_213 = arith.constant 8 : index
    %c0_214 = arith.constant 0 : index
    %c0_215 = arith.constant 0 : index
    %228 = vector.load %arg6[%c8_213, %c0_214, %c0_215] : memref<9x16x16xbf16, #tpu.memory_space<vmem>>, vector<1x16x16xbf16>
    %229 = vector.shape_cast %228 : vector<1x16x16xbf16> to vector<16x16xbf16>
    %cst_216 = arith.constant dense<0.000000e+00> : vector<16x18xf32>
    %230 = tpu.matmul %229, %227, %cst_216 {dimension_numbers = #tpu.dot_dimension_numbers<[1], [0], [0], [1], [0, 0, 1, 1], [], []>} : vector<16x16xbf16>, vector<16x18xbf16>, vector<16x18xf32> -> vector<16x18xf32>
    %231 = arith.addf %223, %230 : vector<16x18xf32>
    %c0_217 = arith.constant 0 : index
    %c0_218 = arith.constant 0 : index
    %232 = vector.load %arg7[%c0_217, %c0_218] : memref<16x1xf32, #tpu.memory_space<vmem>>, vector<16x1xf32>
    %233 = vector.broadcast %232 : vector<16x1xf32> to vector<16x18xf32>
    %234 = arith.addf %231, %233 : vector<16x18xf32>
    %235 = vector.extract_strided_slice %234 {offsets = [0, 0], sizes = [16, 9], strides = [1, 1]} : vector<16x18xf32> to vector<16x9xf32>
    %236 = arith.truncf %235 : vector<16x9xf32> to vector<16x9xbf16>
    %c0_219 = arith.constant 0 : index
    %c0_220 = arith.constant 0 : index
    %c0_221 = arith.constant 0 : index
    %237 = vector.load %arg9[%c0_219, %c0_220, %c0_221] : memref<2x16x9xbf16, #tpu.memory_space<vmem>>, vector<1x16x9xbf16>
    %238 = vector.shape_cast %237 : vector<1x16x9xbf16> to vector<16x9xbf16>
    %239 = vector.shape_cast %236 : vector<16x9xbf16> to vector<1x16x9xbf16>
    tpu.vector_store %arg9[%c0_219, %c0_220, %c0_221], %239 {strides = array<i32>} : memref<2x16x9xbf16, #tpu.memory_space<vmem>>, vector<1x16x9xbf16>,
    %240 = vector.extract_strided_slice %234 {offsets = [0, 9], sizes = [16, 9], strides = [1, 1]} : vector<16x18xf32> to vector<16x9xf32>
    %241 = arith.truncf %240 : vector<16x9xf32> to vector<16x9xbf16>
    %c1_222 = arith.constant 1 : index
    %c0_223 = arith.constant 0 : index
    %c0_224 = arith.constant 0 : index
    %242 = vector.load %arg9[%c1_222, %c0_223, %c0_224] : memref<2x16x9xbf16, #tpu.memory_space<vmem>>, vector<1x16x9xbf16>
    %243 = vector.shape_cast %242 : vector<1x16x9xbf16> to vector<16x9xbf16>
    %244 = vector.shape_cast %241 : vector<16x9xbf16> to vector<1x16x9xbf16>
    tpu.vector_store %arg9[%c1_222, %c0_223, %c0_224], %244 {strides = array<i32>} : memref<2x16x9xbf16, #tpu.memory_space<vmem>>, vector<1x16x9xbf16>,
    return
  }
  func.func @transform_0(%arg0: i32) -> (i32, i32, i32) {
    %c0_i32 = arith.constant 0 : i32
    %c0_i32_0 = arith.constant 0 : i32
    %c0_i32_1 = arith.constant 0 : i32
    %c0_i32_2 = arith.constant 0 : i32
    return %c0_i32, %c0_i32_0, %c0_i32_1 : i32, i32, i32
  }
  func.func @transform_1(%arg0: i32) -> (i32, i32, i32) {
    %c0_i32 = arith.constant 0 : i32
    %c0_i32_0 = arith.constant 0 : i32
    %c0_i32_1 = arith.constant 0 : i32
    %c0_i32_2 = arith.constant 0 : i32
    return %c0_i32, %c0_i32_0, %c0_i32_1 : i32, i32, i32
  }
  func.func @transform_2(%arg0: i32) -> (i32, i32) {
    %c0_i32 = arith.constant 0 : i32
    %c0_i32_0 = arith.constant 0 : i32
    %c0_i32_1 = arith.constant 0 : i32
    return %c0_i32, %c0_i32_0 : i32, i32
  }
  func.func @transform_3(%arg0: i32) -> (i32, i32, i32) {
    %c0_i32 = arith.constant 0 : i32
    %c0_i32_0 = arith.constant 0 : i32
    %c0_i32_1 = arith.constant 0 : i32
    %c0_i32_2 = arith.constant 0 : i32
    return %c0_i32, %c0_i32_0, %c0_i32_1 : i32, i32, i32
  }
  func.func @transform_4(%arg0: i32) -> (i32, i32) {
    %c0_i32 = arith.constant 0 : i32
    %c0_i32_0 = arith.constant 0 : i32
    %c0_i32_1 = arith.constant 0 : i32
    return %c0_i32, %c0_i32_0 : i32, i32
  }
  func.func @transform_5(%arg0: i32) -> (i32, i32, i32) {
    %c0_i32 = arith.constant 0 : i32
    %c0_i32_0 = arith.constant 0 : i32
    %c0_i32_1 = arith.constant 0 : i32
    %c0_i32_2 = arith.constant 0 : i32
    return %c0_i32, %c0_i32_0, %c0_i32_1 : i32, i32, i32
  }
  func.func @transform_6(%arg0: i32) -> (i32, i32) {
    %c0_i32 = arith.constant 0 : i32
    %c0_i32_0 = arith.constant 0 : i32
    %c0_i32_1 = arith.constant 0 : i32
    return %c0_i32, %c0_i32_0 : i32, i32
  }
  func.func @transform_7(%arg0: i32) -> (i32, i32) {
    %c0_i32 = arith.constant 0 : i32
    %c0_i32_0 = arith.constant 0 : i32
    %c0_i32_1 = arith.constant 0 : i32
    return %c0_i32, %c0_i32_0 : i32, i32
  }
  func.func @transform_8(%arg0: i32) -> (i32, i32, i32) {
    %c0_i32 = arith.constant 0 : i32
    %c0_i32_0 = arith.constant 0 : i32
    %c0_i32_1 = arith.constant 0 : i32
    %c0_i32_2 = arith.constant 0 : i32
    return %c0_i32, %c0_i32_0, %c0_i32_1 : i32, i32, i32
  }
}

module attributes {stable_mosaic.version = 11 : i64} {
  func.func @_tail_kernel(%arg0: i32, %arg1: i32, %arg2: memref<16x16xbf16, #tpu.memory_space<vmem>>, %arg3: memref<16x1xf32, #tpu.memory_space<vmem>>, %arg4: memref<32x16xbf16, #tpu.memory_space<vmem>>, %arg5: memref<32x1xf32, #tpu.memory_space<vmem>>, %arg6: memref<1x16x9xbf16, #tpu.memory_space<vmem>>, %arg7: memref<9x1024xbf16, #tpu.memory_space<vmem>>, %arg8: memref<1x16x1024xbf16, #tpu.memory_space<vmem>>, %arg9: memref<1x32x1024xf32, #tpu.memory_space<vmem>>, %arg10: memref<1x32x1024xf32, #tpu.memory_space<vmem>>) attributes {dimension_semantics = [#tpu.dimension_semantics<parallel>, #tpu.dimension_semantics<parallel>], iteration_bounds = array<i64: 2, 1>, scalar_prefetch = 0 : i64, scratch_operands = 0 : i64, tpu.core_type = #tpu.core_type<tc>, window_params = [{pipeline_mode = #tpu.pipeline_mode<synchronous>, transform_indices = @transform_0, window_bounds = array<i64: 16, 16>}, {pipeline_mode = #tpu.pipeline_mode<synchronous>, transform_indices = @transform_1, window_bounds = array<i64: 16, 1>}, {pipeline_mode = #tpu.pipeline_mode<synchronous>, transform_indices = @transform_2, window_bounds = array<i64: 32, 16>}, {pipeline_mode = #tpu.pipeline_mode<synchronous>, transform_indices = @transform_3, window_bounds = array<i64: 32, 1>}, {transform_indices = @transform_4, window_bounds = array<i64: 1, 16, 9>}, {transform_indices = @transform_5, window_bounds = array<i64: 9, 1024>}, {transform_indices = @transform_6, window_bounds = array<i64: 1, 16, 1024>}, {transform_indices = @transform_7, window_bounds = array<i64: 1, 32, 1024>}, {transform_indices = @transform_8, window_bounds = array<i64: 1, 32, 1024>}]} {
    %c0 = arith.constant 0 : index
    %c0_0 = arith.constant 0 : index
    %c0_1 = arith.constant 0 : index
    %0 = vector.load %arg6[%c0, %c0_0, %c0_1] : memref<1x16x9xbf16, #tpu.memory_space<vmem>>, vector<1x16x9xbf16>
    %1 = vector.shape_cast %0 : vector<1x16x9xbf16> to vector<16x9xbf16>
    %c0_2 = arith.constant 0 : index
    %c0_3 = arith.constant 0 : index
    %2 = vector.load %arg7[%c0_2, %c0_3] : memref<9x1024xbf16, #tpu.memory_space<vmem>>, vector<9x1024xbf16>
    %cst = arith.constant dense<0.000000e+00> : vector<16x1024xf32>
    %3 = tpu.matmul %1, %2, %cst {dimension_numbers = #tpu.dot_dimension_numbers<[1], [0], [0], [1], [0, 0, 1, 1], [], []>} : vector<16x9xbf16>, vector<9x1024xbf16>, vector<16x1024xf32> -> vector<16x1024xf32>
    %c0_4 = arith.constant 0 : index
    %c0_5 = arith.constant 0 : index
    %4 = vector.load %arg2[%c0_4, %c0_5] : memref<16x16xbf16, #tpu.memory_space<vmem>>, vector<16x16xbf16>
    %c0_6 = arith.constant 0 : index
    %c0_7 = arith.constant 0 : index
    %c0_8 = arith.constant 0 : index
    %5 = vector.load %arg8[%c0_6, %c0_7, %c0_8] : memref<1x16x1024xbf16, #tpu.memory_space<vmem>>, vector<1x16x1024xbf16>
    %6 = vector.shape_cast %5 : vector<1x16x1024xbf16> to vector<16x1024xbf16>
    %cst_9 = arith.constant dense<0.000000e+00> : vector<16x1024xf32>
    %7 = tpu.matmul %4, %6, %cst_9 {dimension_numbers = #tpu.dot_dimension_numbers<[1], [0], [0], [1], [0, 0, 1, 1], [], []>} : vector<16x16xbf16>, vector<16x1024xbf16>, vector<16x1024xf32> -> vector<16x1024xf32>
    %c0_10 = arith.constant 0 : index
    %c0_11 = arith.constant 0 : index
    %8 = vector.load %arg3[%c0_10, %c0_11] : memref<16x1xf32, #tpu.memory_space<vmem>>, vector<16x1xf32>
    %9 = vector.broadcast %8 : vector<16x1xf32> to vector<16x1024xf32>
    %10 = arith.addf %7, %9 : vector<16x1024xf32>
    %11 = arith.addf %3, %10 : vector<16x1024xf32>
    %12 = arith.truncf %11 : vector<16x1024xf32> to vector<16x1024xbf16>
    %c0_12 = arith.constant 0 : index
    %c0_13 = arith.constant 0 : index
    %13 = vector.load %arg4[%c0_12, %c0_13] : memref<32x16xbf16, #tpu.memory_space<vmem>>, vector<32x16xbf16>
    %cst_14 = arith.constant dense<0.000000e+00> : vector<32x1024xf32>
    %14 = tpu.matmul %13, %12, %cst_14 {dimension_numbers = #tpu.dot_dimension_numbers<[1], [0], [0], [1], [0, 0, 1, 1], [], []>} : vector<32x16xbf16>, vector<16x1024xbf16>, vector<32x1024xf32> -> vector<32x1024xf32>
    %c0_15 = arith.constant 0 : index
    %c0_16 = arith.constant 0 : index
    %15 = vector.load %arg5[%c0_15, %c0_16] : memref<32x1xf32, #tpu.memory_space<vmem>>, vector<32x1xf32>
    %16 = vector.broadcast %15 : vector<32x1xf32> to vector<32x1024xf32>
    %17 = arith.addf %14, %16 : vector<32x1024xf32>
    %cst_17 = arith.constant 0.000000e+00 : f32
    %18 = vector.broadcast %cst_17 : f32 to vector<32x1024xf32>
    %19 = arith.subf %18, %17 : vector<32x1024xf32>
    %20 = math.exp %19 : vector<32x1024xf32>
    %cst_18 = arith.constant 1.000000e+00 : f32
    %21 = vector.broadcast %cst_18 : f32 to vector<32x1024xf32>
    %22 = arith.addf %21, %20 : vector<32x1024xf32>
    %23 = tpu.reciprocal %22 {approx = true} : vector<32x1024xf32> -> vector<32x1024xf32>
    %c0_19 = arith.constant 0 : index
    %c0_20 = arith.constant 0 : index
    %c0_21 = arith.constant 0 : index
    %24 = vector.load %arg9[%c0_19, %c0_20, %c0_21] : memref<1x32x1024xf32, #tpu.memory_space<vmem>>, vector<1x32x1024xf32>
    %25 = vector.shape_cast %24 : vector<1x32x1024xf32> to vector<32x1024xf32>
    %26 = arith.mulf %25, %23 : vector<32x1024xf32>
    %c0_22 = arith.constant 0 : index
    %c0_23 = arith.constant 0 : index
    %c0_24 = arith.constant 0 : index
    %27 = vector.load %arg10[%c0_22, %c0_23, %c0_24] : memref<1x32x1024xf32, #tpu.memory_space<vmem>>, vector<1x32x1024xf32>
    %28 = vector.shape_cast %27 : vector<1x32x1024xf32> to vector<32x1024xf32>
    %29 = vector.shape_cast %26 : vector<32x1024xf32> to vector<1x32x1024xf32>
    tpu.vector_store %arg10[%c0_22, %c0_23, %c0_24], %29 {strides = array<i32>} : memref<1x32x1024xf32, #tpu.memory_space<vmem>>, vector<1x32x1024xf32>,
    return
  }
  func.func @transform_0(%arg0: i32, %arg1: i32) -> (i32, i32) {
    %c0_i32 = arith.constant 0 : i32
    %c0_i32_0 = arith.constant 0 : i32
    %c0_i32_1 = arith.constant 0 : i32
    return %c0_i32, %c0_i32_0 : i32, i32
  }
  func.func @transform_1(%arg0: i32, %arg1: i32) -> (i32, i32) {
    %c0_i32 = arith.constant 0 : i32
    %c0_i32_0 = arith.constant 0 : i32
    %c0_i32_1 = arith.constant 0 : i32
    return %c0_i32, %c0_i32_0 : i32, i32
  }
  func.func @transform_2(%arg0: i32, %arg1: i32) -> (i32, i32) {
    %c0_i32 = arith.constant 0 : i32
    %c0_i32_0 = arith.constant 0 : i32
    %c0_i32_1 = arith.constant 0 : i32
    return %c0_i32, %c0_i32_0 : i32, i32
  }
  func.func @transform_3(%arg0: i32, %arg1: i32) -> (i32, i32) {
    %c0_i32 = arith.constant 0 : i32
    %c0_i32_0 = arith.constant 0 : i32
    %c0_i32_1 = arith.constant 0 : i32
    return %c0_i32, %c0_i32_0 : i32, i32
  }
  func.func @transform_4(%arg0: i32, %arg1: i32) -> (i32, i32, i32) {
    %c0_i32 = arith.constant 0 : i32
    %c0_i32_0 = arith.constant 0 : i32
    %c0_i32_1 = arith.constant 0 : i32
    return %arg0, %c0_i32, %c0_i32_0 : i32, i32, i32
  }
  func.func @transform_5(%arg0: i32, %arg1: i32) -> (i32, i32) {
    %c0_i32 = arith.constant 0 : i32
    %c0_i32_0 = arith.constant 0 : i32
    return %c0_i32, %arg1 : i32, i32
  }
  func.func @transform_6(%arg0: i32, %arg1: i32) -> (i32, i32, i32) {
    %c0_i32 = arith.constant 0 : i32
    %c0_i32_0 = arith.constant 0 : i32
    return %arg0, %c0_i32, %arg1 : i32, i32, i32
  }
  func.func @transform_7(%arg0: i32, %arg1: i32) -> (i32, i32, i32) {
    %c0_i32 = arith.constant 0 : i32
    %c0_i32_0 = arith.constant 0 : i32
    return %arg0, %c0_i32, %arg1 : i32, i32, i32
  }
  func.func @transform_8(%arg0: i32, %arg1: i32) -> (i32, i32, i32) {
    %c0_i32 = arith.constant 0 : i32
    %c0_i32_0 = arith.constant 0 : i32
    return %arg0, %c0_i32, %arg1 : i32, i32, i32
  }
}

</mosaic_0001>

<bundles_post_ra>
// kernel: esa_fwd.4
= control target key start
LH: loop header
LB: loop body
LE: loop exit
PB: predicated region body
PF: predicated region fallthrough
CT: control target
= control target key end

     0   :  { %s594_s12 = smov 0   ;;  %s596_s13 = smov 0   ;;  %s692_s0 = inlined_call_operand.vmem [shape: bf16[16,32], index: 0, kind: input, shape index: {}]   ;;  %s693_s1 = inlined_call_operand.vmem [shape: f32[16,1], index: 1, kind: input, shape index: {}]   ;;  %s694_s2 = inlined_call_operand.vmem [shape: f32[2,32,1024], index: 2, kind: input, shape index: {}]   ;;  %s695_s3 = inlined_call_operand.vmem [shape: bf16[2,16,1024], index: 3, kind: output, shape index: {}]  }
   0x1   :  { %s598_s14 = smov 0  }
   0x2 LB: > { %s25_s15 = sadd.s32 1, %s567_s13  ;;  %p501_p0 = scmp.ge.s32.totalorder %s571_s14, 1  ;;  %s571_s14 = sphi %s598_s14, %s13_s14   ;;  %s567_s13 = sphi %s596_s13, %s697_s13   ;;  %s563_s12 = sphi %s594_s12, %s696_s12  }
   0x3   : > { %p27_p1 = scmp.ge.s32.totalorder %s25_s15, 2  ;;  %p158_p2 = scmp.lt.s32.totalorder %s571_s14, 3 }
   0x5   : > { %s699_s15 = smov (%p27_p1, %s25_s15), 0  ;;  %p159_p3 = pnand %p501_p0, %p158_p2 }
   0x6   : > { %p191_p4 = scmp.lt.s32.totalorder (!%p159_p3), %s563_s12, 1 }
   0x7   : > { %162 = sbr.rel (%p159_p3) target bundleno = 189 (0xbd), region = 32 }
   0xc   : > { %v261_v0 = vld [vmem:[%s693_s1] sm:$0xff]  ;;  %v573_v1 = vmov 0   ;;  %s701_s12 = smov (!%p191_p4, %s563_s12), 1  ;;  %v262_v5 = vld [vmem:[%s693_s1 + $0x8] sm:$0xff]  ;;  %vm278_vm0 = vcmask 261120  }
   0xd   : > { %548 = vset.pattern.permute.xlu0 %v573_v1  ;;  %s520_s18 = sshll.u32 %s701_s12, 8  ;;  %v522_v24 = vld [vmem:[%s692_s0] sm:$0xff]  ;;  %s521_s26 = sshll.u32 %s701_s12, 6 }
   0xe   : > { %265 = vperm.xlu0 %548, %v261_v0   ;;  %s621_s21 = scalar_lea.vmem %s694_s2, %s520_s18  ;;  %s673_s29 = scalar_lea.vmem %s695_s3, %s521_s26 }
   0xf   : > { %v227_v2 = vld [vmem:[%s621_s21 + $0x80] sm:$0xff]  ;;  %v228_v4 = vld [vmem:[%s621_s21 + $0x88] sm:$0xff]  ;;  %v229_v8 = vld [vmem:[%s621_s21 + $0x90] sm:$0xff] }
  0x10   : > { %v235_v3 = vld [vmem:[%s621_s21 + $0xc0] sm:$0xff]  ;;  %v236_v7 = vld [vmem:[%s621_s21 + $0xc8] sm:$0xff]  ;;  %v237_v9 = vld [vmem:[%s621_s21 + $0xd0] sm:$0xff] }
  0x11   : > { %v251_v6 = vpack.c.bf16 %v235_v3, %v227_v2  ;;  %v252_v10 = vpack.c.bf16 %v236_v7, %v228_v4  ;;  %v253_v11 = vpack.c.bf16 %v237_v9, %v229_v8  ;;  %v230_v12 = vld [vmem:[%s621_s21 + $0x98] sm:$0xff]  ;;  %v211_v14 = vld [vmem:[%s621_s21] sm:$0xff]  ;;  %v212_v17 = vld [vmem:[%s621_s21 + $0x8] sm:$0xff] }
  0x12   : > { %v238_v13 = vld [vmem:[%s621_s21 + $0xd8] sm:$0xff]  ;;  %v219_v16 = vld [vmem:[%s621_s21 + $0x40] sm:$0xff]  ;;  %v220_v18 = vld [vmem:[%s621_s21 + $0x48] sm:$0xff] }
  0x13   : > { %288 = vmatpush.bf16.msra.mxu0 %v251_v6  ;;  %v254_v15 = vpack.c.bf16 %v238_v13, %v230_v12  ;;  %302 = vmatpush.bf16.msra.mxu1 %v252_v10  ;;  %v243_v19 = vpack.c.bf16 %v219_v16, %v211_v14  ;;  %v244_v20 = vpack.c.bf16 %v220_v18, %v212_v17  ;;  %v213_v21 = vld [vmem:[%s621_s21 + $0x10] sm:$0xff]  ;;  %v214_v23 = vld [vmem:[%s621_s21 + $0x18] sm:$0xff]  ;;  %v231_v33 = vld [vmem:[%s621_s21 + $0xa0] sm:$0xff] }
  0x14   : > { %316 = vmatpush.bf16.msra.mxu2 %v253_v11  ;;  %v221_v22 = vld [vmem:[%s621_s21 + $0x50] sm:$0xff]  ;;  %v222_v26 = vld [vmem:[%s621_s21 + $0x58] sm:$0xff]  ;;  %v239_v35 = vld [vmem:[%s621_s21 + $0xe0] sm:$0xff] }
  0x15   : > { %330 = vmatpush.bf16.msra.mxu3 %v254_v15  ;;  %v245_v25 = vpack.c.bf16 %v221_v22, %v213_v21  ;;  %v233_v27 = vld [vmem:[%s621_s21 + $0xb0] sm:$0xff]  ;;  %v246_v29 = vpack.c.bf16 %v222_v26, %v214_v23  ;;  %v234_v31 = vld [vmem:[%s621_s21 + $0xb8] sm:$0xff]  ;;  %v232_v36 = vld [vmem:[%s621_s21 + $0xa8] sm:$0xff]  ;;  %v255_v38 = vpack.c.bf16 %v239_v35, %v231_v33 }
  0x16   : > { %v241_v28 = vld [vmem:[%s621_s21 + $0xf0] sm:$0xff]  ;;  %270 = vperm.xlu0 %548, %v262_v5   ;;  %v242_v32 = vld [vmem:[%s621_s21 + $0xf8] sm:$0xff]  ;;  %v240_v37 = vld [vmem:[%s621_s21 + $0xe8] sm:$0xff] }
  0x17   : > { %v257_v30 = vpack.c.bf16 %v241_v28, %v233_v27  ;;  %289 = vmatpush.bf16.msra.mxu0 %v243_v19  ;;  %v258_v34 = vpack.c.bf16 %v242_v32, %v234_v31  ;;  %303 = vmatpush.bf16.msra.mxu1 %v244_v20  ;;  %v217_v39 = vld [vmem:[%s621_s21 + $0x30] sm:$0xff]  ;;  %v218_v41 = vld [vmem:[%s621_s21 + $0x38] sm:$0xff]  ;;  %v256_v42 = vpack.c.bf16 %v240_v37, %v232_v36  ;;  %v215_v45 = vld [vmem:[%s621_s21 + $0x20] sm:$0xff] }
  0x18   : > { %317 = vmatpush.bf16.msra.mxu2 %v245_v25  ;;  %v225_v40 = vld [vmem:[%s621_s21 + $0x70] sm:$0xff]  ;;  %v226_v44 = vld [vmem:[%s621_s21 + $0x78] sm:$0xff]  ;;  %v223_v46 = vld [vmem:[%s621_s21 + $0x60] sm:$0xff] }
  0x19   : > { %331 = vmatpush.bf16.msra.mxu3 %v246_v29  ;;  %v249_v43 = vpack.c.bf16 %v225_v40, %v217_v39  ;;  %v250_v47 = vpack.c.bf16 %v226_v44, %v218_v41  ;;  %v216_v48 = vld [vmem:[%s621_s21 + $0x28] sm:$0xff]  ;;  %v247_v50 = vpack.c.bf16 %v223_v46, %v215_v45 }
  0x1a   : > { %510 = vmatmul.msk.bf16.vlgmr.msra.gmra.mxu0 %vm278_vm0, %v522_v24  ;;  %v224_v49 = vld [vmem:[%s621_s21 + $0x68] sm:$0xff]  ;;  %511 = vmatmul.msk.bf16.vlgmr.msra.gmra.mxu1 %vm278_vm0, %v522_v24 }
  0x1b   : > { %512 = vmatmul.msk.bf16.vlgmr.msra.gmra.mxu2 %vm278_vm0, %v522_v24  ;;  %344 = vmatpush.bf16.msrb.mxu0 %v255_v38  ;;  %v248_v51 = vpack.c.bf16 %v224_v49, %v216_v48 }
  0x1c   : > { %372 = vmatpush.bf16.msrb.mxu2 %v257_v30  ;;  %513 = vmatmul.msk.bf16.vlgmr.msra.gmra.mxu3 %vm278_vm0, %v522_v24 }
  0x1d   : > { %386 = vmatpush.bf16.msrb.mxu3 %v258_v34  ;;  %358 = vmatpush.bf16.msrb.mxu1 %v256_v42 }
  0x1f   : > { %345 = vmatpush.bf16.msrb.mxu0 %v247_v50 }
  0x20   : > { %373 = vmatpush.bf16.msrb.mxu2 %v249_v43 }
  0x21   : > { %387 = vmatpush.bf16.msrb.mxu3 %v250_v47  ;;  %359 = vmatpush.bf16.msrb.mxu1 %v248_v51 }
  0x2a   : > { %514 = vmatmul.msk.bf16.vlgmr.msrb.gmra.mxu0 %vm278_vm0, %v522_v24  ;;  %515 = vmatmul.msk.bf16.vlgmr.msrb.gmra.mxu1 %vm278_vm0, %v522_v24 }
  0x2b   : > { %516 = vmatmul.msk.bf16.vlgmr.msrb.gmra.mxu2 %vm278_vm0, %v522_v24 }
  0x2c   : > { %517 = vmatmul.msk.bf16.vlgmr.msrb.gmra.mxu3 %vm278_vm0, %v522_v24 }
  0x80   : > { %v266_v52 = vpop.permute.xlu0 %265 }
  0x88   : > { %v271_v58 = vpop.permute.xlu0 %270 }
  0x97   : > { %v291_v53 = vpop.f32.mrf.mxu0  ;;  %v305_v55 = vpop.f32.mrf.mxu1 }
  0x98   : > { %v292_v54 = vadd.f32 %v291_v53, %v266_v52  ;;  %v306_v56 = vadd.f32 %v305_v55, %v266_v52 }
  0x9a   : > { %v394_v57 = vpack.c.bf16 %v306_v56, %v292_v54 }
  0x9c   : > { %402 = vst [vmem:[%s673_s29] sm:$0xff] %v394_v57 }
  0x9e   : > { %v319_v59 = vpop.f32.mrf.mxu2 }
  0x9f   : > { %v320_v60 = vadd.f32 %v319_v59, %v266_v52  ;;  %v333_v61 = vpop.f32.mrf.mxu3  ;;  %v293_v62 = vpop.f32.mrf.mxu0 }
  0xa0   : > { %v334_v63 = vadd.f32 %v333_v61, %v266_v52  ;;  %v294_v0 = vadd.f32 %v293_v62, %v271_v58  ;;  %v307_v1 = vpop.f32.mrf.mxu1 }
  0xa1   : > { %v308_v2 = vadd.f32 %v307_v1, %v271_v58 }
  0xa2   : > { %v395_v3 = vpack.c.bf16 %v334_v63, %v320_v60 }
  0xa3   : > { %v398_v4 = vpack.c.bf16 %v308_v2, %v294_v0 }
  0xa4   : > { %403 = vst [vmem:[%s673_s29 + $0x8] sm:$0xff] %v395_v3 }
  0xa5   : > { %406 = vst [vmem:[%s673_s29 + $0x20] sm:$0xff] %v398_v4 }
  0xa6   : > { %v321_v5 = vpop.f32.mrf.mxu2 }
  0xa7   : > { %v322_v6 = vadd.f32 %v321_v5, %v271_v58  ;;  %v335_v7 = vpop.f32.mrf.mxu3  ;;  %v347_v8 = vpop.f32.mrf.mxu0 }
  0xa8   : > { %v336_v9 = vadd.f32 %v335_v7, %v271_v58  ;;  %v348_v10 = vadd.f32 %v347_v8, %v266_v52  ;;  %v361_v11 = vpop.f32.mrf.mxu1 }
  0xa9   : > { %v362_v12 = vadd.f32 %v361_v11, %v266_v52 }
  0xaa   : > { %v399_v13 = vpack.c.bf16 %v336_v9, %v322_v6 }
  0xab   : > { %v396_v14 = vpack.c.bf16 %v362_v12, %v348_v10 }
  0xac   : > { %407 = vst [vmem:[%s673_s29 + $0x28] sm:$0xff] %v399_v13 }
  0xad   : > { %404 = vst [vmem:[%s673_s29 + $0x10] sm:$0xff] %v396_v14 }
  0xae   : > { %v375_v15 = vpop.f32.mrf.mxu2 }
  0xaf   : > { %v376_v16 = vadd.f32 %v375_v15, %v266_v52  ;;  %v389_v17 = vpop.f32.mrf.mxu3  ;;  %v349_v18 = vpop.f32.mrf.mxu0 }
  0xb0   : > { %v390_v19 = vadd.f32 %v389_v17, %v266_v52  ;;  %v350_v20 = vadd.f32 %v349_v18, %v271_v58  ;;  %v363_v21 = vpop.f32.mrf.mxu1 }
  0xb1   : > { %v364_v22 = vadd.f32 %v363_v21, %v271_v58 }
  0xb2   : > { %v397_v23 = vpack.c.bf16 %v390_v19, %v376_v16 }
  0xb3   : > { %v400_v24 = vpack.c.bf16 %v364_v22, %v350_v20 }
  0xb4   : > { %405 = vst [vmem:[%s673_s29 + $0x18] sm:$0xff] %v397_v23 }
  0xb5   : > { %408 = vst [vmem:[%s673_s29 + $0x30] sm:$0xff] %v400_v24 }
  0xb6   : > { %v377_v25 = vpop.f32.mrf.mxu2 }
  0xb7   : > { %v378_v26 = vadd.f32 %v377_v25, %v271_v58  ;;  %v391_v27 = vpop.f32.mrf.mxu3 }
  0xb8   : > { %v392_v28 = vadd.f32 %v391_v27, %v271_v58 }
  0xba   : > { %v401_v29 = vpack.c.bf16 %v392_v28, %v378_v26 }
  0xbc   : > { %409 = vst [vmem:[%s673_s29 + $0x38] sm:$0xff] %v401_v29 }
  0xbd PF: > { %s13_s14 = sadd.s32 1, %s571_s14   ;;  %s696_s12 = smov %s567_s13 }
  0xbe   : > { %p10_p5 = scmp.ge.s32.totalorder %s13_s14, 4   ;;  %s697_s13 = smov %s699_s15 }
  0xc0   :  { %12 = sbr.rel (!%p10_p5) target bundleno = 2 (0x2), region = 62 }

// kernel: esa_fwd.5
= control target key start
LH: loop header
LB: loop body
LE: loop exit
PB: predicated region body
PF: predicated region fallthrough
CT: control target
= control target key end

     0   :  { %vm254_vm0 = vcmask 130048   ;;  %s867_s2 = inlined_call_operand.vmem [shape: bf16[144,512], index: 2, kind: input, shape index: {}]   ;;  %s868_s0 = inlined_call_operand.vmem [shape: bf16[16,144], index: 0, kind: input, shape index: {}]   ;;  %s869_s1 = inlined_call_operand.vmem [shape: f32[16,1], index: 1, kind: input, shape index: {}]   ;;  %s870_s3 = inlined_call_operand.vmem [shape: f32[16,512], index: 3, kind: output, shape index: {}]  }
   0x1   :  { %v504_v0 = vld [vmem:[%s867_s2 + $0xe0] sm:$0xf]  ;;  %v570_v1 = vld [vmem:[%s867_s2 + $0xec] sm:$0xf0]  ;;  %v568_v5 = vld [vmem:[%s867_s2 + $0xe4] sm:$0xf] }
   0x2   :  { %v520_v2 = vld [vmem:[%s867_s2 + $0x100] sm:$0xf]  ;;  %v505_v3 = vor.u32 %v570_v1, %v504_v0  ;;  %v574_v4 = vld [vmem:[%s867_s2 + $0x10c] sm:$0xf0]  ;;  %v506_v6 = vld [vmem:[%s867_s2 + $0xf0] sm:$0xf0] }
   0x3   :  { %v521_v7 = vor.u32 %v574_v4, %v520_v2  ;;  %v509_v8 = vor.u32 %v568_v5, %v506_v6  ;;  %v512_v9 = vld [vmem:[%s867_s2 + $0xe8] sm:$0xf]  ;;  %v571_v10 = vld [vmem:[%s867_s2 + $0xf4] sm:$0xf0]  ;;  %v488_v11 = vld [vmem:[%s867_s2 + $0xc0] sm:$0xf] }
   0x4   :  { %258 = vmatpush.bf16.msra.mxu0 %v505_v3  ;;  %v513_v12 = vor.u32 %v571_v10, %v512_v9  ;;  %v566_v13 = vld [vmem:[%s867_s2 + $0xcc] sm:$0xf0]  ;;  %v564_v14 = vld [vmem:[%s867_s2 + $0xc4] sm:$0xf]  ;;  %v490_v15 = vld [vmem:[%s867_s2 + $0xd0] sm:$0xf0] }
   0x5   :  { %279 = vmatpush.bf16.msra.mxu1 %v521_v7  ;;  %286 = vmatpush.bf16.msra.mxu2 %v509_v8  ;;  %v489_v16 = vor.u32 %v566_v13, %v488_v11  ;;  %v493_v17 = vor.u32 %v564_v14, %v490_v15  ;;  %v496_v18 = vld [vmem:[%s867_s2 + $0xc8] sm:$0xf]  ;;  %v567_v19 = vld [vmem:[%s867_s2 + $0xd4] sm:$0xf0]  ;;  %v569_v23 = vld [vmem:[%s867_s2 + $0xec] sm:$0xf] }
   0x6   :  { %v528_v20 = vld [vmem:[%s867_s2 + $0x108] sm:$0xf]  ;;  %v497_v21 = vor.u32 %v567_v19, %v496_v18  ;;  %v575_v22 = vld [vmem:[%s867_s2 + $0x114] sm:$0xf0]  ;;  %v514_v24 = vld [vmem:[%s867_s2 + $0xf8] sm:$0xf0] }
   0x7   :  { %v529_v25 = vor.u32 %v575_v22, %v528_v20  ;;  %v517_v26 = vor.u32 %v569_v23, %v514_v24  ;;  %v472_v27 = vld [vmem:[%s867_s2 + $0xa0] sm:$0xf]  ;;  %v562_v28 = vld [vmem:[%s867_s2 + $0xac] sm:$0xf0]  ;;  %v560_v29 = vld [vmem:[%s867_s2 + $0xa4] sm:$0xf] }
   0x8   :  { %259 = vmatpush.bf16.msra.mxu0 %v489_v16  ;;  %v473_v30 = vor.u32 %v562_v28, %v472_v27  ;;  %v474_v31 = vld [vmem:[%s867_s2 + $0xb0] sm:$0xf0]  ;;  %v480_v32 = vld [vmem:[%s867_s2 + $0xa8] sm:$0xf]  ;;  %v563_v33 = vld [vmem:[%s867_s2 + $0xb4] sm:$0xf0] }
   0x9   :  { %314 = vmatpush.bf16.msrb.mxu1 %v513_v12  ;;  %287 = vmatpush.bf16.msra.mxu2 %v493_v17  ;;  %v477_v34 = vor.u32 %v560_v29, %v474_v31  ;;  %v565_v35 = vld [vmem:[%s867_s2 + $0xcc] sm:$0xf]  ;;  %v498_v36 = vld [vmem:[%s867_s2 + $0xd8] sm:$0xf0]  ;;  %v456_v37 = vld [vmem:[%s867_s2 + $0x80] sm:$0xf]  ;;  %v481_v38 = vor.u32 %v563_v33, %v480_v32 }
   0xa   :  { %335 = vmatpush.bf16.msra.mxu3 %v529_v25  ;;  %v501_v39 = vor.u32 %v565_v35, %v498_v36  ;;  %v558_v40 = vld [vmem:[%s867_s2 + $0x8c] sm:$0xf0]  ;;  %v556_v41 = vld [vmem:[%s867_s2 + $0x84] sm:$0xf]  ;;  %v458_v42 = vld [vmem:[%s867_s2 + $0x90] sm:$0xf0] }
   0xb   :  { %v464_v43 = vld [vmem:[%s867_s2 + $0x88] sm:$0xf]  ;;  %v559_v44 = vld [vmem:[%s867_s2 + $0x94] sm:$0xf0]  ;;  %v561_v45 = vld [vmem:[%s867_s2 + $0xac] sm:$0xf]  ;;  %v457_v46 = vor.u32 %v558_v40, %v456_v37  ;;  %v461_v49 = vor.u32 %v556_v41, %v458_v42 }
   0xc   :  { %260 = vmatpush.bf16.msra.mxu0 %v473_v30  ;;  %v482_v47 = vld [vmem:[%s867_s2 + $0xb8] sm:$0xf0]  ;;  %v440_v48 = vld [vmem:[%s867_s2 + $0x60] sm:$0xf]  ;;  %v554_v50 = vld [vmem:[%s867_s2 + $0x6c] sm:$0xf0]  ;;  %v465_v53 = vor.u32 %v559_v44, %v464_v43 }
   0xd   :  { %315 = vmatpush.bf16.msrb.mxu1 %v497_v21  ;;  %288 = vmatpush.bf16.msra.mxu2 %v477_v34  ;;  %v538_v51 = vld [vmem:[%s868_s0 + $0x4] sm:$0xf]  ;;  %v386_v52 = vld [vmem:[%s868_s0 + $0x8] sm:$0xf0]  ;;  %v485_v54 = vor.u32 %v561_v45, %v482_v47  ;;  %v442_v57 = vld [vmem:[%s867_s2 + $0x70] sm:$0xf0]  ;;  %v441_v62 = vor.u32 %v554_v50, %v440_v48 }
   0xe   :  { %342 = vmatpush.bf16.msrb.mxu3 %v517_v26  ;;  %v713_v55 = vor.u32 %v538_v51, %v386_v52  ;;  %v552_v56 = vld [vmem:[%s867_s2 + $0x64] sm:$0xf]  ;;  %v448_v58 = vld [vmem:[%s867_s2 + $0x68] sm:$0xf]  ;;  %v555_v59 = vld [vmem:[%s867_s2 + $0x74] sm:$0xf0] }
   0xf   :  { %v557_v60 = vld [vmem:[%s867_s2 + $0x8c] sm:$0xf]  ;;  %v466_v61 = vld [vmem:[%s867_s2 + $0x98] sm:$0xf0]  ;;  %v445_v63 = vor.u32 %v552_v56, %v442_v57  ;;  %v424_v0 = vld [vmem:[%s867_s2 + $0x40] sm:$0xf]  ;;  %v449_v2 = vor.u32 %v555_v59, %v448_v58 }
  0x10   :  { %261 = vmatpush.bf16.msra.mxu0 %v457_v46  ;;  %534 = vmatmul.msk.bf16.vlgmr.msra.gmra.mxu1 %vm254_vm0, %v713_v55  ;;  %v550_v1 = vld [vmem:[%s867_s2 + $0x4c] sm:$0xf0]  ;;  %v469_v3 = vor.u32 %v557_v60, %v466_v61  ;;  %v548_v4 = vld [vmem:[%s867_s2 + $0x44] sm:$0xf]  ;;  %v426_v5 = vld [vmem:[%s867_s2 + $0x50] sm:$0xf0] }
  0x11   :  { %316 = vmatpush.bf16.msrb.mxu1 %v481_v38  ;;  %289 = vmatpush.bf16.msra.mxu2 %v461_v49  ;;  %v432_v6 = vld [vmem:[%s867_s2 + $0x48] sm:$0xf]  ;;  %v551_v7 = vld [vmem:[%s867_s2 + $0x54] sm:$0xf0]  ;;  %v553_v8 = vld [vmem:[%s867_s2 + $0x6c] sm:$0xf]  ;;  %v425_v10 = vor.u32 %v550_v1, %v424_v0  ;;  %v429_v11 = vor.u32 %v548_v4, %v426_v5 }
  0x12   :  { %343 = vmatpush.bf16.msrb.mxu3 %v501_v39  ;;  %v450_v9 = vld [vmem:[%s867_s2 + $0x78] sm:$0xf0]  ;;  %v408_v12 = vld [vmem:[%s867_s2 + $0x20] sm:$0xf]  ;;  %v546_v13 = vld [vmem:[%s867_s2 + $0x2c] sm:$0xf0]  ;;  %v433_v14 = vor.u32 %v551_v7, %v432_v6 }
  0x13   :  { %536 = vmatmul.msk.bf16.vlgmr.msra.gmra.mxu3 %vm254_vm0, %v713_v55  ;;  %v453_v15 = vor.u32 %v553_v8, %v450_v9  ;;  %v544_v16 = vld [vmem:[%s867_s2 + $0x24] sm:$0xf]  ;;  %v410_v17 = vld [vmem:[%s867_s2 + $0x30] sm:$0xf0]  ;;  %v416_v18 = vld [vmem:[%s867_s2 + $0x28] sm:$0xf]  ;;  %v409_v22 = vor.u32 %v546_v13, %v408_v12 }
  0x14   :  { %262 = vmatpush.bf16.msra.mxu0 %v441_v62  ;;  %v547_v19 = vld [vmem:[%s867_s2 + $0x34] sm:$0xf0]  ;;  %v549_v20 = vld [vmem:[%s867_s2 + $0x4c] sm:$0xf]  ;;  %v434_v21 = vld [vmem:[%s867_s2 + $0x58] sm:$0xf0]  ;;  %v413_v26 = vor.u32 %v544_v16, %v410_v17 }
  0x15   :  { %317 = vmatpush.bf16.msrb.mxu1 %v465_v53  ;;  %290 = vmatpush.bf16.msra.mxu2 %v445_v63  ;;  %v392_v23 = vld [vmem:[%s867_s2] sm:$0xf]  ;;  %v542_v24 = vld [vmem:[%s867_s2 + $0xc] sm:$0xf0]  ;;  %v540_v25 = vld [vmem:[%s867_s2 + $0x4] sm:$0xf]  ;;  %v417_v30 = vor.u32 %v547_v19, %v416_v18  ;;  %v437_v31 = vor.u32 %v549_v20, %v434_v21 }
  0x16   :  { %344 = vmatpush.bf16.msrb.mxu3 %v485_v54  ;;  %v394_v27 = vld [vmem:[%s867_s2 + $0x10] sm:$0xf0]  ;;  %v400_v28 = vld [vmem:[%s867_s2 + $0x8] sm:$0xf]  ;;  %v543_v29 = vld [vmem:[%s867_s2 + $0x14] sm:$0xf0]  ;;  %v393_v39 = vor.u32 %v542_v24, %v392_v23 }
  0x17   :  { %v573_v32 = vld [vmem:[%s867_s2 + $0x10c] sm:$0xf]  ;;  %v530_v33 = vld [vmem:[%s867_s2 + $0x118] sm:$0xf0]  ;;  %v53_v34 = vld [vmem:[%s869_s1] sm:$0xff]  ;;  %v578_v38 = vmov 0   ;;  %v397_v43 = vor.u32 %v540_v25, %v394_v27  ;;  %v401_v45 = vor.u32 %v543_v29, %v400_v28 }
  0x18   :  { %263 = vmatpush.bf16.msra.mxu0 %v425_v10  ;;  %v545_v35 = vld [vmem:[%s867_s2 + $0x2c] sm:$0xf]  ;;  %v418_v36 = vld [vmem:[%s867_s2 + $0x38] sm:$0xf0]  ;;  %v384_v37 = vld [vmem:[%s868_s0] sm:$0xf]  ;;  %577 = vset.pattern.permute.xlu0 %v578_v38  ;;  %v533_v44 = vor.u32 %v573_v32, %v530_v33 }
  0x19   :  { %318 = vmatpush.bf16.msrb.mxu1 %v449_v2  ;;  %291 = vmatpush.bf16.msra.mxu2 %v429_v11  ;;  %v539_v40 = vld [vmem:[%s868_s0 + $0x4] sm:$0xf0]  ;;  %v572_v41 = vld [vmem:[%s867_s2 + $0x104] sm:$0xf]  ;;  %v522_v42 = vld [vmem:[%s867_s2 + $0x110] sm:$0xf0]  ;;  %v421_v46 = vor.u32 %v545_v35, %v418_v36 }
  0x1a   :  { %345 = vmatpush.bf16.msrb.mxu3 %v469_v3  ;;  %57 = vperm.xlu0 %577, %v53_v34   ;;  %v385_v47 = vor.u32 %v539_v40, %v384_v37  ;;  %v525_v48 = vor.u32 %v572_v41, %v522_v42  ;;  %v541_v49 = vld [vmem:[%s867_s2 + $0xc] sm:$0xf]  ;;  %v402_v50 = vld [vmem:[%s867_s2 + $0x18] sm:$0xf0] }
  0x1b   :  { %v54_v51 = vld [vmem:[%s869_s1 + $0x8] sm:$0xff]  ;;  %v405_v52 = vor.u32 %v541_v49, %v402_v50 }
  0x1c   :  { %264 = vmatpush.bf16.msra.mxu0 %v409_v22 }
  0x1d   :  { %319 = vmatpush.bf16.msrb.mxu1 %v433_v14  ;;  %292 = vmatpush.bf16.msra.mxu2 %v413_v26 }
  0x1e   :  { %346 = vmatpush.bf16.msrb.mxu3 %v453_v15 }
  0x20   :  { %265 = vmatpush.bf16.msra.mxu0 %v393_v39 }
  0x21   :  { %320 = vmatpush.bf16.msrb.mxu1 %v417_v30  ;;  %293 = vmatpush.bf16.msra.mxu2 %v397_v43 }
  0x22   :  { %347 = vmatpush.bf16.msrb.mxu3 %v437_v31  ;;  %62 = vperm.xlu0 %577, %v54_v51  }
  0x23   :  { %266 = vmatmul.bf16.vlgmr.msra.gmra.mxu0 %v385_v47 }
  0x24   :  { %363 = vmatpush.bf16.msrb.mxu0 %v533_v44  ;;  %294 = vmatmul.bf16.vlgmr.msra.gmra.mxu2 %v385_v47 }
  0x25   :  { %321 = vmatpush.bf16.msrb.mxu1 %v401_v45  ;;  %307 = vmatpush.bf16.msrb.mxu2 %v525_v48 }
  0x26   :  { %348 = vmatpush.bf16.msrb.mxu3 %v421_v46 }
  0x28   :  { %322 = vmatmul.bf16.vlgmr.msrb.gmra.mxu1 %v385_v47 }
  0x2a   :  { %349 = vmatpush.bf16.msrb.mxu3 %v405_v52 }
  0x2d   :  { %350 = vmatmul.bf16.vlgmr.msrb.gmra.mxu3 %v385_v47 }
  0x33   :  { %537 = vmatmul.msk.bf16.vlgmr.msrb.gmra.mxu0 %vm254_vm0, %v713_v55 }
  0x34   :  { %535 = vmatmul.msk.bf16.vlgmr.msrb.gmra.mxu2 %vm254_vm0, %v713_v55 }
  0x8c   :  { %v58_v57 = vpop.permute.xlu0 %57 }
  0x8d   :  { %v281_v53 = vpop.f32.mrf.mxu1 }
  0x94   :  { %v63_v1 = vpop.permute.xlu0 %62 }
  0x95   :  { %v283_v54 = vpop.f32.mrf.mxu1 }
  0x96   :  { %v337_v56 = vpop.f32.mrf.mxu3 }
  0x9e   :  { %v339_v61 = vpop.f32.mrf.mxu3 }
  0xa0   :  { %v267_v58 = vpop.f32.mrf.mxu0 }
  0xa1   :  { %v268_v59 = vadd.f32 %v267_v58, %v58_v57 }
  0xa3   :  { %v282_v62 = vadd.f32 %v281_v53, %v268_v59 }
  0xa5   :  { %v323_v60 = vpop.f32.mrf.mxu1  ;;  %370 = vst [vmem:[%s870_s3] sm:$0xff] %v282_v62 }
  0xa6   :  { %v324_v63 = vadd.f32 %v323_v60, %v58_v57 }
  0xa7   :  { %v295_v55 = vpop.f32.mrf.mxu2 }
  0xa8   :  { %v338_v0 = vadd.f32 %v337_v56, %v324_v63  ;;  %v269_v2 = vpop.f32.mrf.mxu0  ;;  %v296_v14 = vadd.f32 %v295_v55, %v58_v57 }
  0xa9   :  { %v270_v3 = vadd.f32 %v269_v2, %v63_v1 }
  0xaa   :  { %372 = vst [vmem:[%s870_s3 + $0x10] sm:$0xff] %v338_v0 }
  0xab   :  { %v284_v5 = vadd.f32 %v283_v54, %v270_v3 }
  0xad   :  { %v325_v4 = vpop.f32.mrf.mxu1  ;;  %374 = vst [vmem:[%s870_s3 + $0x20] sm:$0xff] %v284_v5 }
  0xae   :  { %v326_v6 = vadd.f32 %v325_v4, %v63_v1 }
  0xaf   :  { %v297_v10 = vpop.f32.mrf.mxu2 }
  0xb0   :  { %v351_v7 = vpop.f32.mrf.mxu3  ;;  %v340_v8 = vadd.f32 %v339_v61, %v326_v6  ;;  %v365_v11 = vpop.f32.mrf.mxu0  ;;  %v298_v20 = vadd.f32 %v297_v10, %v63_v1 }
  0xb1   :  { %v352_v9 = vadd.f32 %v351_v7, %v58_v57 }
  0xb2   :  { %376 = vst [vmem:[%s870_s3 + $0x30] sm:$0xff] %v340_v8 }
  0xb3   :  { %v366_v12 = vadd.f32 %v365_v11, %v352_v9 }
  0xb5   :  { %373 = vst [vmem:[%s870_s3 + $0x18] sm:$0xff] %v366_v12 }
  0xb7   :  { %v309_v16 = vpop.f32.mrf.mxu2 }
  0xb8   :  { %v353_v13 = vpop.f32.mrf.mxu3  ;;  %v310_v17 = vadd.f32 %v309_v16, %v296_v14  ;;  %v367_v18 = vpop.f32.mrf.mxu0 }
  0xb9   :  { %v354_v15 = vadd.f32 %v353_v13, %v63_v1 }
  0xba   :  { %371 = vst [vmem:[%s870_s3 + $0x8] sm:$0xff] %v310_v17 }
  0xbb   :  { %v368_v19 = vadd.f32 %v367_v18, %v354_v15 }
  0xbd   :  { %377 = vst [vmem:[%s870_s3 + $0x38] sm:$0xff] %v368_v19 }
  0xbf   :  { %v311_v21 = vpop.f32.mrf.mxu2 }
  0xc0   :  { %v312_v22 = vadd.f32 %v311_v21, %v298_v20 }
  0xc2   :  { %375 = vst [vmem:[%s870_s3 + $0x28] sm:$0xff] %v312_v22 }

// kernel: esa_fwd.7
= control target key start
LH: loop header
LB: loop body
LE: loop exit
PB: predicated region body
PF: predicated region fallthrough
CT: control target
= control target key end

     0   :  { %s1770_s27 = smov 0   ;;  %s1772_s28 = smov 0   ;;  %s2095_s0 = inlined_call_operand.vmem [shape: bf16[16,16], index: 0, kind: input, shape index: {}]   ;;  %s2096_s1 = inlined_call_operand.vmem [shape: f32[16,1], index: 1, kind: input, shape index: {}]   ;;  %s2097_s2 = inlined_call_operand.vmem [shape: bf16[32,16], index: 2, kind: input, shape index: {}]   ;;  %s2098_s3 = inlined_call_operand.vmem [shape: f32[32,1], index: 3, kind: input, shape index: {}]   ;;  %s2099_s4 = inlined_call_operand.vmem [shape: bf16[2,16,9], index: 4, kind: input, shape index: {}]   ;;  %s2100_s5 = inlined_call_operand.vmem [shape: bf16[9,1024], index: 5, kind: input, shape index: {}]   ;;  %s2101_s6 = inlined_call_operand.vmem [shape: bf16[2,16,1024], index: 6, kind: input, shape index: {}]   ;;  %s2102_s7 = inlined_call_operand.vmem [shape: f32[2,32,1024], index: 7, kind: input, shape index: {}]   ;;  %s2103_s8 = inlined_call_operand.vmem [shape: f32[2,32,1024], index: 8, kind: output, shape index: {}]  }
   0x1   :  { %s1774_s29 = smov 0  }
   0x2 LB: > { %s30_s30 = sadd.s32 1, %s1717_s28  ;;  %p1395_p0 = scmp.ge.s32.totalorder %s1721_s29, 1  ;;  %s1721_s29 = sphi %s1774_s29, %s18_s29   ;;  %s1717_s28 = sphi %s1772_s28, %s2105_s28   ;;  %s1713_s27 = sphi %s1770_s27, %s2104_s27  }
   0x3   : > { %p32_p1 = scmp.ge.s32.totalorder %s30_s30, 2  ;;  %p321_p2 = scmp.lt.s32.totalorder %s1721_s29, 3 }
   0x5   : > { %s2107_s30 = smov (%p32_p1, %s30_s30), 0  ;;  %p322_p3 = pnand %p1395_p0, %p321_p2 }
   0x6   : > { %p382_p4 = scmp.lt.s32.totalorder (!%p322_p3), %s1713_s27, 1 }
   0x7   : > { %325 = sbr.rel (%p322_p3) target bundleno = 422 (0x1a6), region = 52 }
   0xc   : > { %v444_v0 = vld [vmem:[%s2096_s1] sm:$0xff]  ;;  %v1723_v1 = vmov 0   ;;  %vm658_vm0 = vcmask 1043456   ;;  %s2109_s27 = smov (!%p382_p4, %s1713_s27), 1  ;;  %vm659_vm1 = vcmask 1044480   ;;  %v1724_v4 = vmov 65535  }
   0xd   : > { %1568 = vset.pattern.permute.xlu0 %v1723_v1  ;;  %1569 = vset.pattern.permute.xlu1 %v1723_v1  ;;  %v1454_v2 = vld [vmem:[%s2100_s5] sm:$0xf]  ;;  %v660_v5 = vsel %vm658_vm0, 4294967295, %v1724_v4  ;;  %v1523_v6 = vld [vmem:[%s2100_s5 + $0x4] sm:$0xf]  ;;  %s1519_s19 = sshll.u32 %s2109_s27, 6 }
   0xe   : > { %448 = vperm.xlu0 %1568, %v444_v0   ;;  %1570 = vset.pattern.permute.xlu2 %v1723_v1  ;;  %v1527_v3 = vld [vmem:[%s2100_s5 + $0x1c] sm:$0x10]  ;;  %v1456_v7 = vld [vmem:[%s2100_s5 + $0x20] sm:$0x10]  ;;  %v1462_v8 = vld [vmem:[%s2100_s5 + $0x8] sm:$0xf]  ;;  %s1815_s26 = scalar_lea.vmem %s2101_s6, %s1519_s19 }
   0xf   : > { %v1528_v9 = vld [vmem:[%s2100_s5 + $0x24] sm:$0x10]  ;;  %vm501_vm2 = vcmask 130048   ;;  %v1817_v10 = vsel %vm659_vm1, %v660_v5, 0  ;;  %v1524_v11 = vld [vmem:[%s2100_s5 + $0xc] sm:$0xf]  ;;  %v1455_v27 = vor.u32 %v1527_v3, %v1454_v2  ;;  %v1459_v28 = vor.u32 %v1523_v6, %v1456_v7 }
  0x10   : > { %v1464_v12 = vld [vmem:[%s2100_s5 + $0x28] sm:$0x10]  ;;  %v1410_v13 = vld [vmem:[%s1815_s26] sm:$0xf]  ;;  %v1532_v15 = vld [vmem:[%s1815_s26 + $0x4] sm:$0xf]  ;;  %v1463_v33 = vor.u32 %v1528_v9, %v1462_v8 }
  0x11   : > { %v1536_v14 = vld [vmem:[%s1815_s26 + $0x1c] sm:$0xf0]  ;;  %v445_v17 = vld [vmem:[%s2096_s1 + $0x8] sm:$0xff]  ;;  %v1412_v19 = vld [vmem:[%s1815_s26 + $0x20] sm:$0xf0]  ;;  %v1467_v34 = vor.u32 %v1524_v11, %v1464_v12  ;;  %v663_v43 = vand.u32 %v1455_v27, %v1817_v10  ;;  %v666_v44 = vand.u32 %v1459_v28, %v1817_v10  ;;  %s1518_s15 = sshll.u32 %s2109_s27, 3 }
  0x12   : > { %v1831_v16 = vld [vmem:[%s2095_s0] sm:$0xff]  ;;  %v1411_v18 = vor.u32 %v1536_v14, %v1410_v13  ;;  %v1418_v20 = vld [vmem:[%s1815_s26 + $0x8] sm:$0xf]  ;;  %v1415_v22 = vor.u32 %v1532_v15, %v1412_v19  ;;  %v1533_v24 = vld [vmem:[%s1815_s26 + $0xc] sm:$0xf]  ;;  %v669_v45 = vand.u32 %v1463_v33, %v1817_v10  ;;  %s386_s18 = scalar_lea.vmem %s2099_s4, %s1518_s15  ;;  %vm654_vm3 = vcmask 72704  }
  0x13   : > { %v1537_v21 = vld [vmem:[%s1815_s26 + $0x24] sm:$0xf0]  ;;  %v1420_v25 = vld [vmem:[%s1815_s26 + $0x28] sm:$0xf0]  ;;  %v1426_v26 = vld [vmem:[%s1815_s26 + $0x10] sm:$0xf]  ;;  %v672_v46 = vand.u32 %v1467_v34, %v1817_v10 }
  0x14   : > { %v1419_v23 = vor.u32 %v1537_v21, %v1418_v20  ;;  %512 = vmatpush.bf16.msra.mxu0 %v1411_v18  ;;  %v1423_v29 = vor.u32 %v1533_v24, %v1420_v25  ;;  %v1538_v30 = vld [vmem:[%s1815_s26 + $0x2c] sm:$0xf0]  ;;  %v1534_v31 = vld [vmem:[%s1815_s26 + $0x14] sm:$0xf]  ;;  %526 = vmatpush.bf16.msra.mxu1 %v1415_v22  ;;  %v1434_v37 = vld [vmem:[%s1815_s26 + $0x18] sm:$0xf] }
  0x15   : > { %v1428_v32 = vld [vmem:[%s1815_s26 + $0x30] sm:$0xf0]  ;;  %v1427_v35 = vor.u32 %v1538_v30, %v1426_v26  ;;  %v1539_v38 = vld [vmem:[%s1815_s26 + $0x34] sm:$0xf0]  ;;  %v1535_v39 = vld [vmem:[%s1815_s26 + $0x1c] sm:$0xf] }
  0x16   : > { %540 = vmatpush.bf16.msra.mxu2 %v1419_v23  ;;  %v1431_v36 = vor.u32 %v1534_v31, %v1428_v32  ;;  %554 = vmatpush.bf16.msra.mxu3 %v1423_v29  ;;  %v1435_v40 = vor.u32 %v1539_v38, %v1434_v37  ;;  %v1436_v41 = vld [vmem:[%s1815_s26 + $0x38] sm:$0xf0]  ;;  %v1470_v47 = vld [vmem:[%s2100_s5 + $0x10] sm:$0xf]  ;;  %v1525_v49 = vld [vmem:[%s2100_s5 + $0x14] sm:$0xf] }
  0x17   : > { %453 = vperm.xlu0 %1568, %v445_v17   ;;  %1440 = vmatmul.msk.bf16.vlgmr.msra.gmra.mxu0 %vm501_vm2, %v1831_v16  ;;  %v1439_v42 = vor.u32 %v1535_v39, %v1436_v41  ;;  %v1529_v48 = vld [vmem:[%s2100_s5 + $0x2c] sm:$0x10]  ;;  %v1472_v50 = vld [vmem:[%s2100_s5 + $0x30] sm:$0x10]  ;;  %v1478_v51 = vld [vmem:[%s2100_s5 + $0x18] sm:$0xf] }
  0x18   : > { %582 = vmatpush.bf16.msrb.mxu1 %v1431_v36  ;;  %568 = vmatpush.bf16.msrb.mxu0 %v1427_v35  ;;  %v1530_v52 = vld [vmem:[%s2100_s5 + $0x34] sm:$0x10]  ;;  %v1526_v53 = vld [vmem:[%s2100_s5 + $0x1c] sm:$0xf]  ;;  %v1471_v55 = vor.u32 %v1529_v48, %v1470_v47  ;;  %v1475_v56 = vor.u32 %v1525_v49, %v1472_v50  ;;  %v1522_v63 = vld [vmem:[%s386_s18] sm:$0xff]  ;;  %s1520_s13 = sshll.u32 %s2109_s27, 8 }
  0x19   : > { %1441 = vmatmul.msk.bf16.vlgmr.msra.gmra.mxu1 %vm501_vm2, %v1831_v16  ;;  %1442 = vmatmul.msk.bf16.vlgmr.msra.gmra.mxu2 %vm501_vm2, %v1831_v16  ;;  %v1480_v54 = vld [vmem:[%s2100_s5 + $0x38] sm:$0x10]  ;;  %v1479_v57 = vor.u32 %v1530_v52, %v1478_v51  ;;  %v810_v18 = vld [vmem:[%s2098_s3] sm:$0xff]  ;;  %v811_v28 = vld [vmem:[%s2098_s3 + $0x8] sm:$0xff]  ;;  %s1985_s16 = scalar_lea.vmem %s2102_s7, %s1520_s13  ;;  %s1996_s19 = scalar_lea.vmem %s2103_s8, %s1520_s13 }
  0x1a   : > { %1443 = vmatmul.msk.bf16.vlgmr.msra.gmra.mxu3 %vm501_vm2, %v1831_v16  ;;  %596 = vmatpush.bf16.msrb.mxu2 %v1435_v40  ;;  %v1483_v58 = vor.u32 %v1526_v53, %v1480_v54  ;;  %v675_v59 = vand.u32 %v1471_v55, %v1817_v10  ;;  %v678_v60 = vand.u32 %v1475_v56, %v1817_v10  ;;  %v1922_v36 = vld [vmem:[%s2097_s2] sm:$0xff] }
  0x1b   : > { %610 = vmatpush.bf16.msrb.mxu3 %v1439_v42  ;;  %v681_v61 = vand.u32 %v1479_v57, %v1817_v10  ;;  %816 = vperm.xlu1 %1569, %v810_v18  }
  0x1c   : > { %693 = vmatpush.bf16.msra.mxu0 %v663_v43  ;;  %707 = vmatpush.bf16.msra.mxu1 %v666_v44  ;;  %v684_v62 = vand.u32 %v1483_v58, %v1817_v10 }
  0x1e   : > { %721 = vmatpush.bf16.msra.mxu2 %v669_v45 }
  0x1f   : > { %735 = vmatpush.bf16.msra.mxu3 %v672_v46 }
  0x23   : > { %821 = vperm.xlu1 %1569, %v811_v28  }
  0x27   : > { %1444 = vmatmul.msk.bf16.vlgmr.msrb.gmra.mxu0 %vm501_vm2, %v1831_v16 }
  0x28   : > { %749 = vmatpush.bf16.msrb.mxu0 %v675_v59 }
  0x29   : > { %1445 = vmatmul.msk.bf16.vlgmr.msrb.gmra.mxu1 %vm501_vm2, %v1831_v16  ;;  %1446 = vmatmul.msk.bf16.vlgmr.msrb.gmra.mxu2 %vm501_vm2, %v1831_v16 }
  0x2a   : > { %1447 = vmatmul.msk.bf16.vlgmr.msrb.gmra.mxu3 %vm501_vm2, %v1831_v16  ;;  %763 = vmatpush.bf16.msrb.mxu1 %v678_v60 }
  0x2b   : > { %777 = vmatpush.bf16.msrb.mxu2 %v681_v61  ;;  %791 = vmatpush.bf16.msrb.mxu3 %v684_v62 }
  0x37   : > { %1484 = vmatmul.msk.bf16.vlgmr.msra.gmra.mxu0 %vm654_vm3, %v1522_v63 }
  0x39   : > { %1485 = vmatmul.msk.bf16.vlgmr.msra.gmra.mxu1 %vm654_vm3, %v1522_v63  ;;  %1486 = vmatmul.msk.bf16.vlgmr.msra.gmra.mxu2 %vm654_vm3, %v1522_v63 }
  0x3a   : > { %1487 = vmatmul.msk.bf16.vlgmr.msra.gmra.mxu3 %vm654_vm3, %v1522_v63 }
  0x47   : > { %1488 = vmatmul.msk.bf16.vlgmr.msrb.gmra.mxu0 %vm654_vm3, %v1522_v63 }
  0x49   : > { %1489 = vmatmul.msk.bf16.vlgmr.msrb.gmra.mxu1 %vm654_vm3, %v1522_v63  ;;  %1490 = vmatmul.msk.bf16.vlgmr.msrb.gmra.mxu2 %vm654_vm3, %v1522_v63 }
  0x4a   : > { %1491 = vmatmul.msk.bf16.vlgmr.msrb.gmra.mxu3 %vm654_vm3, %v1522_v63 }
  0x80   : > { %v1905_v14 = vpop.permute.xlu0 %448 }
  0x89   : > { %v454_v20 = vpop.permute.xlu0 %453 }
  0x94   : > { %v514_v0 = vpop.f32.mrf.mxu0 }
  0x95   : > { %v515_v21 = vadd.f32 %v514_v0, %v1905_v14 }
  0x96   : > { %v528_v1 = vpop.f32.mrf.mxu1 }
  0x97   : > { %v529_v24 = vadd.f32 %v528_v1, %v1905_v14  ;;  %v1541_v1 = vld [vmem:[%s2097_s2 + $0x8] sm:$0xff] }
  0x9c   : > { %v542_v2 = vpop.f32.mrf.mxu2  ;;  %v516_v4 = vpop.f32.mrf.mxu0 }
  0x9d   : > { %v556_v3 = vpop.f32.mrf.mxu3  ;;  %v517_v23 = vadd.f32 %v516_v4, %v454_v20  ;;  %v543_v37 = vadd.f32 %v542_v2, %v1905_v14 }
  0x9e   : > { %v530_v5 = vpop.f32.mrf.mxu1  ;;  %v557_v39 = vadd.f32 %v556_v3, %v1905_v14 }
  0x9f   : > { %v531_v27 = vadd.f32 %v530_v5, %v454_v20 }
  0xa4   : > { %v544_v6 = vpop.f32.mrf.mxu2  ;;  %v570_v8 = vpop.f32.mrf.mxu0 }
  0xa5   : > { %v558_v7 = vpop.f32.mrf.mxu3  ;;  %v545_v38 = vadd.f32 %v544_v6, %v454_v20  ;;  %v571_v51 = vadd.f32 %v570_v8, %v1905_v14 }
  0xa6   : > { %v584_v9 = vpop.f32.mrf.mxu1  ;;  %v559_v40 = vadd.f32 %v558_v7, %v454_v20 }
  0xa7   : > { %v585_v54 = vadd.f32 %v584_v9, %v1905_v14 }
  0xac   : > { %v1901_v10 = vpop.f32.mrf.mxu2  ;;  %v572_v12 = vpop.f32.mrf.mxu0 }
  0xad   : > { %v1903_v11 = vpop.f32.mrf.mxu3  ;;  %v573_v52 = vadd.f32 %v572_v12, %v454_v20  ;;  %v599_v2 = vadd.f32 %v1901_v10, %v1905_v14 }
  0xae   : > { %v586_v13 = vpop.f32.mrf.mxu1  ;;  %v613_v4 = vadd.f32 %v1903_v11, %v1905_v14  ;;  %v812_v11 = vld [vmem:[%s2098_s3 + $0x10] sm:$0xff]  ;;  %v813_v14 = vld [vmem:[%s2098_s3 + $0x18] sm:$0xff] }
  0xaf   : > { %v587_v55 = vadd.f32 %v586_v13, %v454_v20  ;;  %826 = vperm.xlu2 %1570, %v812_v11  }
  0xb4   : > { %v1907_v15 = vpop.f32.mrf.mxu2  ;;  %v695_v17 = vpop.f32.mrf.mxu0 }
  0xb5   : > { %v1909_v16 = vpop.f32.mrf.mxu3  ;;  %v696_v29 = vadd.f32 %v695_v17, %v515_v21  ;;  %v601_v3 = vadd.f32 %v1907_v15, %v454_v20  ;;  %v1967_v15 = vpop.permute.xlu1 %816 }
  0xb6   : > { %v709_v19 = vpop.f32.mrf.mxu1  ;;  %v615_v5 = vadd.f32 %v1909_v16, %v454_v20 }
  0xb7   : > { %v710_v32 = vadd.f32 %v709_v19, %v529_v24  ;;  %831 = vperm.xlu2 %1570, %v813_v14  }
  0xbc   : > { %v723_v22 = vpop.f32.mrf.mxu2  ;;  %v697_v26 = vpop.f32.mrf.mxu0 }
  0xbd   : > { %v737_v25 = vpop.f32.mrf.mxu3  ;;  %v698_v30 = vadd.f32 %v697_v26, %v517_v23  ;;  %v724_v42 = vadd.f32 %v723_v22, %v543_v37 }
  0xbe   : > { %v711_v31 = vpop.f32.mrf.mxu1  ;;  %v738_v46 = vadd.f32 %v737_v25, %v557_v39  ;;  %v1971_v25 = vpop.permute.xlu1 %821 }
  0xbf   : > { %v712_v33 = vadd.f32 %v711_v31, %v531_v27  ;;  %v798_v34 = vpack.c.bf16 %v698_v30, %v696_v29 }
  0xc1   : > { %v799_v35 = vpack.c.bf16 %v712_v33, %v710_v32  ;;  %857 = vmatpush.bf16.msra.mxu0 %v798_v34 }
  0xc3   : > { %876 = vmatpush.bf16.msra.mxu1 %v799_v35 }
  0xc4   : > { %v725_v41 = vpop.f32.mrf.mxu2  ;;  %v751_v45 = vpop.f32.mrf.mxu0  ;;  %1500 = vmatmul.msk.bf16.vlgmr.msra.gmra.mxu0 %vm501_vm2, %v1922_v36 }
  0xc5   : > { %v726_v43 = vadd.f32 %v725_v41, %v545_v38  ;;  %v739_v44 = vpop.f32.mrf.mxu3  ;;  %v752_v58 = vadd.f32 %v751_v45, %v571_v51 }
  0xc6   : > { %v740_v47 = vadd.f32 %v739_v44, %v559_v40  ;;  %v765_v48 = vpop.f32.mrf.mxu1  ;;  %1502 = vmatmul.msk.bf16.vlgmr.msra.gmra.mxu1 %vm501_vm2, %v1922_v36 }
  0xc7   : > { %v800_v49 = vpack.c.bf16 %v726_v43, %v724_v42  ;;  %v766_v61 = vadd.f32 %v765_v48, %v585_v54 }
  0xc8   : > { %v801_v50 = vpack.c.bf16 %v740_v47, %v738_v46 }
  0xc9   : > { %895 = vmatpush.bf16.msra.mxu2 %v800_v49 }
  0xca   : > { %914 = vmatpush.bf16.msra.mxu3 %v801_v50 }
  0xcc   : > { %v779_v53 = vpop.f32.mrf.mxu2  ;;  %1504 = vmatmul.msk.bf16.vlgmr.msra.gmra.mxu2 %vm501_vm2, %v1922_v36  ;;  %v753_v57 = vpop.f32.mrf.mxu0 }
  0xcd   : > { %v793_v56 = vpop.f32.mrf.mxu3  ;;  %1506 = vmatmul.msk.bf16.vlgmr.msra.gmra.mxu3 %vm501_vm2, %v1922_v36  ;;  %v754_v59 = vadd.f32 %v753_v57, %v573_v52  ;;  %v780_v7 = vadd.f32 %v779_v53, %v599_v2  ;;  %v1162_v52 = vld [vmem:[%s1985_s16] sm:$0xff] }
  0xce   : > { %v767_v60 = vpop.f32.mrf.mxu1  ;;  %v794_v12 = vadd.f32 %v793_v56, %v613_v4 }
  0xcf   : > { %v768_v62 = vadd.f32 %v767_v60, %v587_v55  ;;  %v802_v63 = vpack.c.bf16 %v754_v59, %v752_v58  ;;  %v1163_v55 = vld [vmem:[%s1985_s16 + $0x8] sm:$0xff] }
  0xd1   : > { %v803_v0 = vpack.c.bf16 %v768_v62, %v766_v61  ;;  %933 = vmatpush.bf16.msrb.mxu0 %v802_v63 }
  0xd3   : > { %952 = vmatpush.bf16.msrb.mxu1 %v803_v0 }
  0xd4   : > { %v781_v6 = vpop.f32.mrf.mxu2  ;;  %1501 = vmatmul.msk.bf16.gmra.mxu0 %vm501_vm2, %v1541_v1 }
  0xd5   : > { %v782_v8 = vadd.f32 %v781_v6, %v601_v3  ;;  %v795_v9 = vpop.f32.mrf.mxu3 }
  0xd6   : > { %v796_v13 = vadd.f32 %v795_v9, %v615_v5  ;;  %1503 = vmatmul.msk.bf16.gmra.mxu1 %vm501_vm2, %v1541_v1 }
  0xd7   : > { %v804_v17 = vpack.c.bf16 %v782_v8, %v780_v7 }
  0xd8   : > { %v805_v10 = vpack.c.bf16 %v796_v13, %v794_v12 }
  0xd9   : > { %971 = vmatpush.bf16.msrb.mxu2 %v804_v17 }
  0xda   : > { %990 = vmatpush.bf16.msrb.mxu3 %v805_v10 }
  0xdc   : > { %1505 = vmatmul.msk.bf16.gmra.mxu2 %vm501_vm2, %v1541_v1 }
  0xdd   : > { %1507 = vmatmul.msk.bf16.gmra.mxu3 %vm501_vm2, %v1541_v1 }
  0xe4   : > { %1508 = vmatmul.msk.bf16.vlgmr.msrb.gmra.mxu0 %vm501_vm2, %v1922_v36 }
  0xe6   : > { %1510 = vmatmul.msk.bf16.vlgmr.msrb.gmra.mxu1 %vm501_vm2, %v1922_v36 }
  0xec   : > { %1512 = vmatmul.msk.bf16.vlgmr.msrb.gmra.mxu2 %vm501_vm2, %v1922_v36 }
  0xed   : > { %1514 = vmatmul.msk.bf16.vlgmr.msrb.gmra.mxu3 %vm501_vm2, %v1922_v36 }
  0xf4   : > { %1509 = vmatmul.msk.bf16.gmra.mxu0 %vm501_vm2, %v1541_v1 }
  0xf6   : > { %1511 = vmatmul.msk.bf16.gmra.mxu1 %vm501_vm2, %v1541_v1 }
  0xfc   : > { %1513 = vmatmul.msk.bf16.gmra.mxu2 %vm501_vm2, %v1541_v1 }
  0xfd   : > { %1515 = vmatmul.msk.bf16.gmra.mxu3 %vm501_vm2, %v1541_v1 }
 0x109   : > { %v1975_v32 = vpop.permute.xlu2 %826 }
 0x111   : > { %v1999_v63 = vpop.permute.xlu2 %831 }
 0x141   : > { %v859_v16 = vpop.f32.mrf.mxu0 }
 0x142   : > { %v860_v18 = vadd.f32 %v859_v16, %v1967_v15 }
 0x143   : > { %v878_v19 = vpop.f32.mrf.mxu1 }
 0x144   : > { %v879_v20 = vadd.f32 %v878_v19, %v1967_v15  ;;  %v1002_v21 = vsub.f32 0.0, %v860_v18 }
 0x146   : > { %v1003_v22 = vsub.f32 0.0, %v879_v20  ;;  %v1034_v23 = vmul.f32 1.442695, %v1002_v21  ;;  %v1170_v20 = vld [vmem:[%s1985_s16 + $0x40] sm:$0xff] }
 0x148   : > { %v1036_v24 = vmul.f32 1.442695, %v1003_v22  ;;  %1571 = vpow2.f32 %v1034_v23 }
 0x149   : > { %v861_v26 = vpop.f32.mrf.mxu0 }
 0x14a   : > { %1573 = vpow2.f32 %v1036_v24  ;;  %v862_v27 = vadd.f32 %v861_v26, %v1971_v25 }
 0x14b   : > { %v880_v28 = vpop.f32.mrf.mxu1 }
 0x14c   : > { %v881_v29 = vadd.f32 %v880_v28, %v1971_v25  ;;  %v1010_v30 = vsub.f32 0.0, %v862_v27 }
 0x14e   : > { %v1011_v31 = vsub.f32 0.0, %v881_v29  ;;  %v1572_v33 = vpop.eup %1571  ;;  %v1050_v35 = vmul.f32 1.442695, %v1010_v30 }
 0x14f   : > { %v897_v34 = vpop.f32.mrf.mxu2  ;;  %v1098_v37 = vadd.f32 1.0, %v1572_v33  ;;  %v1171_v33 = vld [vmem:[%s1985_s16 + $0x48] sm:$0xff] }
 0x150   : > { %v1574_v36 = vpop.eup %1573  ;;  %v898_v38 = vadd.f32 %v897_v34, %v1967_v15  ;;  %v916_v39 = vpop.f32.mrf.mxu3  ;;  %v1052_v40 = vmul.f32 1.442695, %v1011_v31  ;;  %1575 = vpow2.f32 %v1050_v35 }
 0x151   : > { %v1099_v41 = vadd.f32 1.0, %v1574_v36  ;;  %v917_v42 = vadd.f32 %v916_v39, %v1967_v15  ;;  %1577 = vrcp.f32 %v1098_v37  ;;  %v864_v44 = vpop.f32.mrf.mxu0 }
 0x152   : > { %v1004_v43 = vsub.f32 0.0, %v898_v38  ;;  %v865_v46 = vadd.f32 %v864_v44, %v1975_v32 }
 0x153   : > { %1579 = vrcp.f32 %v1099_v41  ;;  %v1005_v45 = vsub.f32 0.0, %v917_v42  ;;  %v883_v47 = vpop.f32.mrf.mxu1 }
 0x154   : > { %v1038_v48 = vmul.f32 1.442695, %v1004_v43  ;;  %1581 = vpow2.f32 %v1052_v40  ;;  %v884_v49 = vadd.f32 %v883_v47, %v1975_v32  ;;  %v1018_v51 = vsub.f32 0.0, %v865_v46  ;;  %v1164_v40 = vld [vmem:[%s1985_s16 + $0x10] sm:$0xff] }
 0x155   : > { %v1040_v50 = vmul.f32 1.442695, %v1005_v45  ;;  %v1165_v45 = vld [vmem:[%s1985_s16 + $0x18] sm:$0xff] }
 0x156   : > { %1583 = vpow2.f32 %v1038_v48  ;;  %v1019_v53 = vsub.f32 0.0, %v884_v49  ;;  %v1576_v54 = vpop.eup %1575  ;;  %v1066_v57 = vmul.f32 1.442695, %v1018_v51 }
 0x157   : > { %1585 = vpow2.f32 %v1040_v50  ;;  %v899_v56 = vpop.f32.mrf.mxu2  ;;  %v1578_v58 = vpop.eup %1577  ;;  %v1106_v59 = vadd.f32 1.0, %v1576_v54 }
 0x158   : > { %v900_v60 = vadd.f32 %v899_v56, %v1971_v25  ;;  %v918_v61 = vpop.f32.mrf.mxu3  ;;  %v1068_v62 = vmul.f32 1.442695, %v1019_v53  ;;  %v1194_v1 = vmul.f32 %v1578_v58, %v1162_v52  ;;  %1587 = vpow2.f32 %v1066_v57 }
 0x159   : > { %v1580_v0 = vpop.eup %1579  ;;  %v919_v2 = vadd.f32 %v918_v61, %v1971_v25  ;;  %1589 = vrcp.f32 %v1106_v59  ;;  %v866_v6 = vpop.f32.mrf.mxu0 }
 0x15a   : > { %v1582_v3 = vpop.eup %1581  ;;  %v1195_v4 = vmul.f32 %v1580_v0, %v1163_v55  ;;  %v1012_v5 = vsub.f32 0.0, %v900_v60  ;;  %1226 = vst [vmem:[%s1996_s19] sm:$0xff] %v1194_v1  ;;  %1591 = vpow2.f32 %v1068_v62  ;;  %v867_v9 = vadd.f32 %v866_v6, %v1999_v63  ;;  %v1178_v55 = vld [vmem:[%s1985_s16 + $0x80] sm:$0xff]  ;;  %v1179_v0 = vld [vmem:[%s1985_s16 + $0x88] sm:$0xff] }
 0x15b   : > { %v1107_v7 = vadd.f32 1.0, %v1582_v3  ;;  %v1013_v8 = vsub.f32 0.0, %v919_v2  ;;  %v885_v12 = vpop.f32.mrf.mxu1 }
 0x15c   : > { %v1584_v13 = vpop.eup %1583  ;;  %1227 = vst [vmem:[%s1996_s19 + $0x8] sm:$0xff] %v1195_v4  ;;  %v1054_v17 = vmul.f32 1.442695, %v1012_v5  ;;  %v886_v10 = vadd.f32 %v885_v12, %v1999_v63  ;;  %v1026_v18 = vsub.f32 0.0, %v867_v9 }
 0x15d   : > { %v1586_v11 = vpop.eup %1585  ;;  %v1100_v14 = vadd.f32 1.0, %v1584_v13  ;;  %1593 = vrcp.f32 %v1107_v7  ;;  %v1056_v16 = vmul.f32 1.442695, %v1013_v8 }
 0x15e   : > { %v1101_v19 = vadd.f32 1.0, %v1586_v11  ;;  %1595 = vpow2.f32 %v1054_v17  ;;  %v1027_v21 = vsub.f32 0.0, %v886_v10  ;;  %v1588_v22 = vpop.eup %1587  ;;  %v1082_v24 = vmul.f32 1.442695, %v1026_v18  ;;  %v1172_v17 = vld [vmem:[%s1985_s16 + $0x50] sm:$0xff] }
 0x15f   : > { %1597 = vrcp.f32 %v1100_v14  ;;  %v902_v23 = vpop.f32.mrf.mxu2  ;;  %v1590_v26 = vpop.eup %1589  ;;  %v1114_v27 = vadd.f32 1.0, %v1588_v22 }
 0x160   : > { %1599 = vrcp.f32 %v1101_v19  ;;  %v903_v28 = vadd.f32 %v902_v23, %v1975_v32  ;;  %v921_v29 = vpop.f32.mrf.mxu3  ;;  %v1592_v30 = vpop.eup %1591  ;;  %v1202_v31 = vmul.f32 %v1590_v26, %v1170_v20  ;;  %v1084_v35 = vmul.f32 1.442695, %v1027_v21 }
 0x161   : > { %1601 = vpow2.f32 %v1056_v16  ;;  %v922_v34 = vadd.f32 %v921_v29, %v1975_v32  ;;  %v1115_v36 = vadd.f32 1.0, %v1592_v30  ;;  %v935_v38 = vpop.f32.mrf.mxu0 }
 0x162   : > { %1603 = vrcp.f32 %v1114_v27  ;;  %v1020_v37 = vsub.f32 0.0, %v903_v28  ;;  %1234 = vst [vmem:[%s1996_s19 + $0x40] sm:$0xff] %v1202_v31  ;;  %v936_v42 = vadd.f32 %v935_v38, %v1967_v15  ;;  %v1173_v28 = vld [vmem:[%s1985_s16 + $0x58] sm:$0xff] }
 0x163   : > { %v1594_v39 = vpop.eup %1593  ;;  %v1021_v41 = vsub.f32 0.0, %v922_v34  ;;  %1605 = vpow2.f32 %v1082_v24  ;;  %v954_v43 = vpop.f32.mrf.mxu1 }
 0x164   : > { %v1596_v44 = vpop.eup %1595  ;;  %v1203_v46 = vmul.f32 %v1594_v39, %v1171_v33  ;;  %1607 = vrcp.f32 %v1115_v36  ;;  %v1070_v47 = vmul.f32 1.442695, %v1020_v37  ;;  %v955_v48 = vadd.f32 %v954_v43, %v1967_v15 }
 0x165   : > { %v1598_v49 = vpop.eup %1597  ;;  %v1108_v50 = vadd.f32 1.0, %v1596_v44  ;;  %v1072_v51 = vmul.f32 1.442695, %v1021_v41  ;;  %1609 = vpow2.f32 %v1084_v35  ;;  %v1006_v52 = vsub.f32 0.0, %v936_v42  ;;  %v1186_v35 = vld [vmem:[%s1985_s16 + $0xc0] sm:$0xff] }
 0x166   : > { %v1600_v53 = vpop.eup %1599  ;;  %v1196_v54 = vmul.f32 %v1598_v49, %v1164_v40  ;;  %1235 = vst [vmem:[%s1996_s19 + $0x48] sm:$0xff] %v1203_v46  ;;  %1611 = vpow2.f32 %v1070_v47  ;;  %v1007_v56 = vsub.f32 0.0, %v955_v48  ;;  %v1180_v49 = vld [vmem:[%s1985_s16 + $0x90] sm:$0xff] }
 0x167   : > { %v1602_v57 = vpop.eup %1601  ;;  %v1197_v58 = vmul.f32 %v1600_v53, %v1165_v45  ;;  %1613 = vrcp.f32 %v1108_v50  ;;  %v904_v59 = vpop.f32.mrf.mxu2  ;;  %v1042_v60 = vmul.f32 1.442695, %v1006_v52  ;;  %v1187_v45 = vld [vmem:[%s1985_s16 + $0xc8] sm:$0xff] }
 0x168   : > { %v1604_v61 = vpop.eup %1603  ;;  %1228 = vst [vmem:[%s1996_s19 + $0x10] sm:$0xff] %v1196_v54  ;;  %v1109_v62 = vadd.f32 1.0, %v1602_v57  ;;  %1615 = vpow2.f32 %v1072_v51  ;;  %v905_v1 = vadd.f32 %v904_v59, %v1999_v63  ;;  %v923_v2 = vpop.f32.mrf.mxu3  ;;  %v1044_v3 = vmul.f32 1.442695, %v1007_v56 }
 0x169   : > { %v1606_v4 = vpop.eup %1605  ;;  %1229 = vst [vmem:[%s1996_s19 + $0x18] sm:$0xff] %v1197_v58  ;;  %v1210_v5 = vmul.f32 %v1604_v61, %v1178_v55  ;;  %v924_v6 = vadd.f32 %v923_v2, %v1999_v63  ;;  %1617 = vpow2.f32 %v1042_v60  ;;  %v937_v12 = vpop.f32.mrf.mxu0  ;;  %v1181_v58 = vld [vmem:[%s1985_s16 + $0x98] sm:$0xff] }
 0x16a   : > { %v1608_v7 = vpop.eup %1607  ;;  %1619 = vrcp.f32 %v1109_v62  ;;  %v1122_v8 = vadd.f32 1.0, %v1606_v4  ;;  %v1028_v9 = vsub.f32 0.0, %v905_v1  ;;  %v938_v14 = vadd.f32 %v937_v12, %v1971_v25  ;;  %v1166_v4 = vld [vmem:[%s1985_s16 + $0x20] sm:$0xff] }
 0x16b   : > { %v1610_v13 = vpop.eup %1609  ;;  %1242 = vst [vmem:[%s1996_s19 + $0x80] sm:$0xff] %v1210_v5  ;;  %v1211_v10 = vmul.f32 %v1608_v7, %v1179_v0  ;;  %v1029_v11 = vsub.f32 0.0, %v924_v6  ;;  %1621 = vpow2.f32 %v1044_v3  ;;  %v956_v16 = vpop.f32.mrf.mxu1 }
 0x16c   : > { %v1612_v18 = vpop.eup %1611  ;;  %1623 = vrcp.f32 %v1122_v8  ;;  %v1123_v19 = vadd.f32 1.0, %v1610_v13  ;;  %v1086_v20 = vmul.f32 1.442695, %v1028_v9  ;;  %v957_v21 = vadd.f32 %v956_v16, %v1971_v25  ;;  %v1167_v9 = vld [vmem:[%s1985_s16 + $0x28] sm:$0xff] }
 0x16d   : > { %v1614_v22 = vpop.eup %1613  ;;  %1243 = vst [vmem:[%s1996_s19 + $0x88] sm:$0xff] %v1211_v10  ;;  %v1116_v23 = vadd.f32 1.0, %v1612_v18  ;;  %v1014_v24 = vsub.f32 0.0, %v938_v14  ;;  %v1088_v29 = vmul.f32 1.442695, %v1029_v11 }
 0x16e   : > { %v1616_v26 = vpop.eup %1615  ;;  %v1204_v27 = vmul.f32 %v1614_v22, %v1172_v17  ;;  %1625 = vrcp.f32 %v1123_v19  ;;  %v1015_v39 = vsub.f32 0.0, %v957_v21 }
 0x16f   : > { %v1618_v30 = vpop.eup %1617  ;;  %1627 = vrcp.f32 %v1116_v23  ;;  %v1117_v31 = vadd.f32 1.0, %v1616_v26  ;;  %v973_v33 = vpop.f32.mrf.mxu2  ;;  %v1058_v43 = vmul.f32 1.442695, %v1014_v24 }
 0x170   : > { %v1620_v34 = vpop.eup %1619  ;;  %1236 = vst [vmem:[%s1996_s19 + $0x50] sm:$0xff] %v1204_v27  ;;  %1629 = vpow2.f32 %v1086_v20  ;;  %v1102_v36 = vadd.f32 1.0, %v1618_v30  ;;  %v974_v37 = vadd.f32 %v973_v33, %v1967_v15  ;;  %v992_v38 = vpop.f32.mrf.mxu3  ;;  %v1060_v55 = vmul.f32 1.442695, %v1015_v39 }
 0x171   : > { %v1622_v40 = vpop.eup %1621  ;;  %v1205_v41 = vmul.f32 %v1620_v34, %v1173_v28  ;;  %1631 = vrcp.f32 %v1117_v31  ;;  %v993_v42 = vadd.f32 %v992_v38, %v1967_v15  ;;  %v940_v48 = vpop.f32.mrf.mxu0 }
 0x172   : > { %v1624_v44 = vpop.eup %1623  ;;  %1633 = vpow2.f32 %v1088_v29  ;;  %v1103_v46 = vadd.f32 1.0, %v1622_v40  ;;  %v1008_v47 = vsub.f32 0.0, %v974_v37  ;;  %v941_v52 = vadd.f32 %v940_v48, %v1975_v32  ;;  %v1188_v29 = vld [vmem:[%s1985_s16 + $0xd0] sm:$0xff]  ;;  %v1189_v37 = vld [vmem:[%s1985_s16 + $0xd8] sm:$0xff] }
 0x173   : > { %1237 = vst [vmem:[%s1996_s19 + $0x58] sm:$0xff] %v1205_v41  ;;  %v1218_v50 = vmul.f32 %v1624_v44, %v1186_v35  ;;  %1635 = vrcp.f32 %v1102_v36  ;;  %v1009_v51 = vsub.f32 0.0, %v993_v42  ;;  %v959_v53 = vpop.f32.mrf.mxu1 }
 0x174   : > { %v1626_v54 = vpop.eup %1625  ;;  %1637 = vrcp.f32 %v1103_v46  ;;  %v1046_v15 = vmul.f32 1.442695, %v1008_v47  ;;  %v960_v56 = vadd.f32 %v959_v53, %v1975_v32  ;;  %v1022_v61 = vsub.f32 0.0, %v941_v52  ;;  %v1174_v52 = vld [vmem:[%s1985_s16 + $0x60] sm:$0xff] }
 0x175   : > { %v1628_v57 = vpop.eup %1627  ;;  %1250 = vst [vmem:[%s1996_s19 + $0xc0] sm:$0xff] %v1218_v50  ;;  %v1219_v59 = vmul.f32 %v1626_v54, %v1187_v45  ;;  %v1048_v60 = vmul.f32 1.442695, %v1009_v51  ;;  %1639 = vpow2.f32 %v1058_v43  ;;  %v1168_v54 = vld [vmem:[%s1985_s16 + $0x30] sm:$0xff] }
 0x176   : > { %v1630_v62 = vpop.eup %1629  ;;  %v1212_v0 = vmul.f32 %v1628_v57, %v1180_v49  ;;  %1641 = vpow2.f32 %v1046_v15  ;;  %v1023_v1 = vsub.f32 0.0, %v960_v56  ;;  %v1074_v6 = vmul.f32 1.442695, %v1022_v61  ;;  %v1169_v57 = vld [vmem:[%s1985_s16 + $0x38] sm:$0xff]  ;;  %v1175_v61 = vld [vmem:[%s1985_s16 + $0x68] sm:$0xff] }
 0x177   : > { %v1632_v2 = vpop.eup %1631  ;;  %1251 = vst [vmem:[%s1996_s19 + $0xc8] sm:$0xff] %v1219_v59  ;;  %v1124_v3 = vadd.f32 1.0, %v1630_v62  ;;  %1643 = vpow2.f32 %v1048_v60  ;;  %v975_v5 = vpop.f32.mrf.mxu2 }
 0x178   : > { %v1634_v7 = vpop.eup %1633  ;;  %1244 = vst [vmem:[%s1996_s19 + $0x90] sm:$0xff] %v1212_v0  ;;  %v1213_v8 = vmul.f32 %v1632_v2, %v1181_v58  ;;  %1645 = vpow2.f32 %v1060_v55  ;;  %v976_v12 = vadd.f32 %v975_v5, %v1971_v25  ;;  %v994_v13 = vpop.f32.mrf.mxu3  ;;  %v1076_v17 = vmul.f32 1.442695, %v1023_v1 }
 0x179   : > { %v1636_v10 = vpop.eup %1635  ;;  %1647 = vrcp.f32 %v1124_v3  ;;  %v1125_v11 = vadd.f32 1.0, %v1634_v7  ;;  %v995_v14 = vadd.f32 %v994_v13, %v1971_v25  ;;  %v942_v20 = vpop.f32.mrf.mxu0 }
 0x17a   : > { %v1638_v16 = vpop.eup %1637  ;;  %1245 = vst [vmem:[%s1996_s19 + $0x98] sm:$0xff] %v1213_v8  ;;  %v1198_v18 = vmul.f32 %v1636_v10, %v1166_v4  ;;  %v1016_v19 = vsub.f32 0.0, %v976_v12  ;;  %1649 = vpow2.f32 %v1074_v6  ;;  %v943_v25 = vadd.f32 %v942_v20, %v1999_v63  ;;  %v1182_v8 = vld [vmem:[%s1985_s16 + $0xa0] sm:$0xff]  ;;  %v1183_v10 = vld [vmem:[%s1985_s16 + $0xa8] sm:$0xff] }
 0x17b   : > { %v1640_v21 = vpop.eup %1639  ;;  %1651 = vrcp.f32 %v1125_v11  ;;  %v1199_v22 = vmul.f32 %v1638_v16, %v1167_v9  ;;  %v1017_v23 = vsub.f32 0.0, %v995_v14  ;;  %v961_v24 = vpop.f32.mrf.mxu1 }
 0x17c   : > { %v1642_v26 = vpop.eup %1641  ;;  %1230 = vst [vmem:[%s1996_s19 + $0x20] sm:$0xff] %v1198_v18  ;;  %v1110_v27 = vadd.f32 1.0, %v1640_v21  ;;  %1653 = vpow2.f32 %v1076_v17  ;;  %v962_v31 = vadd.f32 %v961_v24, %v1999_v63  ;;  %v1062_v35 = vmul.f32 1.442695, %v1016_v19 }
 0x17d   : > { %v1644_v28 = vpop.eup %1643  ;;  %1231 = vst [vmem:[%s1996_s19 + $0x28] sm:$0xff] %v1199_v22  ;;  %v1104_v30 = vadd.f32 1.0, %v1642_v26  ;;  %v1064_v39 = vmul.f32 1.442695, %v1017_v23  ;;  %v1030_v45 = vsub.f32 0.0, %v943_v25 }
 0x17e   : > { %v1646_v33 = vpop.eup %1645  ;;  %v1105_v34 = vadd.f32 1.0, %v1644_v28  ;;  %1655 = vrcp.f32 %v1110_v27  ;;  %v1031_v49 = vsub.f32 0.0, %v962_v31 }
 0x17f   : > { %v1648_v36 = vpop.eup %1647  ;;  %1657 = vrcp.f32 %v1104_v30  ;;  %v1111_v38 = vadd.f32 1.0, %v1646_v33  ;;  %v978_v40 = vpop.f32.mrf.mxu2  ;;  %v1090_v59 = vmul.f32 1.442695, %v1030_v45  ;;  %v1177_v33 = vld [vmem:[%s1985_s16 + $0x78] sm:$0xff] }
 0x180   : > { %v1650_v41 = vpop.eup %1649  ;;  %v1220_v42 = vmul.f32 %v1648_v36, %v1188_v29  ;;  %1659 = vrcp.f32 %v1105_v34  ;;  %v979_v43 = vadd.f32 %v978_v40, %v1975_v32  ;;  %v997_v44 = vpop.f32.mrf.mxu3  ;;  %v1092_v0 = vmul.f32 1.442695, %v1031_v49  ;;  %v1176_v29 = vld [vmem:[%s1985_s16 + $0x70] sm:$0xff] }
 0x181   : > { %v1652_v46 = vpop.eup %1651  ;;  %1661 = vrcp.f32 %v1111_v38  ;;  %v1118_v47 = vadd.f32 1.0, %v1650_v41  ;;  %v998_v48 = vadd.f32 %v997_v44, %v1975_v32  ;;  %v1185_v41 = vld [vmem:[%s1985_s16 + $0xb8] sm:$0xff] }
 0x182   : > { %v1654_v50 = vpop.eup %1653  ;;  %1252 = vst [vmem:[%s1996_s19 + $0xd0] sm:$0xff] %v1220_v42  ;;  %v1221_v51 = vmul.f32 %v1652_v46, %v1189_v37  ;;  %1663 = vpow2.f32 %v1062_v35  ;;  %v1024_v53 = vsub.f32 0.0, %v979_v43  ;;  %v1190_v43 = vld [vmem:[%s1985_s16 + $0xe0] sm:$0xff] }
 0x183   : > { %1665 = vpow2.f32 %v1064_v39  ;;  %v1119_v15 = vadd.f32 1.0, %v1654_v50  ;;  %v1025_v55 = vsub.f32 0.0, %v998_v48  ;;  %v1184_v39 = vld [vmem:[%s1985_s16 + $0xb0] sm:$0xff] }
 0x184   : > { %v1656_v56 = vpop.eup %1655  ;;  %1253 = vst [vmem:[%s1996_s19 + $0xd8] sm:$0xff] %v1221_v51  ;;  %1667 = vrcp.f32 %v1118_v47  ;;  %v1078_v58 = vmul.f32 1.442695, %v1024_v53  ;;  %v1191_v47 = vld [vmem:[%s1985_s16 + $0xe8] sm:$0xff] }
 0x185   : > { %v1658_v32 = vpop.eup %1657  ;;  %v1206_v60 = vmul.f32 %v1656_v56, %v1174_v52  ;;  %1669 = vrcp.f32 %v1119_v15  ;;  %v1080_v62 = vmul.f32 1.442695, %v1025_v55  ;;  %v1192_v15 = vld [vmem:[%s1985_s16 + $0xf0] sm:$0xff] }
 0x186   : > { %v1660_v1 = vpop.eup %1659  ;;  %v1200_v2 = vmul.f32 %v1658_v32, %v1168_v54  ;;  %1671 = vpow2.f32 %v1078_v58 }
 0x187   : > { %v1662_v3 = vpop.eup %1661  ;;  %v1201_v4 = vmul.f32 %v1660_v1, %v1169_v57  ;;  %1238 = vst [vmem:[%s1996_s19 + $0x60] sm:$0xff] %v1206_v60  ;;  %1673 = vpow2.f32 %v1080_v62  ;;  %v980_v5 = vpop.f32.mrf.mxu2  ;;  %v1193_v57 = vld [vmem:[%s1985_s16 + $0xf8] sm:$0xff] }
 0x188   : > { %v1664_v6 = vpop.eup %1663  ;;  %1232 = vst [vmem:[%s1996_s19 + $0x30] sm:$0xff] %v1200_v2  ;;  %v1207_v7 = vmul.f32 %v1662_v3, %v1175_v61  ;;  %1675 = vpow2.f32 %v1090_v59  ;;  %v981_v9 = vadd.f32 %v980_v5, %v1999_v63  ;;  %v999_v12 = vpop.f32.mrf.mxu3 }
 0x189   : > { %v1666_v13 = vpop.eup %1665  ;;  %1233 = vst [vmem:[%s1996_s19 + $0x38] sm:$0xff] %v1201_v4  ;;  %v1112_v17 = vadd.f32 1.0, %v1664_v6  ;;  %1677 = vpow2.f32 %v1092_v0  ;;  %v1000_v11 = vadd.f32 %v999_v12, %v1999_v63 }
 0x18a   : > { %v1668_v14 = vpop.eup %1667  ;;  %1239 = vst [vmem:[%s1996_s19 + $0x68] sm:$0xff] %v1207_v7  ;;  %v1113_v16 = vadd.f32 1.0, %v1666_v13  ;;  %v1032_v18 = vsub.f32 0.0, %v981_v9 }
 0x18b   : > { %v1670_v19 = vpop.eup %1669  ;;  %1679 = vrcp.f32 %v1112_v17  ;;  %v1214_v20 = vmul.f32 %v1668_v14, %v1182_v8  ;;  %v1033_v21 = vsub.f32 0.0, %v1000_v11 }
 0x18c   : > { %v1672_v22 = vpop.eup %1671  ;;  %1681 = vrcp.f32 %v1113_v16  ;;  %v1215_v23 = vmul.f32 %v1670_v19, %v1183_v10  ;;  %v1094_v24 = vmul.f32 1.442695, %v1032_v18 }
 0x18d   : > { %v1674_v26 = vpop.eup %1673  ;;  %1246 = vst [vmem:[%s1996_s19 + $0xa0] sm:$0xff] %v1214_v20  ;;  %v1120_v27 = vadd.f32 1.0, %v1672_v22  ;;  %v1096_v31 = vmul.f32 1.442695, %v1033_v21 }
 0x18e   : > { %v1676_v25 = vpop.eup %1675  ;;  %1247 = vst [vmem:[%s1996_s19 + $0xa8] sm:$0xff] %v1215_v23  ;;  %v1121_v63 = vadd.f32 1.0, %v1674_v26  ;;  %1683 = vpow2.f32 %v1094_v24 }
 0x18f   : > { %v1678_v28 = vpop.eup %1677  ;;  %1685 = vrcp.f32 %v1120_v27  ;;  %v1126_v30 = vadd.f32 1.0, %v1676_v25 }
 0x190   : > { %1687 = vrcp.f32 %v1121_v63  ;;  %v1127_v34 = vadd.f32 1.0, %v1678_v28 }
 0x191   : > { %v1680_v35 = vpop.eup %1679  ;;  %1689 = vrcp.f32 %v1126_v30 }
 0x192   : > { %v1682_v36 = vpop.eup %1681  ;;  %v1208_v37 = vmul.f32 %v1680_v35, %v1176_v29  ;;  %1691 = vrcp.f32 %v1127_v34 }
 0x193   : > { %v1209_v38 = vmul.f32 %v1682_v36, %v1177_v33  ;;  %1693 = vpow2.f32 %v1096_v31 }
 0x194   : > { %v1684_v40 = vpop.eup %1683  ;;  %1240 = vst [vmem:[%s1996_s19 + $0x70] sm:$0xff] %v1208_v37 }
 0x195   : > { %v1686_v42 = vpop.eup %1685  ;;  %1241 = vst [vmem:[%s1996_s19 + $0x78] sm:$0xff] %v1209_v38  ;;  %v1128_v44 = vadd.f32 1.0, %v1684_v40 }
 0x196   : > { %v1688_v45 = vpop.eup %1687  ;;  %v1216_v46 = vmul.f32 %v1686_v42, %v1184_v39 }
 0x197   : > { %v1690_v48 = vpop.eup %1689  ;;  %v1217_v49 = vmul.f32 %v1688_v45, %v1185_v41  ;;  %1695 = vrcp.f32 %v1128_v44 }
 0x198   : > { %v1692_v50 = vpop.eup %1691  ;;  %1248 = vst [vmem:[%s1996_s19 + $0xb0] sm:$0xff] %v1216_v46  ;;  %v1222_v51 = vmul.f32 %v1690_v48, %v1190_v43 }
 0x199   : > { %v1694_v52 = vpop.eup %1693  ;;  %1249 = vst [vmem:[%s1996_s19 + $0xb8] sm:$0xff] %v1217_v49  ;;  %v1223_v53 = vmul.f32 %v1692_v50, %v1191_v47 }
 0x19a   : > { %1254 = vst [vmem:[%s1996_s19 + $0xe0] sm:$0xff] %v1222_v51  ;;  %v1129_v54 = vadd.f32 1.0, %v1694_v52 }
 0x19b   : > { %1255 = vst [vmem:[%s1996_s19 + $0xe8] sm:$0xff] %v1223_v53 }
 0x19c   : > { %1697 = vrcp.f32 %v1129_v54 }
 0x19d   : > { %v1696_v55 = vpop.eup %1695 }
 0x19e   : > { %v1224_v56 = vmul.f32 %v1696_v55, %v1192_v15 }
 0x1a0   : > { %1256 = vst [vmem:[%s1996_s19 + $0xf0] sm:$0xff] %v1224_v56 }
 0x1a2   : > { %v1698_v58 = vpop.eup %1697 }
 0x1a3   : > { %v1225_v59 = vmul.f32 %v1698_v58, %v1193_v57 }
 0x1a5   : > { %1257 = vst [vmem:[%s1996_s19 + $0xf8] sm:$0xff] %v1225_v59 }
 0x1a6 PF: > { %s18_s29 = sadd.s32 1, %s1721_s29   ;;  %s2104_s27 = smov %s1717_s28 }
 0x1a7   : > { %p15_p5 = scmp.ge.s32.totalorder %s18_s29, 4   ;;  %s2105_s28 = smov %s2107_s30 }
 0x1a9   :  { %17 = sbr.rel (!%p15_p5) target bundleno = 2 (0x2), region = 91 }

// kernel: esa_fwd.6
= control target key start
LH: loop header
LB: loop body
LE: loop exit
PB: predicated region body
PF: predicated region fallthrough
CT: control target
= control target key end

     0   :  { %vm53_vm0 = vcmask 1040384   ;;  %vm49_vm1 = vcmask 146432   ;;  %vm113_vm2 = vcmask 130048   ;;  %vm1361_vm3 = vcmask 68608   ;;  %s1698_s30 = smov 119   ;;  %s2083_s0 = inlined_call_operand.vmem [shape: bf16[9,18,18], index: 0, kind: input, shape index: {}]   ;;  %s2084_s7 = inlined_call_operand.vmem [shape: bf16[16,18], index: 7, kind: input, shape index: {}]   ;;  %s2085_s1 = inlined_call_operand.vmem [shape: bf16[9,16,16], index: 1, kind: input, shape index: {}]   ;;  %s2086_s2 = inlined_call_operand.vmem [shape: f32[16,1], index: 2, kind: input, shape index: {}]   ;;  %s2087_s3 = inlined_call_operand.vmem [shape: bf16[9,16,16], index: 3, kind: input, shape index: {}]   ;;  %s2088_s4 = inlined_call_operand.vmem [shape: f32[16,1], index: 4, kind: input, shape index: {}]   ;;  %s2089_s5 = inlined_call_operand.vmem [shape: bf16[9,16,16], index: 5, kind: input, shape index: {}]   ;;  %s2090_s6 = inlined_call_operand.vmem [shape: f32[16,1], index: 6, kind: input, shape index: {}]   ;;  %s2091_s8 = inlined_call_operand.vmem [shape: bf16[2,16,9], index: 8, kind: output, shape index: {}]  }
   0x1   :  { %v34_v0 = vld [vmem:[%s2083_s0 + $0x8] sm:$0x1]  ;;  %v1390_v1 = vld [vmem:[%s2083_s0 + $0x14] sm:$0x1]  ;;  %v1761_v8 = vld [vmem:[%s2083_s0] sm:$0xff] }
   0x2   :  { %v45_v2 = vunpack.c.l.b16 %v34_v0  ;;  %v83_v3 = vunpack.c.l.b16 %v1390_v1  ;;  %v1766_v9 = vld [vmem:[%s2083_s0 + $0xc] sm:$0xff]  ;;  %v1771_v10 = vld [vmem:[%s2084_s7] sm:$0xff]  ;;  %v1440_v19 = vld [vmem:[%s2083_s0 + $0x38] sm:$0x1] }
   0x3   :  { %v1410_v11 = vld [vmem:[%s2083_s0 + $0x20] sm:$0x1]  ;;  %v1425_v12 = vld [vmem:[%s2083_s0 + $0x2c] sm:$0x1]  ;;  %v1795_v20 = vld [vmem:[%s2083_s0 + $0x24] sm:$0xff]  ;;  %v278_v22 = vunpack.c.l.b16 %v1440_v19 }
   0x4   :  { %v47_v4 = vpack.c.b16 %v45_v2, %v45_v2  ;;  %v85_v5 = vpack.c.b16 %v83_v3, %v83_v3  ;;  %v220_v13 = vunpack.c.l.b16 %v1425_v12  ;;  %v162_v16 = vunpack.c.l.b16 %v1410_v11  ;;  %v1659_v28 = vld [vmem:[%s2085_s1 + $0x8] sm:$0xff]  ;;  %v1657_v29 = vld [vmem:[%s2085_s1] sm:$0xff]  ;;  %v1811_v31 = vld [vmem:[%s2083_s0 + $0x18] sm:$0xff] }
   0x5   :  { %v280_v30 = vpack.c.b16 %v278_v22, %v278_v22  ;;  %v1455_v33 = vld [vmem:[%s2083_s0 + $0x44] sm:$0x1]  ;;  %v1828_v35 = vld [vmem:[%s2083_s0 + $0x30] sm:$0xff]  ;;  %v1840_v40 = vld [vmem:[%s2083_s0 + $0x3c] sm:$0xff] }
   0x6   :  { %v1751_v6 = vsel %vm53_vm0, %v47_v4, 0  ;;  %v1754_v7 = vsel %vm53_vm0, %v85_v5, 0  ;;  %v222_v17 = vpack.c.b16 %v220_v13, %v220_v13  ;;  %v164_v21 = vpack.c.b16 %v162_v16, %v162_v16  ;;  %v1470_v37 = vld [vmem:[%s2083_s0 + $0x50] sm:$0x1]  ;;  %v1485_v43 = vld [vmem:[%s2083_s0 + $0x5c] sm:$0x1] }
   0x7   :  { %63 = vmatpush.bf16.msra.mxu0 %v1751_v6  ;;  %96 = vmatpush.bf16.msra.mxu1 %v1754_v7  ;;  %v1818_v32 = vsel %vm53_vm0, %v280_v30, 0  ;;  %v336_v34 = vunpack.c.l.b16 %v1455_v33  ;;  %v394_v39 = vunpack.c.l.b16 %v1470_v37  ;;  %v1858_v44 = vld [vmem:[%s2083_s0 + $0x48] sm:$0xff]  ;;  %v452_v45 = vunpack.c.l.b16 %v1485_v43  ;;  %v1871_v50 = vld [vmem:[%s2083_s0 + $0x54] sm:$0xff]  ;;  %v1888_v53 = vld [vmem:[%s2083_s0 + $0x60] sm:$0xff] }
   0x8   :  { %v1786_v18 = vsel %vm53_vm0, %v222_v17, 0  ;;  %v1799_v27 = vsel %vm53_vm0, %v164_v21, 0  ;;  %v1500_v47 = vld [vmem:[%s2083_s0 + $0x68] sm:$0x1]  ;;  %v1663_v58 = vld [vmem:[%s2085_s1 + $0x18] sm:$0xff]  ;;  %v1661_v4 = vld [vmem:[%s2085_s1 + $0x10] sm:$0xff] }
   0x9   :  { %v338_v36 = vpack.c.b16 %v336_v34, %v336_v34  ;;  %v396_v41 = vpack.c.b16 %v394_v39, %v394_v39  ;;  %v454_v46 = vpack.c.b16 %v452_v45, %v452_v45  ;;  %v510_v49 = vunpack.c.l.b16 %v1500_v47  ;;  %v1667_v0 = vld [vmem:[%s2085_s1 + $0x28] sm:$0xff]  ;;  %v1671_v12 = vld [vmem:[%s2085_s1 + $0x38] sm:$0xff]  ;;  %v559_v16 = vld [vmem:[%s2086_s2] sm:$0xff] }
   0xa   :  { %v1697_v17 = vmov 0   ;;  %v560_v21 = vld [vmem:[%s2086_s2 + $0x8] sm:$0xff] }
   0xb   :  { %64 = vmatpush.bf16.msra.mxu0 %v1761_v8  ;;  %97 = vmatpush.bf16.msra.mxu1 %v1766_v9  ;;  %v1834_v38 = vsel %vm53_vm0, %v338_v36, 0  ;;  %v1845_v42 = vsel %vm53_vm0, %v396_v41, 0  ;;  %v1865_v48 = vsel %vm53_vm0, %v454_v46, 0  ;;  %v512_v51 = vpack.c.b16 %v510_v49, %v510_v49 }
   0xc   :  { %1694 = vset.pattern.permute.xlu0 %v1697_v17  ;;  %1695 = vset.pattern.permute.xlu1 %v1697_v17 }
   0xd   :  { %v1876_v52 = vsel %vm53_vm0, %v512_v51, 0  ;;  %563 = vperm.xlu0 %1694, %v559_v16   ;;  %1696 = vset.pattern.permute.xlu2 %v1697_v17 }
   0xe   :  { %1387 = vmatmul.msk.bf16.vlgmr.msra.gmra.mxu0 %vm49_vm1, %v1771_v10  ;;  %1395 = vmatmul.msk.bf16.vlgmr.msra.gmra.mxu1 %vm49_vm1, %v1771_v10 }
   0xf   :  { %233 = vmatpush.bf16.msrb.mxu0 %v1786_v18 }
  0x13   :  { %234 = vmatpush.bf16.msrb.mxu0 %v1795_v20 }
  0x15   :  { %568 = vperm.xlu0 %1694, %v560_v21  }
  0x17   :  { %349 = vmatpush.bf16.msra.mxu0 %v1834_v38 }
  0x1b   :  { %350 = vmatpush.bf16.msra.mxu0 %v1840_v40 }
  0x1e   :  { %1430 = vmatmul.msk.bf16.vlgmr.msrb.gmra.mxu0 %vm49_vm1, %v1771_v10 }
  0x1f   :  { %465 = vmatpush.bf16.msrb.mxu0 %v1865_v48 }
  0x23   :  { %466 = vmatpush.bf16.msrb.mxu0 %v1871_v50 }
  0x2e   :  { %1460 = vmatmul.msk.bf16.vlgmr.msra.gmra.mxu0 %vm49_vm1, %v1771_v10 }
  0x2f   :  { %585 = vmatpush.bf16.msra.mxu0 %v1751_v6 }
  0x33   :  { %586 = vmatpush.bf16.msra.mxu0 %v1761_v8 }
  0x3e   :  { %1490 = vmatmul.msk.bf16.vlgmr.msrb.gmra.mxu0 %vm49_vm1, %v1771_v10 }
  0x3f   :  { %664 = vmatpush.bf16.msrb.mxu0 %v1799_v27 }
  0x43   :  { %665 = vmatpush.bf16.msrb.mxu0 %v1811_v31 }
  0x8b   :  { %v66_v14 = vpop.f32.mrf.mxu0  ;;  %v99_v15 = vpop.f32.mrf.mxu1 }
  0x93   :  { %v68_v23 = vpop.f32.mrf.mxu0  ;;  %v101_v24 = vpop.f32.mrf.mxu1 }
  0x94   :  { %v104_v25 = vpack.c.bf16 %v101_v24, %v99_v15  ;;  %v71_v26 = vpack.c.bf16 %v68_v23, %v66_v14  ;;  %v1665_v15 = vld [vmem:[%s2085_s1 + $0x20] sm:$0xff]  ;;  %v1669_v24 = vld [vmem:[%s2085_s1 + $0x30] sm:$0xff] }
  0x96   :  { %124 = vmatpush.bf16.msra.mxu2 %v104_v25  ;;  %146 = vmatpush.bf16.msra.mxu3 %v71_v26 }
  0x99   :  { %1402 = vmatmul.msk.bf16.vlgmr.msra.gmra.mxu2 %vm113_vm2, %v1659_v28  ;;  %1407 = vmatmul.msk.bf16.vlgmr.msra.gmra.mxu3 %vm113_vm2, %v1657_v29  ;;  %v1673_v29 = vld [vmem:[%s2085_s1 + $0x40] sm:$0xff] }
  0x9a   :  { %175 = vmatpush.bf16.msrb.mxu2 %v1799_v27 }
  0x9b   :  { %v236_v54 = vpop.f32.mrf.mxu0 }
  0x9e   :  { %176 = vmatpush.bf16.msrb.mxu2 %v1811_v31 }
  0xa2   :  { %291 = vmatpush.bf16.msra.mxu2 %v1818_v32 }
  0xa3   :  { %v238_v56 = vpop.f32.mrf.mxu0 }
  0xa4   :  { %v241_v57 = vpack.c.bf16 %v238_v56, %v236_v54 }
  0xa6   :  { %292 = vmatpush.bf16.msra.mxu2 %v1828_v35  ;;  %260 = vmatpush.bf16.msrb.mxu1 %v241_v57 }
  0xa9   :  { %1415 = vmatmul.msk.bf16.vlgmr.msrb.gmra.mxu2 %vm49_vm1, %v1771_v10  ;;  %1437 = vmatmul.msk.bf16.vlgmr.msrb.gmra.mxu1 %vm113_vm2, %v1663_v58 }
  0xaa   :  { %407 = vmatpush.bf16.msrb.mxu2 %v1845_v42 }
  0xab   :  { %v352_v60 = vpop.f32.mrf.mxu0 }
  0xae   :  { %408 = vmatpush.bf16.msrb.mxu2 %v1858_v44 }
  0xb3   :  { %v354_v62 = vpop.f32.mrf.mxu0 }
  0xb4   :  { %v357_v63 = vpack.c.bf16 %v354_v62, %v352_v60 }
  0xb6   :  { %376 = vmatpush.bf16.msra.mxu1 %v357_v63 }
  0xb9   :  { %1445 = vmatmul.msk.bf16.vlgmr.msra.gmra.mxu2 %vm49_vm1, %v1771_v10  ;;  %1467 = vmatmul.msk.bf16.vlgmr.msra.gmra.mxu1 %vm113_vm2, %v1667_v0 }
  0xba   :  { %523 = vmatpush.bf16.msra.mxu2 %v1876_v52 }
  0xbb   :  { %v468_v3 = vpop.f32.mrf.mxu0 }
  0xbe   :  { %524 = vmatpush.bf16.msra.mxu2 %v1888_v53 }
  0xc9   :  { %1475 = vmatmul.msk.bf16.vlgmr.msrb.gmra.mxu2 %vm49_vm1, %v1771_v10 }
  0xd9   :  { %1505 = vmatmul.msk.bf16.vlgmr.msra.gmra.mxu2 %vm49_vm1, %v1771_v10  ;;  %v470_v10 = vpop.f32.mrf.mxu0 }
  0xda   :  { %v473_v11 = vpack.c.bf16 %v470_v10, %v468_v3 }
  0xdc   :  { %492 = vmatpush.bf16.msrb.mxu1 %v473_v11 }
  0xdf   :  { %1497 = vmatmul.msk.bf16.vlgmr.msrb.gmra.mxu1 %vm113_vm2, %v1671_v12 }
  0xe0   :  { %602 = vmatpush.bf16.msra.mxu1 %v1754_v7 }
  0xe4   :  { %603 = vmatpush.bf16.msra.mxu1 %v1766_v9 }
 0x11c   :  { %v1896_v55 = vpop.f32.mrf.mxu2  ;;  %v148_v30 = vpop.f32.mrf.mxu3 }
 0x11d   :  { %v149_v49 = vadd.f32 %v148_v30, %v1896_v55  ;;  %v1674_v30 = vld [vmem:[%s2087_s3] sm:$0xff] }
 0x124   :  { %v128_v59 = vpop.f32.mrf.mxu2  ;;  %v150_v33 = vpop.f32.mrf.mxu3 }
 0x125   :  { %v151_v54 = vadd.f32 %v150_v33, %v128_v59 }
 0x126   :  { %v262_v36 = vpop.f32.mrf.mxu1 }
 0x12c   :  { %v178_v61 = vpop.f32.mrf.mxu2 }
 0x12e   :  { %v264_v39 = vpop.f32.mrf.mxu1 }
 0x134   :  { %v180_v1 = vpop.f32.mrf.mxu2 }
 0x135   :  { %v183_v2 = vpack.c.bf16 %v180_v1, %v178_v61 }
 0x136   :  { %v378_v43 = vpop.f32.mrf.mxu1 }
 0x137   :  { %202 = vmatpush.bf16.msrb.mxu3 %v183_v2  ;;  %v564_v2 = vpop.permute.xlu0 %563 }
 0x13a   :  { %1422 = vmatmul.msk.bf16.vlgmr.msrb.gmra.mxu3 %vm113_vm2, %v1661_v4 }
 0x13c   :  { %v294_v5 = vpop.f32.mrf.mxu2 }
 0x13e   :  { %v380_v46 = vpop.f32.mrf.mxu1 }
 0x144   :  { %v296_v13 = vpop.f32.mrf.mxu2 }
 0x145   :  { %v299_v14 = vpack.c.bf16 %v296_v13, %v294_v5 }
 0x147   :  { %318 = vmatpush.bf16.msra.mxu3 %v299_v14 }
 0x14a   :  { %1452 = vmatmul.msk.bf16.vlgmr.msra.gmra.mxu3 %vm113_vm2, %v1665_v15  ;;  %v569_v15 = vpop.permute.xlu0 %568 }
 0x14c   :  { %v410_v19 = vpop.f32.mrf.mxu2 }
 0x154   :  { %v412_v22 = vpop.f32.mrf.mxu2 }
 0x155   :  { %v415_v23 = vpack.c.bf16 %v412_v22, %v410_v19 }
 0x157   :  { %434 = vmatpush.bf16.msrb.mxu3 %v415_v23 }
 0x15a   :  { %1482 = vmatmul.msk.bf16.vlgmr.msrb.gmra.mxu3 %vm113_vm2, %v1669_v24 }
 0x15c   :  { %v526_v25 = vpop.f32.mrf.mxu2  ;;  %v494_v61 = vpop.f32.mrf.mxu1 }
 0x164   :  { %v528_v26 = vpop.f32.mrf.mxu2  ;;  %v496_v11 = vpop.f32.mrf.mxu1 }
 0x165   :  { %v531_v28 = vpack.c.bf16 %v528_v26, %v526_v25 }
 0x167   :  { %550 = vmatpush.bf16.msra.mxu3 %v531_v28 }
 0x16a   :  { %1512 = vmatmul.msk.bf16.vlgmr.msra.gmra.mxu3 %vm113_vm2, %v1673_v29  ;;  %v1675_v29 = vld [vmem:[%s2087_s3 + $0x8] sm:$0xff] }
 0x1bd   :  { %v204_v34 = vpop.f32.mrf.mxu3 }
 0x1be   :  { %v209_v51 = vadd.f32 %v204_v34, %v149_v49 }
 0x1c0   :  { %v267_v56 = vadd.f32 %v262_v36, %v209_v51 }
 0x1c5   :  { %v206_v37 = vpop.f32.mrf.mxu3 }
 0x1c6   :  { %v210_v57 = vadd.f32 %v206_v37, %v151_v54  ;;  %v1676_v37 = vld [vmem:[%s2087_s3 + $0x10] sm:$0xff] }
 0x1c8   :  { %v268_v62 = vadd.f32 %v264_v39, %v210_v57 }
 0x1cd   :  { %v320_v41 = vpop.f32.mrf.mxu3 }
 0x1ce   :  { %v325_v60 = vadd.f32 %v320_v41, %v267_v56 }
 0x1d0   :  { %v383_v63 = vadd.f32 %v378_v43, %v325_v60 }
 0x1d5   :  { %v322_v45 = vpop.f32.mrf.mxu3 }
 0x1d6   :  { %v326_v0 = vadd.f32 %v322_v45, %v268_v62  ;;  %v1678_v45 = vld [vmem:[%s2087_s3 + $0x20] sm:$0xff] }
 0x1d7   :  { %v952_v62 = vld [vmem:[%s2088_s4] sm:$0xff] }
 0x1d8   :  { %v384_v4 = vadd.f32 %v380_v46, %v326_v0  ;;  %956 = vperm.xlu1 %1695, %v952_v62   ;;  %v953_v0 = vld [vmem:[%s2088_s4 + $0x8] sm:$0xff] }
 0x1dd   :  { %v436_v47 = vpop.f32.mrf.mxu3 }
 0x1de   :  { %v441_v1 = vadd.f32 %v436_v47, %v383_v63 }
 0x1e0   :  { %v499_v5 = vadd.f32 %v494_v61, %v441_v1  ;;  %961 = vperm.xlu1 %1695, %v953_v0   ;;  %v1685_v0 = vld [vmem:[%s2089_s5 + $0x10] sm:$0xff] }
 0x1e5   :  { %v438_v58 = vpop.f32.mrf.mxu3 }
 0x1e6   :  { %v442_v10 = vadd.f32 %v438_v58, %v384_v4 }
 0x1e8   :  { %v500_v13 = vadd.f32 %v496_v11, %v442_v10  ;;  %v1681_v11 = vld [vmem:[%s2087_s3 + $0x38] sm:$0xff] }
 0x1ed   :  { %v552_v3 = vpop.f32.mrf.mxu3 }
 0x1ee   :  { %v557_v12 = vadd.f32 %v552_v3, %v499_v5  ;;  %v1679_v3 = vld [vmem:[%s2087_s3 + $0x28] sm:$0xff] }
 0x1f0   :  { %v571_v14 = vadd.f32 %v564_v2, %v557_v12 }
 0x1f2   :  { %v573_v17 = vmax.f32 %v571_v14, 0.0 }
 0x1f5   :  { %v554_v55 = vpop.f32.mrf.mxu3 }
 0x1f6   :  { %v558_v59 = vadd.f32 %v554_v55, %v500_v13 }
 0x1f8   :  { %v572_v16 = vadd.f32 %v569_v15, %v558_v59 }
 0x1fa   :  { %v574_v19 = vmax.f32 %v572_v16, 0.0 }
 0x1fc   :  { %v575_v21 = vpack.c.bf16 %v574_v19, %v573_v17 }
 0x1fe   :  { %1513 = vmatmul.msk.bf16.vlgmr.msra.gmra.mxu0 %vm49_vm1, %v575_v21  ;;  %1514 = vmatmul.msk.bf16.vlgmr.msra.gmra.mxu1 %vm49_vm1, %v575_v21 }
 0x1ff   :  { %748 = vmatpush.bf16.msra.mxu0 %v1818_v32 }
 0x203   :  { %749 = vmatpush.bf16.msra.mxu0 %v1828_v35 }
 0x20e   :  { %1527 = vmatmul.msk.bf16.vlgmr.msrb.gmra.mxu0 %vm49_vm1, %v575_v21 }
 0x20f   :  { %832 = vmatpush.bf16.msrb.mxu0 %v1845_v42 }
 0x213   :  { %833 = vmatpush.bf16.msrb.mxu0 %v1858_v44 }
 0x21e   :  { %1543 = vmatmul.msk.bf16.vlgmr.msra.gmra.mxu0 %vm49_vm1, %v575_v21 }
 0x21f   :  { %916 = vmatpush.bf16.msra.mxu0 %v1876_v52 }
 0x223   :  { %917 = vmatpush.bf16.msra.mxu0 %v1888_v53 }
 0x22e   :  { %1559 = vmatmul.msk.bf16.vlgmr.msrb.gmra.mxu0 %vm49_vm1, %v575_v21 }
 0x23e   :  { %1575 = vmatmul.msk.bf16.vlgmr.msra.gmra.mxu0 %vm49_vm1, %v575_v21 }
 0x27b   :  { %v588_v22 = vpop.f32.mrf.mxu0  ;;  %v605_v23 = vpop.f32.mrf.mxu1 }
 0x283   :  { %v590_v24 = vpop.f32.mrf.mxu0  ;;  %v607_v25 = vpop.f32.mrf.mxu1 }
 0x284   :  { %v593_v26 = vpack.c.bf16 %v590_v24, %v588_v22  ;;  %v610_v28 = vpack.c.bf16 %v607_v25, %v605_v23 }
 0x286   :  { %629 = vmatpush.bf16.msrb.mxu2 %v610_v28  ;;  %651 = vmatpush.bf16.msrb.mxu3 %v593_v26 }
 0x289   :  { %1521 = vmatmul.msk.bf16.vlgmr.msrb.gmra.mxu2 %vm113_vm2, %v1675_v29  ;;  %1526 = vmatmul.msk.bf16.vlgmr.msrb.gmra.mxu3 %vm113_vm2, %v1674_v30 }
 0x28a   :  { %706 = vmatpush.bf16.msra.mxu2 %v1786_v18 }
 0x28b   :  { %v667_v33 = vpop.f32.mrf.mxu0 }
 0x28e   :  { %707 = vmatpush.bf16.msra.mxu2 %v1795_v20 }
 0x292   :  { %790 = vmatpush.bf16.msrb.mxu2 %v1834_v38 }
 0x293   :  { %v669_v34 = vpop.f32.mrf.mxu0 }
 0x294   :  { %v672_v36 = vpack.c.bf16 %v669_v34, %v667_v33 }
 0x296   :  { %791 = vmatpush.bf16.msrb.mxu2 %v1840_v40  ;;  %691 = vmatpush.bf16.msrb.mxu1 %v672_v36 }
 0x299   :  { %1534 = vmatmul.msk.bf16.vlgmr.msrb.gmra.mxu1 %vm113_vm2, %v1676_v37  ;;  %1535 = vmatmul.msk.bf16.vlgmr.msra.gmra.mxu2 %vm49_vm1, %v575_v21 }
 0x29a   :  { %874 = vmatpush.bf16.msra.mxu2 %v1865_v48 }
 0x29b   :  { %v751_v39 = vpop.f32.mrf.mxu0 }
 0x29e   :  { %875 = vmatpush.bf16.msra.mxu2 %v1871_v50 }
 0x2a3   :  { %v753_v41 = vpop.f32.mrf.mxu0 }
 0x2a4   :  { %v756_v43 = vpack.c.bf16 %v753_v41, %v751_v39  ;;  %v957_v39 = vpop.permute.xlu1 %956 }
 0x2a6   :  { %775 = vmatpush.bf16.msra.mxu1 %v756_v43 }
 0x2a9   :  { %1551 = vmatmul.msk.bf16.vlgmr.msrb.gmra.mxu2 %vm49_vm1, %v575_v21  ;;  %1550 = vmatmul.msk.bf16.vlgmr.msra.gmra.mxu1 %vm113_vm2, %v1678_v45 }
 0x2aa   :  { %978 = vmatpush.bf16.msrb.mxu2 %v1751_v6  ;;  %v1680_v6 = vld [vmem:[%s2087_s3 + $0x30] sm:$0xff] }
 0x2ab   :  { %v835_v46 = vpop.f32.mrf.mxu0 }
 0x2ae   :  { %979 = vmatpush.bf16.msrb.mxu2 %v1761_v8 }
 0x2b3   :  { %v837_v47 = vpop.f32.mrf.mxu0 }
 0x2b4   :  { %v840_v49 = vpack.c.bf16 %v837_v47, %v835_v46 }
 0x2b6   :  { %859 = vmatpush.bf16.msrb.mxu1 %v840_v49 }
 0x2b9   :  { %1567 = vmatmul.msk.bf16.vlgmr.msra.gmra.mxu2 %vm49_vm1, %v575_v21  ;;  %1566 = vmatmul.msk.bf16.vlgmr.msrb.gmra.mxu1 %vm113_vm2, %v1680_v6 }
 0x2ba   :  { %1057 = vmatpush.bf16.msra.mxu2 %v1799_v27  ;;  %v1677_v27 = vld [vmem:[%s2087_s3 + $0x18] sm:$0xff] }
 0x2bb   :  { %v919_v51 = vpop.f32.mrf.mxu0 }
 0x2be   :  { %1058 = vmatpush.bf16.msra.mxu2 %v1811_v31  ;;  %v1682_v31 = vld [vmem:[%s2087_s3 + $0x40] sm:$0xff] }
 0x2c3   :  { %v921_v54 = vpop.f32.mrf.mxu0 }
 0x2c4   :  { %v924_v56 = vpack.c.bf16 %v921_v54, %v919_v51 }
 0x2c6   :  { %943 = vmatpush.bf16.msra.mxu1 %v924_v56 }
 0x2c9   :  { %1582 = vmatmul.msk.bf16.vlgmr.msra.gmra.mxu1 %vm113_vm2, %v1682_v31 }
 0x30c   :  { %v631_v57 = vpop.f32.mrf.mxu2  ;;  %v653_v13 = vpop.f32.mrf.mxu3 }
 0x30d   :  { %v654_v22 = vadd.f32 %v653_v13, %v631_v57  ;;  %v962_v57 = vpop.permute.xlu1 %961  ;;  %v1691_v13 = vld [vmem:[%s2089_s5 + $0x40] sm:$0xff] }
 0x314   :  { %v633_v58 = vpop.f32.mrf.mxu2  ;;  %v655_v14 = vpop.f32.mrf.mxu3 }
 0x316   :  { %v693_v12 = vpop.f32.mrf.mxu1 }
 0x317   :  { %v698_v23 = vadd.f32 %v693_v12, %v654_v22  ;;  %v1688_v22 = vld [vmem:[%s2089_s5 + $0x28] sm:$0xff] }
 0x31c   :  { %v709_v8 = vpop.f32.mrf.mxu2 }
 0x31e   :  { %v695_v55 = vpop.f32.mrf.mxu1 }
 0x324   :  { %v711_v60 = vpop.f32.mrf.mxu2 }
 0x325   :  { %v714_v61 = vpack.c.bf16 %v711_v60, %v709_v8 }
 0x326   :  { %v777_v59 = vpop.f32.mrf.mxu1 }
 0x327   :  { %733 = vmatpush.bf16.msra.mxu3 %v714_v61 }
 0x32a   :  { %1542 = vmatmul.msk.bf16.vlgmr.msra.gmra.mxu3 %vm113_vm2, %v1677_v27 }
 0x32c   :  { %v793_v63 = vpop.f32.mrf.mxu2 }
 0x32e   :  { %v779_v16 = vpop.f32.mrf.mxu1 }
 0x334   :  { %v795_v1 = vpop.f32.mrf.mxu2 }
 0x335   :  { %v798_v2 = vpack.c.bf16 %v795_v1, %v793_v63 }
 0x336   :  { %v861_v19 = vpop.f32.mrf.mxu1 }
 0x337   :  { %817 = vmatpush.bf16.msrb.mxu3 %v798_v2 }
 0x33a   :  { %1558 = vmatmul.msk.bf16.vlgmr.msrb.gmra.mxu3 %vm113_vm2, %v1679_v3 }
 0x33c   :  { %v877_v4 = vpop.f32.mrf.mxu2 }
 0x33e   :  { %v863_v24 = vpop.f32.mrf.mxu1 }
 0x344   :  { %v879_v5 = vpop.f32.mrf.mxu2 }
 0x345   :  { %v882_v10 = vpack.c.bf16 %v879_v5, %v877_v4 }
 0x346   :  { %v945_v33 = vpop.f32.mrf.mxu1 }
 0x347   :  { %901 = vmatpush.bf16.msra.mxu3 %v882_v10  ;;  %v1689_v10 = vld [vmem:[%s2089_s5 + $0x30] sm:$0xff] }
 0x34a   :  { %1574 = vmatmul.msk.bf16.vlgmr.msra.gmra.mxu3 %vm113_vm2, %v1681_v11 }
 0x34b   :  { %995 = vmatpush.bf16.msrb.mxu3 %v1754_v7  ;;  %v656_v7 = vadd.f32 %v655_v14, %v633_v58 }
 0x34d   :  { %v699_v28 = vadd.f32 %v695_v55, %v656_v7 }
 0x34e   :  { %v947_v51 = vpop.f32.mrf.mxu1 }
 0x34f   :  { %996 = vmatpush.bf16.msrb.mxu3 %v1766_v9 }
 0x3ad   :  { %v735_v15 = vpop.f32.mrf.mxu3 }
 0x3ae   :  { %v740_v25 = vadd.f32 %v735_v15, %v698_v23  ;;  %v1345_v15 = vld [vmem:[%s2090_s6] sm:$0xff] }
 0x3af   :  { %1349 = vperm.xlu2 %1696, %v1345_v15  }
 0x3b0   :  { %v782_v29 = vadd.f32 %v777_v59, %v740_v25  ;;  %v1686_v59 = vld [vmem:[%s2089_s5 + $0x18] sm:$0xff] }
 0x3b5   :  { %v737_v17 = vpop.f32.mrf.mxu3 }
 0x3b6   :  { %v741_v30 = vadd.f32 %v737_v17, %v699_v28  ;;  %v1346_v17 = vld [vmem:[%s2090_s6 + $0x8] sm:$0xff] }
 0x3b7   :  { %1354 = vperm.xlu2 %1696, %v1346_v17  }
 0x3b8   :  { %v783_v36 = vadd.f32 %v779_v16, %v741_v30 }
 0x3bd   :  { %v819_v21 = vpop.f32.mrf.mxu3 }
 0x3be   :  { %v824_v9 = vadd.f32 %v819_v21, %v782_v29 }
 0x3c0   :  { %v866_v37 = vadd.f32 %v861_v19, %v824_v9 }
 0x3c5   :  { %v821_v26 = vpop.f32.mrf.mxu3 }
 0x3c6   :  { %v825_v41 = vadd.f32 %v821_v26, %v783_v36  ;;  %v1690_v26 = vld [vmem:[%s2089_s5 + $0x38] sm:$0xff] }
 0x3c8   :  { %v867_v46 = vadd.f32 %v863_v24, %v825_v41 }
 0x3cd   :  { %v903_v34 = vpop.f32.mrf.mxu3 }
 0x3ce   :  { %v908_v43 = vadd.f32 %v903_v34, %v866_v37 }
 0x3d0   :  { %v950_v45 = vadd.f32 %v945_v33, %v908_v43 }
 0x3d2   :  { %v964_v54 = vadd.f32 %v957_v39, %v950_v45 }
 0x3d4   :  { %v966_v6 = vmax.f32 %v964_v54, 0.0 }
 0x3d5   :  { %v905_v47 = vpop.f32.mrf.mxu3 }
 0x3d6   :  { %v909_v49 = vadd.f32 %v905_v47, %v867_v46 }
 0x3d8   :  { %v951_v56 = vadd.f32 %v947_v51, %v909_v49 }
 0x3da   :  { %v965_v58 = vadd.f32 %v962_v57, %v951_v56 }
 0x3dc   :  { %v967_v8 = vmax.f32 %v965_v58, 0.0 }
 0x3de   :  { %v968_v60 = vpack.c.bf16 %v967_v8, %v966_v6 }
 0x3e0   :  { %1583 = vmatmul.msk.bf16.vlgmr.msrb.gmra.mxu2 %vm49_vm1, %v968_v60  ;;  %1584 = vmatmul.msk.bf16.vlgmr.msrb.gmra.mxu3 %vm49_vm1, %v968_v60 }
 0x3e1   :  { %1141 = vmatpush.bf16.msrb.mxu2 %v1818_v32 }
 0x3e5   :  { %1142 = vmatpush.bf16.msrb.mxu2 %v1828_v35 }
 0x3f0   :  { %1597 = vmatmul.msk.bf16.vlgmr.msra.gmra.mxu2 %vm49_vm1, %v968_v60 }
 0x3f1   :  { %1225 = vmatpush.bf16.msra.mxu2 %v1845_v42  ;;  %v1684_v42 = vld [vmem:[%s2089_s5 + $0x8] sm:$0xff] }
 0x3f5   :  { %1226 = vmatpush.bf16.msra.mxu2 %v1858_v44  ;;  %v1683_v44 = vld [vmem:[%s2089_s5] sm:$0xff] }
 0x400   :  { %1613 = vmatmul.msk.bf16.vlgmr.msrb.gmra.mxu2 %vm49_vm1, %v968_v60 }
 0x401   :  { %1309 = vmatpush.bf16.msrb.mxu2 %v1876_v52 }
 0x405   :  { %1310 = vmatpush.bf16.msrb.mxu2 %v1888_v53 }
 0x410   :  { %1629 = vmatmul.msk.bf16.vlgmr.msra.gmra.mxu2 %vm49_vm1, %v968_v60 }
 0x420   :  { %1645 = vmatmul.msk.bf16.vlgmr.msrb.gmra.mxu2 %vm49_vm1, %v968_v60 }
 0x463   :  { %v981_v61 = vpop.f32.mrf.mxu2  ;;  %v998_v32 = vpop.f32.mrf.mxu3 }
 0x46b   :  { %v983_v27 = vpop.f32.mrf.mxu2  ;;  %v1000_v35 = vpop.f32.mrf.mxu3 }
 0x46c   :  { %v986_v31 = vpack.c.bf16 %v983_v27, %v981_v61  ;;  %v1003_v62 = vpack.c.bf16 %v1000_v35, %v998_v32  ;;  %v1350_v32 = vpop.permute.xlu2 %1349 }
 0x46e   :  { %1022 = vmatpush.bf16.msrb.mxu0 %v1003_v62  ;;  %1044 = vmatpush.bf16.msrb.mxu1 %v986_v31 }
 0x471   :  { %1591 = vmatmul.msk.bf16.vlgmr.msrb.gmra.mxu0 %vm113_vm2, %v1684_v42  ;;  %1596 = vmatmul.msk.bf16.vlgmr.msrb.gmra.mxu1 %vm113_vm2, %v1683_v44 }
 0x472   :  { %1099 = vmatpush.bf16.msra.mxu0 %v1786_v18 }
 0x473   :  { %v1060_v52 = vpop.f32.mrf.mxu2 }
 0x476   :  { %1100 = vmatpush.bf16.msra.mxu0 %v1795_v20 }
 0x47a   :  { %1183 = vmatpush.bf16.msrb.mxu0 %v1834_v38 }
 0x47b   :  { %v1062_v53 = vpop.f32.mrf.mxu2 }
 0x47c   :  { %v1065_v63 = vpack.c.bf16 %v1062_v53, %v1060_v52 }
 0x47e   :  { %1184 = vmatpush.bf16.msrb.mxu0 %v1840_v40  ;;  %1084 = vmatpush.bf16.msra.mxu3 %v1065_v63  ;;  %v1687_v40 = vld [vmem:[%s2089_s5 + $0x20] sm:$0xff] }
 0x481   :  { %1604 = vmatmul.msk.bf16.vlgmr.msra.gmra.mxu3 %vm113_vm2, %v1685_v0  ;;  %1605 = vmatmul.msk.bf16.vlgmr.msra.gmra.mxu0 %vm49_vm1, %v968_v60  ;;  %v1355_v0 = vpop.permute.xlu2 %1354 }
 0x482   :  { %1267 = vmatpush.bf16.msra.mxu0 %v1865_v48 }
 0x483   :  { %v1144_v18 = vpop.f32.mrf.mxu2 }
 0x486   :  { %1268 = vmatpush.bf16.msra.mxu0 %v1871_v50 }
 0x48b   :  { %v1146_v20 = vpop.f32.mrf.mxu2 }
 0x48c   :  { %v1149_v38 = vpack.c.bf16 %v1146_v20, %v1144_v18 }
 0x48e   :  { %1168 = vmatpush.bf16.msrb.mxu3 %v1149_v38 }
 0x491   :  { %1621 = vmatmul.msk.bf16.vlgmr.msrb.gmra.mxu0 %vm49_vm1, %v968_v60  ;;  %1620 = vmatmul.msk.bf16.vlgmr.msrb.gmra.mxu3 %vm113_vm2, %v1687_v40 }
 0x493   :  { %v1228_v1 = vpop.f32.mrf.mxu2 }
 0x49b   :  { %v1230_v2 = vpop.f32.mrf.mxu2 }
 0x49c   :  { %v1233_v3 = vpack.c.bf16 %v1230_v2, %v1228_v1 }
 0x49e   :  { %1252 = vmatpush.bf16.msra.mxu3 %v1233_v3 }
 0x4a1   :  { %1637 = vmatmul.msk.bf16.vlgmr.msra.gmra.mxu0 %vm49_vm1, %v968_v60  ;;  %1636 = vmatmul.msk.bf16.vlgmr.msra.gmra.mxu3 %vm113_vm2, %v1689_v10 }
 0x4a3   :  { %v1312_v48 = vpop.f32.mrf.mxu2 }
 0x4ab   :  { %v1314_v4 = vpop.f32.mrf.mxu2 }
 0x4ac   :  { %v1317_v50 = vpack.c.bf16 %v1314_v4, %v1312_v48 }
 0x4ae   :  { %1336 = vmatpush.bf16.msrb.mxu3 %v1317_v50 }
 0x4b1   :  { %1652 = vmatmul.msk.bf16.vlgmr.msrb.gmra.mxu3 %vm113_vm2, %v1691_v13 }
 0x4ee   :  { %v1024_v5 = vpop.f32.mrf.mxu0  ;;  %v1046_v28 = vpop.f32.mrf.mxu1 }
 0x4ef   :  { %v1047_v41 = vadd.f32 %v1046_v28, %v1024_v5 }
 0x4f6   :  { %v1026_v11 = vpop.f32.mrf.mxu0  ;;  %v1048_v30 = vpop.f32.mrf.mxu1 }
 0x4f7   :  { %v1049_v49 = vadd.f32 %v1048_v30, %v1026_v11 }
 0x4fe   :  { %v1102_v12 = vpop.f32.mrf.mxu0 }
 0x504   :  { %v1086_v7 = vpop.f32.mrf.mxu3 }
 0x505   :  { %v1091_v43 = vadd.f32 %v1086_v7, %v1047_v41 }
 0x506   :  { %v1104_v55 = vpop.f32.mrf.mxu0 }
 0x507   :  { %v1107_v14 = vpack.c.bf16 %v1104_v55, %v1102_v12 }
 0x509   :  { %1126 = vmatpush.bf16.msra.mxu1 %v1107_v14 }
 0x50c   :  { %1612 = vmatmul.msk.bf16.vlgmr.msra.gmra.mxu1 %vm113_vm2, %v1686_v59  ;;  %v1088_v29 = vpop.f32.mrf.mxu3 }
 0x50d   :  { %v1092_v54 = vadd.f32 %v1088_v29, %v1049_v49 }
 0x50e   :  { %v1186_v16 = vpop.f32.mrf.mxu0 }
 0x514   :  { %v1170_v9 = vpop.f32.mrf.mxu3 }
 0x516   :  { %v1188_v19 = vpop.f32.mrf.mxu0 }
 0x517   :  { %v1191_v21 = vpack.c.bf16 %v1188_v19, %v1186_v16 }
 0x519   :  { %1210 = vmatpush.bf16.msrb.mxu1 %v1191_v21 }
 0x51c   :  { %1628 = vmatmul.msk.bf16.vlgmr.msrb.gmra.mxu1 %vm113_vm2, %v1688_v22  ;;  %v1172_v34 = vpop.f32.mrf.mxu3 }
 0x51e   :  { %v1270_v23 = vpop.f32.mrf.mxu0 }
 0x524   :  { %v1254_v37 = vpop.f32.mrf.mxu3 }
 0x526   :  { %v1272_v24 = vpop.f32.mrf.mxu0 }
 0x527   :  { %v1275_v25 = vpack.c.bf16 %v1272_v24, %v1270_v23 }
 0x529   :  { %1294 = vmatpush.bf16.msra.mxu1 %v1275_v25 }
 0x52c   :  { %1644 = vmatmul.msk.bf16.vlgmr.msra.gmra.mxu1 %vm113_vm2, %v1690_v26  ;;  %v1256_v46 = vpop.f32.mrf.mxu3 }
 0x534   :  { %v1338_v8 = vpop.f32.mrf.mxu3 }
 0x53c   :  { %v1340_v53 = vpop.f32.mrf.mxu3 }
 0x589   :  { %v1128_v33 = vpop.f32.mrf.mxu1 }
 0x58a   :  { %v1133_v45 = vadd.f32 %v1128_v33, %v1091_v43 }
 0x58c   :  { %v1175_v51 = vadd.f32 %v1170_v9, %v1133_v45 }
 0x591   :  { %v1130_v36 = vpop.f32.mrf.mxu1 }
 0x592   :  { %v1134_v57 = vadd.f32 %v1130_v36, %v1092_v54 }
 0x594   :  { %v1176_v60 = vadd.f32 %v1172_v34, %v1134_v57 }
 0x599   :  { %v1212_v39 = vpop.f32.mrf.mxu1 }
 0x59a   :  { %v1217_v56 = vadd.f32 %v1212_v39, %v1175_v51 }
 0x59c   :  { %v1259_v58 = vadd.f32 %v1254_v37, %v1217_v56 }
 0x5a1   :  { %v1214_v47 = vpop.f32.mrf.mxu1 }
 0x5a2   :  { %v1218_v27 = vadd.f32 %v1214_v47, %v1176_v60 }
 0x5a4   :  { %v1260_v62 = vadd.f32 %v1256_v46, %v1218_v27 }
 0x5a9   :  { %v1296_v6 = vpop.f32.mrf.mxu1 }
 0x5aa   :  { %v1301_v61 = vadd.f32 %v1296_v6, %v1259_v58 }
 0x5ac   :  { %v1343_v35 = vadd.f32 %v1338_v8, %v1301_v61 }
 0x5ae   :  { %v1357_v31 = vadd.f32 %v1350_v32, %v1343_v35 }
 0x5b0   :  { %v1359_v42 = vpack.c.bf16 %v1357_v31, %v1357_v31 }
 0x5b1   :  { %v1298_v44 = vpop.f32.mrf.mxu1 }
 0x5b2   :  { %1362 = vst.msk [vmem:[%s2091_s8] sm:$0xf] %vm1361_vm3, %v1359_v42  ;;  %v1302_v52 = vadd.f32 %v1298_v44, %v1260_v62  ;;  %1366 = vrot.lane.b32.xlu0 %v1359_v42, %s1698_s30 }
 0x5b4   :  { %v1344_v63 = vadd.f32 %v1340_v53, %v1302_v52 }
 0x5b6   :  { %v1358_v18 = vadd.f32 %v1355_v0, %v1344_v63 }
 0x5b8   :  { %v1360_v20 = vpack.c.bf16 %v1358_v18, %v1358_v18 }
 0x5ba   :  { %1363 = vst.msk [vmem:[%s2091_s8 + $0x4] sm:$0xf] %vm1361_vm3, %v1360_v20  ;;  %1368 = vrot.lane.b32.xlu1 %v1360_v20, %s1698_s30 }
 0x624   :  { %v1367_v38 = vpop.permute.xlu0 %1366 }
 0x625   :  { %1653 = vst.msk [vmem:[%s2091_s8 + $0x8] sm:$0xf] %vm1361_vm3, %v1367_v38 }
 0x62c   :  { %v1369_v40 = vpop.permute.xlu1 %1368 }
 0x62d   :  { %1654 = vst.msk [vmem:[%s2091_s8 + $0xc] sm:$0xf] %vm1361_vm3, %v1369_v40 }

</bundles_post_ra>
